<compile_context>
chip_gen: v7x
topology: tpu7x:2x2x1
jax: 0.10.0
libtpu: 0.0.40
codegen_flags: <defaults>
</compile_context>

<pallas_src>
import jax
import jax.numpy as jnp
from jax.experimental import pallas as pl
from jax.experimental.pallas import tpu as pltpu


# ---------------------------------------------------------------------------
# Constant spatial operators (host-side, built once per configuration)
# ---------------------------------------------------------------------------
def _interp_matrix(size_out, size_in):
    """1-D bilinear interpolation matrix, align_corners=True (PyTorch)."""
    j = jnp.arange(size_out, dtype=jnp.float32)
    if size_out > 1:
        src = j * (size_in - 1) / (size_out - 1)
    else:
        src = jnp.zeros((size_out,), jnp.float32)
    i0 = jnp.clip(jnp.floor(src), 0, size_in - 1).astype(jnp.int32)
    i1 = jnp.clip(i0 + 1, 0, size_in - 1)
    frac = src - i0.astype(jnp.float32)
    m = jnp.zeros((size_out, size_in), jnp.float32)
    rows = jnp.arange(size_out)
    m = m.at[rows, i0].add(1.0 - frac)
    m = m.at[rows, i1].add(frac)
    return m


def _embed_matrix(H, W):
    """(H*W, (H+2)*(W+2)): scatter dense pixels into the zero-padded layout."""
    Wp = W + 2
    p = jnp.arange(H * W)
    q = (p // W + 1) * Wp + (p % W + 1)
    return (q[:, None] == jnp.arange((H + 2) * Wp)[None, :]).astype(jnp.float32)


def _extract_matrix(H, W):
    """(Pmid, H*W): gather dense pixels from the mid-range of the padded layout."""
    Wp = W + 2
    off = W + 3
    pmid = (H + 2) * Wp - 2 * off
    q_mid = jnp.arange(pmid) + off
    p = jnp.arange(H * W)
    q_valid = (p // W + 1) * Wp + (p % W + 1)
    return (q_mid[:, None] == q_valid[None, :]).astype(jnp.float32)


def _pool2x_matrix(H, W):
    """((H+2)*(W+2), (H//2+2)*(W//2+2)): 2x2 avg pool, padded -> padded layout."""
    Hd, Wd = H // 2, W // 2
    Wsp, Wdp = W + 2, Wd + 2
    qs = jnp.arange((H + 2) * Wsp)
    ys, xs = qs // Wsp - 1, qs % Wsp - 1
    s_ok = (ys >= 0) & (ys < H) & (xs >= 0) & (xs < W)
    qd = jnp.arange((Hd + 2) * Wdp)
    yd, xd = qd // Wdp - 1, qd % Wdp - 1
    d_ok = (yd >= 0) & (yd < Hd) & (xd >= 0) & (xd < Wd)
    hit = (ys[:, None] // 2 == yd[None, :]) & (xs[:, None] // 2 == xd[None, :])
    return jnp.where(s_ok[:, None] & d_ok[None, :] & hit, 0.25, 0.0).astype(jnp.float32)


def _const_index_map(ndim):
    zeros = (0,) * ndim
    return lambda n: zeros


# ---------------------------------------------------------------------------
# Fused HRFPN forward builder
# ---------------------------------------------------------------------------
def build_hrfpn(in_channels_list, out_channels, num_outs, input_hw,
                dtype=jnp.float32):
    """Build the fused forward for a fixed configuration.

    input_hw: (H, W) for every entry of in_channels_list (aligned by index).
    Returns forward(inputs_nchw_list, params) -> tuple of num_outs NCHW arrays.
    """
    active = [i for i, c in enumerate(in_channels_list) if c != 0]
    start = active[0]
    cin = [in_channels_list[i] for i in active]
    hw_in = [input_hw[i] for i in active]
    scale = [2 ** (i - start) for i in active]
    H0, W0 = hw_in[0]
    Cout = out_channels
    n_b = len(active)
    n_pool = num_outs - 1

    lvl_hw = [(H0 // (2 ** l), W0 // (2 ** l)) for l in range(num_outs)]
    p0_pad = (H0 + 2) * (W0 + 2)

    # ---- constant spatial operators (computed once, reused every call) ----
    embed0 = _embed_matrix(H0, W0)                        # (H0*W0, p0_pad)
    branch_ops = []
    for k in range(n_b):
        h, w = hw_in[k]
        if scale[k] == 1:
            branch_ops.append(embed0)
        else:
            u = jnp.kron(_interp_matrix(h * scale[k], h),
                         _interp_matrix(w * scale[k], w))  # (H0*W0, h*w)
            branch_ops.append(jnp.dot(u.T, embed0))        # (h*w, p0_pad)
    valid0 = jnp.sum(embed0, axis=0)                       # 1 on valid pixels
    pool_ops = [_pool2x_matrix(*lvl_hw[l - 1]) for l in range(1, num_outs)]
    extract_ops = [_extract_matrix(*lvl_hw[l]) for l in range(num_outs)]

    # ---- the fused kernel (one grid step = one batch element) -------------
    def kernel(*refs):
        k = 0
        x_refs = refs[k:k + n_b]; k += n_b
        wr_refs = refs[k:k + n_b]; k += n_b
        op_refs = refs[k:k + n_b]; k += n_b
        bpad_ref = refs[k]; k += 1
        pool_refs = refs[k:k + n_pool]; k += n_pool
        fw_ref = refs[k]; k += 1
        fb_ref = refs[k]; k += 1
        e_refs = refs[k:k + num_outs]; k += num_outs
        out_refs = refs[k:k + num_outs]

        f32 = jnp.float32

        # (a) upsample + concat + 1x1 reduction conv as one matmul chain.
        #     Result: level-0 feature, channels-first, zero-padded (H0+2,W0+2)
        #     row-major pixel layout (bias only on valid pixels).
        red = bpad_ref[...].astype(f32)                     # (Cout, p0_pad)
        for xr, wr, opr in zip(x_refs, wr_refs, op_refs):
            t = jnp.dot(wr[...].astype(f32), xr[0].astype(f32),
                        preferred_element_type=f32)          # (Cout, h*w)
            red = red + jnp.dot(t, opr[...], preferred_element_type=f32)

        # (b) cascaded 2x2 average pools (padded layout -> padded layout)
        feats = [red]
        for pr in pool_refs:
            feats.append(jnp.dot(feats[-1], pr[...], preferred_element_type=f32))

        # (c) per-level 3x3 conv (padding=1): nine accumulating matmuls over
        #     statically shifted views of the padded feature, then one
        #     selection matmul back to the dense H*W pixel layout.
        for l in range(num_outs):
            h, w = lvl_hw[l]
            wp = w + 2
            off = w + 3
            pmid = (h + 2) * wp - 2 * off
            feat = feats[l]
            acc = None
            for t9 in range(9):
                dy, dx = t9 // 3, t9 % 3
                s = (dy - 1) * wp + (dx - 1)
                term = jnp.dot(fw_ref[l, t9],
                               feat[:, off + s:off + s + pmid],
                               preferred_element_type=f32)
                acc = term if acc is None else acc + term
            if pmid == h * w:            # h == 1: extraction is the identity
                y = acc + fb_ref[l]
            else:
                y = jnp.dot(acc, e_refs[l][...], preferred_element_type=f32)
                y = y + fb_ref[l]
            out_refs[l][...] = y.astype(out_refs[l].dtype)

    # ---- host wrapper ------------------------------------------------------
    def forward(inputs_nchw, params):
        # module semantics: keep only the trailing len(in_channels_list) inputs
        if len(inputs_nchw) >= len(in_channels_list):
            inputs_nchw = inputs_nchw[len(inputs_nchw) - len(in_channels_list):]
        N = inputs_nchw[active[0]].shape[0]

        # channels-first pixel-flattened views (pure reshape, no transpose/pad)
        xs = [inputs_nchw[i].reshape(N, cin[k], hw_in[k][0] * hw_in[k][1])
              for k, i in enumerate(active)]

        # split the 1x1 reduction weight by concatenation channel group
        offs = [0]
        for c in cin:
            offs.append(offs[-1] + c)
        wrs = [params["red_w"][:, offs[k]:offs[k + 1]] for k in range(n_b)]
        bpad = params["red_b"][:, None] * valid0[None, :]    # (Cout, p0_pad)

        args = (xs + wrs + list(branch_ops) + [bpad] + list(pool_ops)
                + [params["fpn_w"], params["fpn_b"]] + list(extract_ops))

        in_specs = []
        for k in range(n_b):
            blk = (1, cin[k], hw_in[k][0] * hw_in[k][1])
            in_specs.append(pl.BlockSpec(blk, lambda n: (n, 0, 0)))
        for a in args[n_b:]:   # grid-invariant operators / weights: full block
            in_specs.append(pl.BlockSpec(a.shape, _const_index_map(a.ndim)))

        out_shape = tuple(jax.ShapeDtypeStruct((N * Cout, h * w), dtype)
                          for (h, w) in lvl_hw)
        out_specs = tuple(pl.BlockSpec((Cout, h * w), lambda n: (n, 0))
                          for (h, w) in lvl_hw)

        outs = pl.pallas_call(
            kernel,
            out_shape=out_shape,
            grid=(N,),
            in_specs=in_specs,
            out_specs=out_specs,
            compiler_params=pltpu.CompilerParams(
                dimension_semantics=("parallel",)),
        )(*args)
        # (N*Cout, H*W) -> NCHW is a free reshape (no transpose)
        return tuple(o.reshape(N, Cout, h, w)
                     for o, (h, w) in zip(outs, lvl_hw))

    return forward


# ---------------------------------------------------------------------------
# Parameters (deterministic; match nn.Module init: kaiming_normal_(a=1), bias 0)
# ---------------------------------------------------------------------------
def init_params(key, in_channels_list, out_channels, num_outs, dtype=jnp.float32):
    cin = sum(in_channels_list)
    k_red, k_fpn = jax.random.split(key)
    params = {}
    # kaiming_normal_(a=1): std = sqrt(2 / (1 + 1) / fan_in) = 1 / sqrt(fan_in)
    params["red_w"] = (jax.random.normal(k_red, (out_channels, cin), dtype)
                       * (1.0 / cin) ** 0.5)
    params["red_b"] = jnp.zeros((out_channels,), dtype)
    fan_in = out_channels * 9
    # fpn weights stored tap-major: (level, ky*3+kx, out_ch, in_ch)
    params["fpn_w"] = (jax.random.normal(
        k_fpn, (num_outs, 9, out_channels, out_channels), dtype)
        * (1.0 / fan_in) ** 0.5)
    params["fpn_b"] = jnp.zeros((num_outs, out_channels, 1), dtype)
    return params


# ---------------------------------------------------------------------------
# Pure-XLA reference of the PyTorch forward (for validation only)
# ---------------------------------------------------------------------------
def reference_forward(inputs_nchw, params, in_channels_list, num_outs):
    hi = jax.lax.Precision.HIGHEST
    if len(inputs_nchw) >= len(in_channels_list):
        inputs_nchw = inputs_nchw[len(inputs_nchw) - len(in_channels_list):]
    outs = []
    start = None
    for i, c in enumerate(in_channels_list):
        if c == 0:
            continue
        if start is None:
            start = i
            outs.append(inputs_nchw[i])
        else:
            s = 2 ** (i - start)
            x = inputs_nchw[i]
            ah = _interp_matrix(x.shape[2] * s, x.shape[2])
            aw = _interp_matrix(x.shape[3] * s, x.shape[3])
            outs.append(jnp.einsum('ph,nchw,qw->ncpq', ah, x, aw, precision=hi))
    cat = jnp.concatenate(outs, axis=1)
    red = (jnp.einsum('oc,nchw->nohw', params["red_w"], cat, precision=hi)
           + params["red_b"][None, :, None, None])
    feats = [red]
    for _ in range(1, num_outs):
        p = feats[-1]
        n, c, h, w = p.shape
        feats.append(p.reshape(n, c, h // 2, 2, w // 2, 2).mean(axis=(3, 5)))
    outputs = []
    for l in range(num_outs):
        f = feats[l]
        n, c, h, w = f.shape
        fp = jnp.pad(f, ((0, 0), (0, 0), (1, 1), (1, 1)))
        acc = jnp.zeros((n, params["fpn_w"].shape[2], h, w), jnp.float32)
        for t in range(9):
            dy, dx = t // 3, t % 3
            acc = acc + jnp.einsum('oc,nchw->nohw', params["fpn_w"][l, t],
                                   fp[:, :, dy:dy + h, dx:dx + w], precision=hi)
        outputs.append(acc + params["fpn_b"][l].reshape(1, -1, 1, 1))
    return tuple(outputs)


if __name__ == "__main__":
    key = jax.random.PRNGKey(0)
    in_channels_list = [4, 8]
    out_channels = 16
    num_outs = 5
    input_hw = [(16, 16), (8, 8)]

    k0, k1, kp = jax.random.split(key, 3)
    x0 = jax.random.normal(k0, (2, 4, 16, 16), jnp.float32)   # level 0 (hi-res)
    x1 = jax.random.normal(k1, (2, 8, 8, 8), jnp.float32)     # level 1 (half-res)

    params = init_params(kp, in_channels_list, out_channels, num_outs)
    forward = build_hrfpn(in_channels_list, out_channels, num_outs, input_hw)

    outs = forward([x0, x1], params)
    outs = jax.block_until_ready(outs)

    expected = ((2, 16, 16, 16), (2, 16, 8, 8), (2, 16, 4, 4),
                (2, 16, 2, 2), (2, 16, 1, 1))
    assert tuple(o.shape for o in outs) == expected
    assert all(bool(jnp.all(jnp.isfinite(o))) for o in outs)

    # validate against a pure-XLA reference of the PyTorch forward
    refs = reference_forward([x0, x1], params, in_channels_list, num_outs)
    for o, r in zip(outs, refs):
        assert float(jnp.max(jnp.abs(o - r))) < 5e-2, "mismatch vs reference"

    print("KERNEL_OK")
</pallas_src>

<mosaic_0001>
module attributes {stable_mosaic.version = 11 : i64} {
  func.func @kernel(%arg0: i32, %arg1: memref<1x4x256xf32, #tpu.memory_space<vmem>>, %arg2: memref<1x8x64xf32, #tpu.memory_space<vmem>>, %arg3: memref<16x4xf32, #tpu.memory_space<vmem>>, %arg4: memref<16x8xf32, #tpu.memory_space<vmem>>, %arg5: memref<256x324xf32, #tpu.memory_space<vmem>>, %arg6: memref<64x324xf32, #tpu.memory_space<vmem>>, %arg7: memref<16x324xf32, #tpu.memory_space<vmem>>, %arg8: memref<324x100xf32, #tpu.memory_space<vmem>>, %arg9: memref<100x36xf32, #tpu.memory_space<vmem>>, %arg10: memref<36x16xf32, #tpu.memory_space<vmem>>, %arg11: memref<16x9xf32, #tpu.memory_space<vmem>>, %arg12: memref<5x9x16x16xf32, #tpu.memory_space<vmem>>, %arg13: memref<5x16x1xf32, #tpu.memory_space<vmem>>, %arg14: memref<286x256xf32, #tpu.memory_space<vmem>>, %arg15: memref<78x64xf32, #tpu.memory_space<vmem>>, %arg16: memref<22x16xf32, #tpu.memory_space<vmem>>, %arg17: memref<6x4xf32, #tpu.memory_space<vmem>>, %arg18: memref<1x1xf32, #tpu.memory_space<vmem>>, %arg19: memref<16x256xf32, #tpu.memory_space<vmem>>, %arg20: memref<16x64xf32, #tpu.memory_space<vmem>>, %arg21: memref<16x16xf32, #tpu.memory_space<vmem>>, %arg22: memref<16x4xf32, #tpu.memory_space<vmem>>, %arg23: memref<16x1xf32, #tpu.memory_space<vmem>>) attributes {dimension_semantics = [#tpu.dimension_semantics<parallel>], iteration_bounds = array<i64: 2>, scalar_prefetch = 0 : i64, scratch_operands = 0 : i64, tpu.core_type = #tpu.core_type<tc>, window_params = [{transform_indices = @transform_0, window_bounds = array<i64: 1, 4, 256>}, {transform_indices = @transform_1, window_bounds = array<i64: 1, 8, 64>}, {pipeline_mode = #tpu.pipeline_mode<synchronous>, transform_indices = @transform_2, window_bounds = array<i64: 16, 4>}, {pipeline_mode = #tpu.pipeline_mode<synchronous>, transform_indices = @transform_3, window_bounds = array<i64: 16, 8>}, {pipeline_mode = #tpu.pipeline_mode<synchronous>, transform_indices = @transform_4, window_bounds = array<i64: 256, 324>}, {pipeline_mode = #tpu.pipeline_mode<synchronous>, transform_indices = @transform_5, window_bounds = array<i64: 64, 324>}, {pipeline_mode = #tpu.pipeline_mode<synchronous>, transform_indices = @transform_6, window_bounds = array<i64: 16, 324>}, {pipeline_mode = #tpu.pipeline_mode<synchronous>, transform_indices = @transform_7, window_bounds = array<i64: 324, 100>}, {pipeline_mode = #tpu.pipeline_mode<synchronous>, transform_indices = @transform_8, window_bounds = array<i64: 100, 36>}, {pipeline_mode = #tpu.pipeline_mode<synchronous>, transform_indices = @transform_9, window_bounds = array<i64: 36, 16>}, {pipeline_mode = #tpu.pipeline_mode<synchronous>, transform_indices = @transform_10, window_bounds = array<i64: 16, 9>}, {pipeline_mode = #tpu.pipeline_mode<synchronous>, transform_indices = @transform_11, window_bounds = array<i64: 5, 9, 16, 16>}, {pipeline_mode = #tpu.pipeline_mode<synchronous>, transform_indices = @transform_12, window_bounds = array<i64: 5, 16, 1>}, {pipeline_mode = #tpu.pipeline_mode<synchronous>, transform_indices = @transform_13, window_bounds = array<i64: 286, 256>}, {pipeline_mode = #tpu.pipeline_mode<synchronous>, transform_indices = @transform_14, window_bounds = array<i64: 78, 64>}, {pipeline_mode = #tpu.pipeline_mode<synchronous>, transform_indices = @transform_15, window_bounds = array<i64: 22, 16>}, {pipeline_mode = #tpu.pipeline_mode<synchronous>, transform_indices = @transform_16, window_bounds = array<i64: 6, 4>}, {pipeline_mode = #tpu.pipeline_mode<synchronous>, transform_indices = @transform_17, window_bounds = array<i64: 1, 1>}, {transform_indices = @transform_18, window_bounds = array<i64: 16, 256>}, {transform_indices = @transform_19, window_bounds = array<i64: 16, 64>}, {transform_indices = @transform_20, window_bounds = array<i64: 16, 16>}, {transform_indices = @transform_21, window_bounds = array<i64: 16, 4>}, {transform_indices = @transform_22, window_bounds = array<i64: 16, 1>}]} {
    %c0 = arith.constant 0 : index
    %c0_0 = arith.constant 0 : index
    %0 = vector.load %arg7[%c0, %c0_0] : memref<16x324xf32, #tpu.memory_space<vmem>>, vector<16x324xf32>
    %c0_1 = arith.constant 0 : index
    %c0_2 = arith.constant 0 : index
    %1 = vector.load %arg3[%c0_1, %c0_2] : memref<16x4xf32, #tpu.memory_space<vmem>>, vector<16x4xf32>
    %c0_3 = arith.constant 0 : index
    %c0_4 = arith.constant 0 : index
    %c0_5 = arith.constant 0 : index
    %2 = vector.load %arg1[%c0_3, %c0_4, %c0_5] : memref<1x4x256xf32, #tpu.memory_space<vmem>>, vector<1x4x256xf32>
    %3 = vector.shape_cast %2 : vector<1x4x256xf32> to vector<4x256xf32>
    %cst = arith.constant dense<0.000000e+00> : vector<16x256xf32>
    %4 = tpu.matmul %1, %3, %cst {dimension_numbers = #tpu.dot_dimension_numbers<[1], [0], [0], [1], [0, 0, 1, 1], [], []>} : vector<16x4xf32>, vector<4x256xf32>, vector<16x256xf32> -> vector<16x256xf32>
    %c0_6 = arith.constant 0 : index
    %c0_7 = arith.constant 0 : index
    %5 = vector.load %arg5[%c0_6, %c0_7] : memref<256x324xf32, #tpu.memory_space<vmem>>, vector<256x324xf32>
    %cst_8 = arith.constant dense<0.000000e+00> : vector<16x324xf32>
    %6 = tpu.matmul %4, %5, %cst_8 {dimension_numbers = #tpu.dot_dimension_numbers<[1], [0], [0], [1], [0, 0, 1, 1], [], []>} : vector<16x256xf32>, vector<256x324xf32>, vector<16x324xf32> -> vector<16x324xf32>
    %7 = arith.addf %0, %6 : vector<16x324xf32>
    %c0_9 = arith.constant 0 : index
    %c0_10 = arith.constant 0 : index
    %8 = vector.load %arg4[%c0_9, %c0_10] : memref<16x8xf32, #tpu.memory_space<vmem>>, vector<16x8xf32>
    %c0_11 = arith.constant 0 : index
    %c0_12 = arith.constant 0 : index
    %c0_13 = arith.constant 0 : index
    %9 = vector.load %arg2[%c0_11, %c0_12, %c0_13] : memref<1x8x64xf32, #tpu.memory_space<vmem>>, vector<1x8x64xf32>
    %10 = vector.shape_cast %9 : vector<1x8x64xf32> to vector<8x64xf32>
    %cst_14 = arith.constant dense<0.000000e+00> : vector<16x64xf32>
    %11 = tpu.matmul %8, %10, %cst_14 {dimension_numbers = #tpu.dot_dimension_numbers<[1], [0], [0], [1], [0, 0, 1, 1], [], []>} : vector<16x8xf32>, vector<8x64xf32>, vector<16x64xf32> -> vector<16x64xf32>
    %c0_15 = arith.constant 0 : index
    %c0_16 = arith.constant 0 : index
    %12 = vector.load %arg6[%c0_15, %c0_16] : memref<64x324xf32, #tpu.memory_space<vmem>>, vector<64x324xf32>
    %cst_17 = arith.constant dense<0.000000e+00> : vector<16x324xf32>
    %13 = tpu.matmul %11, %12, %cst_17 {dimension_numbers = #tpu.dot_dimension_numbers<[1], [0], [0], [1], [0, 0, 1, 1], [], []>} : vector<16x64xf32>, vector<64x324xf32>, vector<16x324xf32> -> vector<16x324xf32>
    %14 = arith.addf %7, %13 : vector<16x324xf32>
    %c0_18 = arith.constant 0 : index
    %c0_19 = arith.constant 0 : index
    %15 = vector.load %arg8[%c0_18, %c0_19] : memref<324x100xf32, #tpu.memory_space<vmem>>, vector<324x100xf32>
    %cst_20 = arith.constant dense<0.000000e+00> : vector<16x100xf32>
    %16 = tpu.matmul %14, %15, %cst_20 {dimension_numbers = #tpu.dot_dimension_numbers<[1], [0], [0], [1], [0, 0, 1, 1], [], []>} : vector<16x324xf32>, vector<324x100xf32>, vector<16x100xf32> -> vector<16x100xf32>
    %c0_21 = arith.constant 0 : index
    %c0_22 = arith.constant 0 : index
    %17 = vector.load %arg9[%c0_21, %c0_22] : memref<100x36xf32, #tpu.memory_space<vmem>>, vector<100x36xf32>
    %cst_23 = arith.constant dense<0.000000e+00> : vector<16x36xf32>
    %18 = tpu.matmul %16, %17, %cst_23 {dimension_numbers = #tpu.dot_dimension_numbers<[1], [0], [0], [1], [0, 0, 1, 1], [], []>} : vector<16x100xf32>, vector<100x36xf32>, vector<16x36xf32> -> vector<16x36xf32>
    %c0_24 = arith.constant 0 : index
    %c0_25 = arith.constant 0 : index
    %19 = vector.load %arg10[%c0_24, %c0_25] : memref<36x16xf32, #tpu.memory_space<vmem>>, vector<36x16xf32>
    %cst_26 = arith.constant dense<0.000000e+00> : vector<16x16xf32>
    %20 = tpu.matmul %18, %19, %cst_26 {dimension_numbers = #tpu.dot_dimension_numbers<[1], [0], [0], [1], [0, 0, 1, 1], [], []>} : vector<16x36xf32>, vector<36x16xf32>, vector<16x16xf32> -> vector<16x16xf32>
    %c0_27 = arith.constant 0 : index
    %c0_28 = arith.constant 0 : index
    %21 = vector.load %arg11[%c0_27, %c0_28] : memref<16x9xf32, #tpu.memory_space<vmem>>, vector<16x9xf32>
    %cst_29 = arith.constant dense<0.000000e+00> : vector<16x9xf32>
    %22 = tpu.matmul %20, %21, %cst_29 {dimension_numbers = #tpu.dot_dimension_numbers<[1], [0], [0], [1], [0, 0, 1, 1], [], []>} : vector<16x16xf32>, vector<16x9xf32>, vector<16x9xf32> -> vector<16x9xf32>
    %c0_30 = arith.constant 0 : index
    %c0_31 = arith.constant 0 : index
    %c0_32 = arith.constant 0 : index
    %c0_33 = arith.constant 0 : index
    %23 = vector.load %arg12[%c0_30, %c0_31, %c0_32, %c0_33] : memref<5x9x16x16xf32, #tpu.memory_space<vmem>>, vector<1x1x16x16xf32>
    %24 = vector.shape_cast %23 : vector<1x1x16x16xf32> to vector<16x16xf32>
    %25 = vector.extract_strided_slice %14 {offsets = [0, 0], sizes = [16, 286], strides = [1, 1]} : vector<16x324xf32> to vector<16x286xf32>
    %cst_34 = arith.constant dense<0.000000e+00> : vector<16x286xf32>
    %26 = tpu.matmul %24, %25, %cst_34 {dimension_numbers = #tpu.dot_dimension_numbers<[1], [0], [0], [1], [0, 0, 1, 1], [], []>} : vector<16x16xf32>, vector<16x286xf32>, vector<16x286xf32> -> vector<16x286xf32>
    %c0_35 = arith.constant 0 : index
    %c1 = arith.constant 1 : index
    %c0_36 = arith.constant 0 : index
    %c0_37 = arith.constant 0 : index
    %27 = vector.load %arg12[%c0_35, %c1, %c0_36, %c0_37] : memref<5x9x16x16xf32, #tpu.memory_space<vmem>>, vector<1x1x16x16xf32>
    %28 = vector.shape_cast %27 : vector<1x1x16x16xf32> to vector<16x16xf32>
    %29 = vector.extract_strided_slice %14 {offsets = [0, 1], sizes = [16, 286], strides = [1, 1]} : vector<16x324xf32> to vector<16x286xf32>
    %cst_38 = arith.constant dense<0.000000e+00> : vector<16x286xf32>
    %30 = tpu.matmul %28, %29, %cst_38 {dimension_numbers = #tpu.dot_dimension_numbers<[1], [0], [0], [1], [0, 0, 1, 1], [], []>} : vector<16x16xf32>, vector<16x286xf32>, vector<16x286xf32> -> vector<16x286xf32>
    %31 = arith.addf %26, %30 : vector<16x286xf32>
    %c0_39 = arith.constant 0 : index
    %c2 = arith.constant 2 : index
    %c0_40 = arith.constant 0 : index
    %c0_41 = arith.constant 0 : index
    %32 = vector.load %arg12[%c0_39, %c2, %c0_40, %c0_41] : memref<5x9x16x16xf32, #tpu.memory_space<vmem>>, vector<1x1x16x16xf32>
    %33 = vector.shape_cast %32 : vector<1x1x16x16xf32> to vector<16x16xf32>
    %34 = vector.extract_strided_slice %14 {offsets = [0, 2], sizes = [16, 286], strides = [1, 1]} : vector<16x324xf32> to vector<16x286xf32>
    %cst_42 = arith.constant dense<0.000000e+00> : vector<16x286xf32>
    %35 = tpu.matmul %33, %34, %cst_42 {dimension_numbers = #tpu.dot_dimension_numbers<[1], [0], [0], [1], [0, 0, 1, 1], [], []>} : vector<16x16xf32>, vector<16x286xf32>, vector<16x286xf32> -> vector<16x286xf32>
    %36 = arith.addf %31, %35 : vector<16x286xf32>
    %c0_43 = arith.constant 0 : index
    %c3 = arith.constant 3 : index
    %c0_44 = arith.constant 0 : index
    %c0_45 = arith.constant 0 : index
    %37 = vector.load %arg12[%c0_43, %c3, %c0_44, %c0_45] : memref<5x9x16x16xf32, #tpu.memory_space<vmem>>, vector<1x1x16x16xf32>
    %38 = vector.shape_cast %37 : vector<1x1x16x16xf32> to vector<16x16xf32>
    %39 = vector.extract_strided_slice %14 {offsets = [0, 18], sizes = [16, 286], strides = [1, 1]} : vector<16x324xf32> to vector<16x286xf32>
    %cst_46 = arith.constant dense<0.000000e+00> : vector<16x286xf32>
    %40 = tpu.matmul %38, %39, %cst_46 {dimension_numbers = #tpu.dot_dimension_numbers<[1], [0], [0], [1], [0, 0, 1, 1], [], []>} : vector<16x16xf32>, vector<16x286xf32>, vector<16x286xf32> -> vector<16x286xf32>
    %41 = arith.addf %36, %40 : vector<16x286xf32>
    %c0_47 = arith.constant 0 : index
    %c4 = arith.constant 4 : index
    %c0_48 = arith.constant 0 : index
    %c0_49 = arith.constant 0 : index
    %42 = vector.load %arg12[%c0_47, %c4, %c0_48, %c0_49] : memref<5x9x16x16xf32, #tpu.memory_space<vmem>>, vector<1x1x16x16xf32>
    %43 = vector.shape_cast %42 : vector<1x1x16x16xf32> to vector<16x16xf32>
    %44 = vector.extract_strided_slice %14 {offsets = [0, 19], sizes = [16, 286], strides = [1, 1]} : vector<16x324xf32> to vector<16x286xf32>
    %cst_50 = arith.constant dense<0.000000e+00> : vector<16x286xf32>
    %45 = tpu.matmul %43, %44, %cst_50 {dimension_numbers = #tpu.dot_dimension_numbers<[1], [0], [0], [1], [0, 0, 1, 1], [], []>} : vector<16x16xf32>, vector<16x286xf32>, vector<16x286xf32> -> vector<16x286xf32>
    %46 = arith.addf %41, %45 : vector<16x286xf32>
    %c0_51 = arith.constant 0 : index
    %c5 = arith.constant 5 : index
    %c0_52 = arith.constant 0 : index
    %c0_53 = arith.constant 0 : index
    %47 = vector.load %arg12[%c0_51, %c5, %c0_52, %c0_53] : memref<5x9x16x16xf32, #tpu.memory_space<vmem>>, vector<1x1x16x16xf32>
    %48 = vector.shape_cast %47 : vector<1x1x16x16xf32> to vector<16x16xf32>
    %49 = vector.extract_strided_slice %14 {offsets = [0, 20], sizes = [16, 286], strides = [1, 1]} : vector<16x324xf32> to vector<16x286xf32>
    %cst_54 = arith.constant dense<0.000000e+00> : vector<16x286xf32>
    %50 = tpu.matmul %48, %49, %cst_54 {dimension_numbers = #tpu.dot_dimension_numbers<[1], [0], [0], [1], [0, 0, 1, 1], [], []>} : vector<16x16xf32>, vector<16x286xf32>, vector<16x286xf32> -> vector<16x286xf32>
    %51 = arith.addf %46, %50 : vector<16x286xf32>
    %c0_55 = arith.constant 0 : index
    %c6 = arith.constant 6 : index
    %c0_56 = arith.constant 0 : index
    %c0_57 = arith.constant 0 : index
    %52 = vector.load %arg12[%c0_55, %c6, %c0_56, %c0_57] : memref<5x9x16x16xf32, #tpu.memory_space<vmem>>, vector<1x1x16x16xf32>
    %53 = vector.shape_cast %52 : vector<1x1x16x16xf32> to vector<16x16xf32>
    %54 = vector.extract_strided_slice %14 {offsets = [0, 36], sizes = [16, 286], strides = [1, 1]} : vector<16x324xf32> to vector<16x286xf32>
    %cst_58 = arith.constant dense<0.000000e+00> : vector<16x286xf32>
    %55 = tpu.matmul %53, %54, %cst_58 {dimension_numbers = #tpu.dot_dimension_numbers<[1], [0], [0], [1], [0, 0, 1, 1], [], []>} : vector<16x16xf32>, vector<16x286xf32>, vector<16x286xf32> -> vector<16x286xf32>
    %56 = arith.addf %51, %55 : vector<16x286xf32>
    %c0_59 = arith.constant 0 : index
    %c7 = arith.constant 7 : index
    %c0_60 = arith.constant 0 : index
    %c0_61 = arith.constant 0 : index
    %57 = vector.load %arg12[%c0_59, %c7, %c0_60, %c0_61] : memref<5x9x16x16xf32, #tpu.memory_space<vmem>>, vector<1x1x16x16xf32>
    %58 = vector.shape_cast %57 : vector<1x1x16x16xf32> to vector<16x16xf32>
    %59 = vector.extract_strided_slice %14 {offsets = [0, 37], sizes = [16, 286], strides = [1, 1]} : vector<16x324xf32> to vector<16x286xf32>
    %cst_62 = arith.constant dense<0.000000e+00> : vector<16x286xf32>
    %60 = tpu.matmul %58, %59, %cst_62 {dimension_numbers = #tpu.dot_dimension_numbers<[1], [0], [0], [1], [0, 0, 1, 1], [], []>} : vector<16x16xf32>, vector<16x286xf32>, vector<16x286xf32> -> vector<16x286xf32>
    %61 = arith.addf %56, %60 : vector<16x286xf32>
    %c0_63 = arith.constant 0 : index
    %c8 = arith.constant 8 : index
    %c0_64 = arith.constant 0 : index
    %c0_65 = arith.constant 0 : index
    %62 = vector.load %arg12[%c0_63, %c8, %c0_64, %c0_65] : memref<5x9x16x16xf32, #tpu.memory_space<vmem>>, vector<1x1x16x16xf32>
    %63 = vector.shape_cast %62 : vector<1x1x16x16xf32> to vector<16x16xf32>
    %64 = vector.extract_strided_slice %14 {offsets = [0, 38], sizes = [16, 286], strides = [1, 1]} : vector<16x324xf32> to vector<16x286xf32>
    %cst_66 = arith.constant dense<0.000000e+00> : vector<16x286xf32>
    %65 = tpu.matmul %63, %64, %cst_66 {dimension_numbers = #tpu.dot_dimension_numbers<[1], [0], [0], [1], [0, 0, 1, 1], [], []>} : vector<16x16xf32>, vector<16x286xf32>, vector<16x286xf32> -> vector<16x286xf32>
    %66 = arith.addf %61, %65 : vector<16x286xf32>
    %c0_67 = arith.constant 0 : index
    %c0_68 = arith.constant 0 : index
    %67 = vector.load %arg14[%c0_67, %c0_68] : memref<286x256xf32, #tpu.memory_space<vmem>>, vector<286x256xf32>
    %cst_69 = arith.constant dense<0.000000e+00> : vector<16x256xf32>
    %68 = tpu.matmul %66, %67, %cst_69 {dimension_numbers = #tpu.dot_dimension_numbers<[1], [0], [0], [1], [0, 0, 1, 1], [], []>} : vector<16x286xf32>, vector<286x256xf32>, vector<16x256xf32> -> vector<16x256xf32>
    %c0_70 = arith.constant 0 : index
    %c0_71 = arith.constant 0 : index
    %c0_72 = arith.constant 0 : index
    %69 = vector.load %arg13[%c0_70, %c0_71, %c0_72] : memref<5x16x1xf32, #tpu.memory_space<vmem>>, vector<1x16x1xf32>
    %70 = vector.shape_cast %69 : vector<1x16x1xf32> to vector<16x1xf32>
    %71 = vector.broadcast %70 : vector<16x1xf32> to vector<16x256xf32>
    %72 = arith.addf %68, %71 : vector<16x256xf32>
    %c0_73 = arith.constant 0 : index
    %c0_74 = arith.constant 0 : index
    %73 = vector.load %arg19[%c0_73, %c0_74] : memref<16x256xf32, #tpu.memory_space<vmem>>, vector<16x256xf32>
    tpu.vector_store %arg19[%c0_73, %c0_74], %72 {strides = array<i32>} : memref<16x256xf32, #tpu.memory_space<vmem>>, vector<16x256xf32>,
    %c1_75 = arith.constant 1 : index
    %c0_76 = arith.constant 0 : index
    %c0_77 = arith.constant 0 : index
    %c0_78 = arith.constant 0 : index
    %74 = vector.load %arg12[%c1_75, %c0_76, %c0_77, %c0_78] : memref<5x9x16x16xf32, #tpu.memory_space<vmem>>, vector<1x1x16x16xf32>
    %75 = vector.shape_cast %74 : vector<1x1x16x16xf32> to vector<16x16xf32>
    %76 = vector.extract_strided_slice %16 {offsets = [0, 0], sizes = [16, 78], strides = [1, 1]} : vector<16x100xf32> to vector<16x78xf32>
    %cst_79 = arith.constant dense<0.000000e+00> : vector<16x78xf32>
    %77 = tpu.matmul %75, %76, %cst_79 {dimension_numbers = #tpu.dot_dimension_numbers<[1], [0], [0], [1], [0, 0, 1, 1], [], []>} : vector<16x16xf32>, vector<16x78xf32>, vector<16x78xf32> -> vector<16x78xf32>
    %c1_80 = arith.constant 1 : index
    %c1_81 = arith.constant 1 : index
    %c0_82 = arith.constant 0 : index
    %c0_83 = arith.constant 0 : index
    %78 = vector.load %arg12[%c1_80, %c1_81, %c0_82, %c0_83] : memref<5x9x16x16xf32, #tpu.memory_space<vmem>>, vector<1x1x16x16xf32>
    %79 = vector.shape_cast %78 : vector<1x1x16x16xf32> to vector<16x16xf32>
    %80 = vector.extract_strided_slice %16 {offsets = [0, 1], sizes = [16, 78], strides = [1, 1]} : vector<16x100xf32> to vector<16x78xf32>
    %cst_84 = arith.constant dense<0.000000e+00> : vector<16x78xf32>
    %81 = tpu.matmul %79, %80, %cst_84 {dimension_numbers = #tpu.dot_dimension_numbers<[1], [0], [0], [1], [0, 0, 1, 1], [], []>} : vector<16x16xf32>, vector<16x78xf32>, vector<16x78xf32> -> vector<16x78xf32>
    %82 = arith.addf %77, %81 : vector<16x78xf32>
    %c1_85 = arith.constant 1 : index
    %c2_86 = arith.constant 2 : index
    %c0_87 = arith.constant 0 : index
    %c0_88 = arith.constant 0 : index
    %83 = vector.load %arg12[%c1_85, %c2_86, %c0_87, %c0_88] : memref<5x9x16x16xf32, #tpu.memory_space<vmem>>, vector<1x1x16x16xf32>
    %84 = vector.shape_cast %83 : vector<1x1x16x16xf32> to vector<16x16xf32>
    %85 = vector.extract_strided_slice %16 {offsets = [0, 2], sizes = [16, 78], strides = [1, 1]} : vector<16x100xf32> to vector<16x78xf32>
    %cst_89 = arith.constant dense<0.000000e+00> : vector<16x78xf32>
    %86 = tpu.matmul %84, %85, %cst_89 {dimension_numbers = #tpu.dot_dimension_numbers<[1], [0], [0], [1], [0, 0, 1, 1], [], []>} : vector<16x16xf32>, vector<16x78xf32>, vector<16x78xf32> -> vector<16x78xf32>
    %87 = arith.addf %82, %86 : vector<16x78xf32>
    %c1_90 = arith.constant 1 : index
    %c3_91 = arith.constant 3 : index
    %c0_92 = arith.constant 0 : index
    %c0_93 = arith.constant 0 : index
    %88 = vector.load %arg12[%c1_90, %c3_91, %c0_92, %c0_93] : memref<5x9x16x16xf32, #tpu.memory_space<vmem>>, vector<1x1x16x16xf32>
    %89 = vector.shape_cast %88 : vector<1x1x16x16xf32> to vector<16x16xf32>
    %90 = vector.extract_strided_slice %16 {offsets = [0, 10], sizes = [16, 78], strides = [1, 1]} : vector<16x100xf32> to vector<16x78xf32>
    %cst_94 = arith.constant dense<0.000000e+00> : vector<16x78xf32>
    %91 = tpu.matmul %89, %90, %cst_94 {dimension_numbers = #tpu.dot_dimension_numbers<[1], [0], [0], [1], [0, 0, 1, 1], [], []>} : vector<16x16xf32>, vector<16x78xf32>, vector<16x78xf32> -> vector<16x78xf32>
    %92 = arith.addf %87, %91 : vector<16x78xf32>
    %c1_95 = arith.constant 1 : index
    %c4_96 = arith.constant 4 : index
    %c0_97 = arith.constant 0 : index
    %c0_98 = arith.constant 0 : index
    %93 = vector.load %arg12[%c1_95, %c4_96, %c0_97, %c0_98] : memref<5x9x16x16xf32, #tpu.memory_space<vmem>>, vector<1x1x16x16xf32>
    %94 = vector.shape_cast %93 : vector<1x1x16x16xf32> to vector<16x16xf32>
    %95 = vector.extract_strided_slice %16 {offsets = [0, 11], sizes = [16, 78], strides = [1, 1]} : vector<16x100xf32> to vector<16x78xf32>
    %cst_99 = arith.constant dense<0.000000e+00> : vector<16x78xf32>
    %96 = tpu.matmul %94, %95, %cst_99 {dimension_numbers = #tpu.dot_dimension_numbers<[1], [0], [0], [1], [0, 0, 1, 1], [], []>} : vector<16x16xf32>, vector<16x78xf32>, vector<16x78xf32> -> vector<16x78xf32>
    %97 = arith.addf %92, %96 : vector<16x78xf32>
    %c1_100 = arith.constant 1 : index
    %c5_101 = arith.constant 5 : index
    %c0_102 = arith.constant 0 : index
    %c0_103 = arith.constant 0 : index
    %98 = vector.load %arg12[%c1_100, %c5_101, %c0_102, %c0_103] : memref<5x9x16x16xf32, #tpu.memory_space<vmem>>, vector<1x1x16x16xf32>
    %99 = vector.shape_cast %98 : vector<1x1x16x16xf32> to vector<16x16xf32>
    %100 = vector.extract_strided_slice %16 {offsets = [0, 12], sizes = [16, 78], strides = [1, 1]} : vector<16x100xf32> to vector<16x78xf32>
    %cst_104 = arith.constant dense<0.000000e+00> : vector<16x78xf32>
    %101 = tpu.matmul %99, %100, %cst_104 {dimension_numbers = #tpu.dot_dimension_numbers<[1], [0], [0], [1], [0, 0, 1, 1], [], []>} : vector<16x16xf32>, vector<16x78xf32>, vector<16x78xf32> -> vector<16x78xf32>
    %102 = arith.addf %97, %101 : vector<16x78xf32>
    %c1_105 = arith.constant 1 : index
    %c6_106 = arith.constant 6 : index
    %c0_107 = arith.constant 0 : index
    %c0_108 = arith.constant 0 : index
    %103 = vector.load %arg12[%c1_105, %c6_106, %c0_107, %c0_108] : memref<5x9x16x16xf32, #tpu.memory_space<vmem>>, vector<1x1x16x16xf32>
    %104 = vector.shape_cast %103 : vector<1x1x16x16xf32> to vector<16x16xf32>
    %105 = vector.extract_strided_slice %16 {offsets = [0, 20], sizes = [16, 78], strides = [1, 1]} : vector<16x100xf32> to vector<16x78xf32>
    %cst_109 = arith.constant dense<0.000000e+00> : vector<16x78xf32>
    %106 = tpu.matmul %104, %105, %cst_109 {dimension_numbers = #tpu.dot_dimension_numbers<[1], [0], [0], [1], [0, 0, 1, 1], [], []>} : vector<16x16xf32>, vector<16x78xf32>, vector<16x78xf32> -> vector<16x78xf32>
    %107 = arith.addf %102, %106 : vector<16x78xf32>
    %c1_110 = arith.constant 1 : index
    %c7_111 = arith.constant 7 : index
    %c0_112 = arith.constant 0 : index
    %c0_113 = arith.constant 0 : index
    %108 = vector.load %arg12[%c1_110, %c7_111, %c0_112, %c0_113] : memref<5x9x16x16xf32, #tpu.memory_space<vmem>>, vector<1x1x16x16xf32>
    %109 = vector.shape_cast %108 : vector<1x1x16x16xf32> to vector<16x16xf32>
    %110 = vector.extract_strided_slice %16 {offsets = [0, 21], sizes = [16, 78], strides = [1, 1]} : vector<16x100xf32> to vector<16x78xf32>
    %cst_114 = arith.constant dense<0.000000e+00> : vector<16x78xf32>
    %111 = tpu.matmul %109, %110, %cst_114 {dimension_numbers = #tpu.dot_dimension_numbers<[1], [0], [0], [1], [0, 0, 1, 1], [], []>} : vector<16x16xf32>, vector<16x78xf32>, vector<16x78xf32> -> vector<16x78xf32>
    %112 = arith.addf %107, %111 : vector<16x78xf32>
    %c1_115 = arith.constant 1 : index
    %c8_116 = arith.constant 8 : index
    %c0_117 = arith.constant 0 : index
    %c0_118 = arith.constant 0 : index
    %113 = vector.load %arg12[%c1_115, %c8_116, %c0_117, %c0_118] : memref<5x9x16x16xf32, #tpu.memory_space<vmem>>, vector<1x1x16x16xf32>
    %114 = vector.shape_cast %113 : vector<1x1x16x16xf32> to vector<16x16xf32>
    %115 = vector.extract_strided_slice %16 {offsets = [0, 22], sizes = [16, 78], strides = [1, 1]} : vector<16x100xf32> to vector<16x78xf32>
    %cst_119 = arith.constant dense<0.000000e+00> : vector<16x78xf32>
    %116 = tpu.matmul %114, %115, %cst_119 {dimension_numbers = #tpu.dot_dimension_numbers<[1], [0], [0], [1], [0, 0, 1, 1], [], []>} : vector<16x16xf32>, vector<16x78xf32>, vector<16x78xf32> -> vector<16x78xf32>
    %117 = arith.addf %112, %116 : vector<16x78xf32>
    %c0_120 = arith.constant 0 : index
    %c0_121 = arith.constant 0 : index
    %118 = vector.load %arg15[%c0_120, %c0_121] : memref<78x64xf32, #tpu.memory_space<vmem>>, vector<78x64xf32>
    %cst_122 = arith.constant dense<0.000000e+00> : vector<16x64xf32>
    %119 = tpu.matmul %117, %118, %cst_122 {dimension_numbers = #tpu.dot_dimension_numbers<[1], [0], [0], [1], [0, 0, 1, 1], [], []>} : vector<16x78xf32>, vector<78x64xf32>, vector<16x64xf32> -> vector<16x64xf32>
    %c1_123 = arith.constant 1 : index
    %c0_124 = arith.constant 0 : index
    %c0_125 = arith.constant 0 : index
    %120 = vector.load %arg13[%c1_123, %c0_124, %c0_125] : memref<5x16x1xf32, #tpu.memory_space<vmem>>, vector<1x16x1xf32>
    %121 = vector.shape_cast %120 : vector<1x16x1xf32> to vector<16x1xf32>
    %122 = vector.broadcast %121 : vector<16x1xf32> to vector<16x64xf32>
    %123 = arith.addf %119, %122 : vector<16x64xf32>
    %c0_126 = arith.constant 0 : index
    %c0_127 = arith.constant 0 : index
    %124 = vector.load %arg20[%c0_126, %c0_127] : memref<16x64xf32, #tpu.memory_space<vmem>>, vector<16x64xf32>
    tpu.vector_store %arg20[%c0_126, %c0_127], %123 {strides = array<i32>} : memref<16x64xf32, #tpu.memory_space<vmem>>, vector<16x64xf32>,
    %c2_128 = arith.constant 2 : index
    %c0_129 = arith.constant 0 : index
    %c0_130 = arith.constant 0 : index
    %c0_131 = arith.constant 0 : index
    %125 = vector.load %arg12[%c2_128, %c0_129, %c0_130, %c0_131] : memref<5x9x16x16xf32, #tpu.memory_space<vmem>>, vector<1x1x16x16xf32>
    %126 = vector.shape_cast %125 : vector<1x1x16x16xf32> to vector<16x16xf32>
    %127 = vector.extract_strided_slice %18 {offsets = [0, 0], sizes = [16, 22], strides = [1, 1]} : vector<16x36xf32> to vector<16x22xf32>
    %cst_132 = arith.constant dense<0.000000e+00> : vector<16x22xf32>
    %128 = tpu.matmul %126, %127, %cst_132 {dimension_numbers = #tpu.dot_dimension_numbers<[1], [0], [0], [1], [0, 0, 1, 1], [], []>} : vector<16x16xf32>, vector<16x22xf32>, vector<16x22xf32> -> vector<16x22xf32>
    %c2_133 = arith.constant 2 : index
    %c1_134 = arith.constant 1 : index
    %c0_135 = arith.constant 0 : index
    %c0_136 = arith.constant 0 : index
    %129 = vector.load %arg12[%c2_133, %c1_134, %c0_135, %c0_136] : memref<5x9x16x16xf32, #tpu.memory_space<vmem>>, vector<1x1x16x16xf32>
    %130 = vector.shape_cast %129 : vector<1x1x16x16xf32> to vector<16x16xf32>
    %131 = vector.extract_strided_slice %18 {offsets = [0, 1], sizes = [16, 22], strides = [1, 1]} : vector<16x36xf32> to vector<16x22xf32>
    %cst_137 = arith.constant dense<0.000000e+00> : vector<16x22xf32>
    %132 = tpu.matmul %130, %131, %cst_137 {dimension_numbers = #tpu.dot_dimension_numbers<[1], [0], [0], [1], [0, 0, 1, 1], [], []>} : vector<16x16xf32>, vector<16x22xf32>, vector<16x22xf32> -> vector<16x22xf32>
    %133 = arith.addf %128, %132 : vector<16x22xf32>
    %c2_138 = arith.constant 2 : index
    %c2_139 = arith.constant 2 : index
    %c0_140 = arith.constant 0 : index
    %c0_141 = arith.constant 0 : index
    %134 = vector.load %arg12[%c2_138, %c2_139, %c0_140, %c0_141] : memref<5x9x16x16xf32, #tpu.memory_space<vmem>>, vector<1x1x16x16xf32>
    %135 = vector.shape_cast %134 : vector<1x1x16x16xf32> to vector<16x16xf32>
    %136 = vector.extract_strided_slice %18 {offsets = [0, 2], sizes = [16, 22], strides = [1, 1]} : vector<16x36xf32> to vector<16x22xf32>
    %cst_142 = arith.constant dense<0.000000e+00> : vector<16x22xf32>
    %137 = tpu.matmul %135, %136, %cst_142 {dimension_numbers = #tpu.dot_dimension_numbers<[1], [0], [0], [1], [0, 0, 1, 1], [], []>} : vector<16x16xf32>, vector<16x22xf32>, vector<16x22xf32> -> vector<16x22xf32>
    %138 = arith.addf %133, %137 : vector<16x22xf32>
    %c2_143 = arith.constant 2 : index
    %c3_144 = arith.constant 3 : index
    %c0_145 = arith.constant 0 : index
    %c0_146 = arith.constant 0 : index
    %139 = vector.load %arg12[%c2_143, %c3_144, %c0_145, %c0_146] : memref<5x9x16x16xf32, #tpu.memory_space<vmem>>, vector<1x1x16x16xf32>
    %140 = vector.shape_cast %139 : vector<1x1x16x16xf32> to vector<16x16xf32>
    %141 = vector.extract_strided_slice %18 {offsets = [0, 6], sizes = [16, 22], strides = [1, 1]} : vector<16x36xf32> to vector<16x22xf32>
    %cst_147 = arith.constant dense<0.000000e+00> : vector<16x22xf32>
    %142 = tpu.matmul %140, %141, %cst_147 {dimension_numbers = #tpu.dot_dimension_numbers<[1], [0], [0], [1], [0, 0, 1, 1], [], []>} : vector<16x16xf32>, vector<16x22xf32>, vector<16x22xf32> -> vector<16x22xf32>
    %143 = arith.addf %138, %142 : vector<16x22xf32>
    %c2_148 = arith.constant 2 : index
    %c4_149 = arith.constant 4 : index
    %c0_150 = arith.constant 0 : index
    %c0_151 = arith.constant 0 : index
    %144 = vector.load %arg12[%c2_148, %c4_149, %c0_150, %c0_151] : memref<5x9x16x16xf32, #tpu.memory_space<vmem>>, vector<1x1x16x16xf32>
    %145 = vector.shape_cast %144 : vector<1x1x16x16xf32> to vector<16x16xf32>
    %146 = vector.extract_strided_slice %18 {offsets = [0, 7], sizes = [16, 22], strides = [1, 1]} : vector<16x36xf32> to vector<16x22xf32>
    %cst_152 = arith.constant dense<0.000000e+00> : vector<16x22xf32>
    %147 = tpu.matmul %145, %146, %cst_152 {dimension_numbers = #tpu.dot_dimension_numbers<[1], [0], [0], [1], [0, 0, 1, 1], [], []>} : vector<16x16xf32>, vector<16x22xf32>, vector<16x22xf32> -> vector<16x22xf32>
    %148 = arith.addf %143, %147 : vector<16x22xf32>
    %c2_153 = arith.constant 2 : index
    %c5_154 = arith.constant 5 : index
    %c0_155 = arith.constant 0 : index
    %c0_156 = arith.constant 0 : index
    %149 = vector.load %arg12[%c2_153, %c5_154, %c0_155, %c0_156] : memref<5x9x16x16xf32, #tpu.memory_space<vmem>>, vector<1x1x16x16xf32>
    %150 = vector.shape_cast %149 : vector<1x1x16x16xf32> to vector<16x16xf32>
    %151 = vector.extract_strided_slice %18 {offsets = [0, 8], sizes = [16, 22], strides = [1, 1]} : vector<16x36xf32> to vector<16x22xf32>
    %cst_157 = arith.constant dense<0.000000e+00> : vector<16x22xf32>
    %152 = tpu.matmul %150, %151, %cst_157 {dimension_numbers = #tpu.dot_dimension_numbers<[1], [0], [0], [1], [0, 0, 1, 1], [], []>} : vector<16x16xf32>, vector<16x22xf32>, vector<16x22xf32> -> vector<16x22xf32>
    %153 = arith.addf %148, %152 : vector<16x22xf32>
    %c2_158 = arith.constant 2 : index
    %c6_159 = arith.constant 6 : index
    %c0_160 = arith.constant 0 : index
    %c0_161 = arith.constant 0 : index
    %154 = vector.load %arg12[%c2_158, %c6_159, %c0_160, %c0_161] : memref<5x9x16x16xf32, #tpu.memory_space<vmem>>, vector<1x1x16x16xf32>
    %155 = vector.shape_cast %154 : vector<1x1x16x16xf32> to vector<16x16xf32>
    %156 = vector.extract_strided_slice %18 {offsets = [0, 12], sizes = [16, 22], strides = [1, 1]} : vector<16x36xf32> to vector<16x22xf32>
    %cst_162 = arith.constant dense<0.000000e+00> : vector<16x22xf32>
    %157 = tpu.matmul %155, %156, %cst_162 {dimension_numbers = #tpu.dot_dimension_numbers<[1], [0], [0], [1], [0, 0, 1, 1], [], []>} : vector<16x16xf32>, vector<16x22xf32>, vector<16x22xf32> -> vector<16x22xf32>
    %158 = arith.addf %153, %157 : vector<16x22xf32>
    %c2_163 = arith.constant 2 : index
    %c7_164 = arith.constant 7 : index
    %c0_165 = arith.constant 0 : index
    %c0_166 = arith.constant 0 : index
    %159 = vector.load %arg12[%c2_163, %c7_164, %c0_165, %c0_166] : memref<5x9x16x16xf32, #tpu.memory_space<vmem>>, vector<1x1x16x16xf32>
    %160 = vector.shape_cast %159 : vector<1x1x16x16xf32> to vector<16x16xf32>
    %161 = vector.extract_strided_slice %18 {offsets = [0, 13], sizes = [16, 22], strides = [1, 1]} : vector<16x36xf32> to vector<16x22xf32>
    %cst_167 = arith.constant dense<0.000000e+00> : vector<16x22xf32>
    %162 = tpu.matmul %160, %161, %cst_167 {dimension_numbers = #tpu.dot_dimension_numbers<[1], [0], [0], [1], [0, 0, 1, 1], [], []>} : vector<16x16xf32>, vector<16x22xf32>, vector<16x22xf32> -> vector<16x22xf32>
    %163 = arith.addf %158, %162 : vector<16x22xf32>
    %c2_168 = arith.constant 2 : index
    %c8_169 = arith.constant 8 : index
    %c0_170 = arith.constant 0 : index
    %c0_171 = arith.constant 0 : index
    %164 = vector.load %arg12[%c2_168, %c8_169, %c0_170, %c0_171] : memref<5x9x16x16xf32, #tpu.memory_space<vmem>>, vector<1x1x16x16xf32>
    %165 = vector.shape_cast %164 : vector<1x1x16x16xf32> to vector<16x16xf32>
    %166 = vector.extract_strided_slice %18 {offsets = [0, 14], sizes = [16, 22], strides = [1, 1]} : vector<16x36xf32> to vector<16x22xf32>
    %cst_172 = arith.constant dense<0.000000e+00> : vector<16x22xf32>
    %167 = tpu.matmul %165, %166, %cst_172 {dimension_numbers = #tpu.dot_dimension_numbers<[1], [0], [0], [1], [0, 0, 1, 1], [], []>} : vector<16x16xf32>, vector<16x22xf32>, vector<16x22xf32> -> vector<16x22xf32>
    %168 = arith.addf %163, %167 : vector<16x22xf32>
    %c0_173 = arith.constant 0 : index
    %c0_174 = arith.constant 0 : index
    %169 = vector.load %arg16[%c0_173, %c0_174] : memref<22x16xf32, #tpu.memory_space<vmem>>, vector<22x16xf32>
    %cst_175 = arith.constant dense<0.000000e+00> : vector<16x16xf32>
    %170 = tpu.matmul %168, %169, %cst_175 {dimension_numbers = #tpu.dot_dimension_numbers<[1], [0], [0], [1], [0, 0, 1, 1], [], []>} : vector<16x22xf32>, vector<22x16xf32>, vector<16x16xf32> -> vector<16x16xf32>
    %c2_176 = arith.constant 2 : index
    %c0_177 = arith.constant 0 : index
    %c0_178 = arith.constant 0 : index
    %171 = vector.load %arg13[%c2_176, %c0_177, %c0_178] : memref<5x16x1xf32, #tpu.memory_space<vmem>>, vector<1x16x1xf32>
    %172 = vector.shape_cast %171 : vector<1x16x1xf32> to vector<16x1xf32>
    %173 = vector.broadcast %172 : vector<16x1xf32> to vector<16x16xf32>
    %174 = arith.addf %170, %173 : vector<16x16xf32>
    %c0_179 = arith.constant 0 : index
    %c0_180 = arith.constant 0 : index
    %175 = vector.load %arg21[%c0_179, %c0_180] : memref<16x16xf32, #tpu.memory_space<vmem>>, vector<16x16xf32>
    tpu.vector_store %arg21[%c0_179, %c0_180], %174 {strides = array<i32>} : memref<16x16xf32, #tpu.memory_space<vmem>>, vector<16x16xf32>,
    %c3_181 = arith.constant 3 : index
    %c0_182 = arith.constant 0 : index
    %c0_183 = arith.constant 0 : index
    %c0_184 = arith.constant 0 : index
    %176 = vector.load %arg12[%c3_181, %c0_182, %c0_183, %c0_184] : memref<5x9x16x16xf32, #tpu.memory_space<vmem>>, vector<1x1x16x16xf32>
    %177 = vector.shape_cast %176 : vector<1x1x16x16xf32> to vector<16x16xf32>
    %178 = vector.extract_strided_slice %20 {offsets = [0, 0], sizes = [16, 6], strides = [1, 1]} : vector<16x16xf32> to vector<16x6xf32>
    %cst_185 = arith.constant dense<0.000000e+00> : vector<16x6xf32>
    %179 = tpu.matmul %177, %178, %cst_185 {dimension_numbers = #tpu.dot_dimension_numbers<[1], [0], [0], [1], [0, 0, 1, 1], [], []>} : vector<16x16xf32>, vector<16x6xf32>, vector<16x6xf32> -> vector<16x6xf32>
    %c3_186 = arith.constant 3 : index
    %c1_187 = arith.constant 1 : index
    %c0_188 = arith.constant 0 : index
    %c0_189 = arith.constant 0 : index
    %180 = vector.load %arg12[%c3_186, %c1_187, %c0_188, %c0_189] : memref<5x9x16x16xf32, #tpu.memory_space<vmem>>, vector<1x1x16x16xf32>
    %181 = vector.shape_cast %180 : vector<1x1x16x16xf32> to vector<16x16xf32>
    %182 = vector.extract_strided_slice %20 {offsets = [0, 1], sizes = [16, 6], strides = [1, 1]} : vector<16x16xf32> to vector<16x6xf32>
    %cst_190 = arith.constant dense<0.000000e+00> : vector<16x6xf32>
    %183 = tpu.matmul %181, %182, %cst_190 {dimension_numbers = #tpu.dot_dimension_numbers<[1], [0], [0], [1], [0, 0, 1, 1], [], []>} : vector<16x16xf32>, vector<16x6xf32>, vector<16x6xf32> -> vector<16x6xf32>
    %184 = arith.addf %179, %183 : vector<16x6xf32>
    %c3_191 = arith.constant 3 : index
    %c2_192 = arith.constant 2 : index
    %c0_193 = arith.constant 0 : index
    %c0_194 = arith.constant 0 : index
    %185 = vector.load %arg12[%c3_191, %c2_192, %c0_193, %c0_194] : memref<5x9x16x16xf32, #tpu.memory_space<vmem>>, vector<1x1x16x16xf32>
    %186 = vector.shape_cast %185 : vector<1x1x16x16xf32> to vector<16x16xf32>
    %187 = vector.extract_strided_slice %20 {offsets = [0, 2], sizes = [16, 6], strides = [1, 1]} : vector<16x16xf32> to vector<16x6xf32>
    %cst_195 = arith.constant dense<0.000000e+00> : vector<16x6xf32>
    %188 = tpu.matmul %186, %187, %cst_195 {dimension_numbers = #tpu.dot_dimension_numbers<[1], [0], [0], [1], [0, 0, 1, 1], [], []>} : vector<16x16xf32>, vector<16x6xf32>, vector<16x6xf32> -> vector<16x6xf32>
    %189 = arith.addf %184, %188 : vector<16x6xf32>
    %c3_196 = arith.constant 3 : index
    %c3_197 = arith.constant 3 : index
    %c0_198 = arith.constant 0 : index
    %c0_199 = arith.constant 0 : index
    %190 = vector.load %arg12[%c3_196, %c3_197, %c0_198, %c0_199] : memref<5x9x16x16xf32, #tpu.memory_space<vmem>>, vector<1x1x16x16xf32>
    %191 = vector.shape_cast %190 : vector<1x1x16x16xf32> to vector<16x16xf32>
    %192 = vector.extract_strided_slice %20 {offsets = [0, 4], sizes = [16, 6], strides = [1, 1]} : vector<16x16xf32> to vector<16x6xf32>
    %cst_200 = arith.constant dense<0.000000e+00> : vector<16x6xf32>
    %193 = tpu.matmul %191, %192, %cst_200 {dimension_numbers = #tpu.dot_dimension_numbers<[1], [0], [0], [1], [0, 0, 1, 1], [], []>} : vector<16x16xf32>, vector<16x6xf32>, vector<16x6xf32> -> vector<16x6xf32>
    %194 = arith.addf %189, %193 : vector<16x6xf32>
    %c3_201 = arith.constant 3 : index
    %c4_202 = arith.constant 4 : index
    %c0_203 = arith.constant 0 : index
    %c0_204 = arith.constant 0 : index
    %195 = vector.load %arg12[%c3_201, %c4_202, %c0_203, %c0_204] : memref<5x9x16x16xf32, #tpu.memory_space<vmem>>, vector<1x1x16x16xf32>
    %196 = vector.shape_cast %195 : vector<1x1x16x16xf32> to vector<16x16xf32>
    %197 = vector.extract_strided_slice %20 {offsets = [0, 5], sizes = [16, 6], strides = [1, 1]} : vector<16x16xf32> to vector<16x6xf32>
    %cst_205 = arith.constant dense<0.000000e+00> : vector<16x6xf32>
    %198 = tpu.matmul %196, %197, %cst_205 {dimension_numbers = #tpu.dot_dimension_numbers<[1], [0], [0], [1], [0, 0, 1, 1], [], []>} : vector<16x16xf32>, vector<16x6xf32>, vector<16x6xf32> -> vector<16x6xf32>
    %199 = arith.addf %194, %198 : vector<16x6xf32>
    %c3_206 = arith.constant 3 : index
    %c5_207 = arith.constant 5 : index
    %c0_208 = arith.constant 0 : index
    %c0_209 = arith.constant 0 : index
    %200 = vector.load %arg12[%c3_206, %c5_207, %c0_208, %c0_209] : memref<5x9x16x16xf32, #tpu.memory_space<vmem>>, vector<1x1x16x16xf32>
    %201 = vector.shape_cast %200 : vector<1x1x16x16xf32> to vector<16x16xf32>
    %202 = vector.extract_strided_slice %20 {offsets = [0, 6], sizes = [16, 6], strides = [1, 1]} : vector<16x16xf32> to vector<16x6xf32>
    %cst_210 = arith.constant dense<0.000000e+00> : vector<16x6xf32>
    %203 = tpu.matmul %201, %202, %cst_210 {dimension_numbers = #tpu.dot_dimension_numbers<[1], [0], [0], [1], [0, 0, 1, 1], [], []>} : vector<16x16xf32>, vector<16x6xf32>, vector<16x6xf32> -> vector<16x6xf32>
    %204 = arith.addf %199, %203 : vector<16x6xf32>
    %c3_211 = arith.constant 3 : index
    %c6_212 = arith.constant 6 : index
    %c0_213 = arith.constant 0 : index
    %c0_214 = arith.constant 0 : index
    %205 = vector.load %arg12[%c3_211, %c6_212, %c0_213, %c0_214] : memref<5x9x16x16xf32, #tpu.memory_space<vmem>>, vector<1x1x16x16xf32>
    %206 = vector.shape_cast %205 : vector<1x1x16x16xf32> to vector<16x16xf32>
    %207 = vector.extract_strided_slice %20 {offsets = [0, 8], sizes = [16, 6], strides = [1, 1]} : vector<16x16xf32> to vector<16x6xf32>
    %cst_215 = arith.constant dense<0.000000e+00> : vector<16x6xf32>
    %208 = tpu.matmul %206, %207, %cst_215 {dimension_numbers = #tpu.dot_dimension_numbers<[1], [0], [0], [1], [0, 0, 1, 1], [], []>} : vector<16x16xf32>, vector<16x6xf32>, vector<16x6xf32> -> vector<16x6xf32>
    %209 = arith.addf %204, %208 : vector<16x6xf32>
    %c3_216 = arith.constant 3 : index
    %c7_217 = arith.constant 7 : index
    %c0_218 = arith.constant 0 : index
    %c0_219 = arith.constant 0 : index
    %210 = vector.load %arg12[%c3_216, %c7_217, %c0_218, %c0_219] : memref<5x9x16x16xf32, #tpu.memory_space<vmem>>, vector<1x1x16x16xf32>
    %211 = vector.shape_cast %210 : vector<1x1x16x16xf32> to vector<16x16xf32>
    %212 = vector.extract_strided_slice %20 {offsets = [0, 9], sizes = [16, 6], strides = [1, 1]} : vector<16x16xf32> to vector<16x6xf32>
    %cst_220 = arith.constant dense<0.000000e+00> : vector<16x6xf32>
    %213 = tpu.matmul %211, %212, %cst_220 {dimension_numbers = #tpu.dot_dimension_numbers<[1], [0], [0], [1], [0, 0, 1, 1], [], []>} : vector<16x16xf32>, vector<16x6xf32>, vector<16x6xf32> -> vector<16x6xf32>
    %214 = arith.addf %209, %213 : vector<16x6xf32>
    %c3_221 = arith.constant 3 : index
    %c8_222 = arith.constant 8 : index
    %c0_223 = arith.constant 0 : index
    %c0_224 = arith.constant 0 : index
    %215 = vector.load %arg12[%c3_221, %c8_222, %c0_223, %c0_224] : memref<5x9x16x16xf32, #tpu.memory_space<vmem>>, vector<1x1x16x16xf32>
    %216 = vector.shape_cast %215 : vector<1x1x16x16xf32> to vector<16x16xf32>
    %217 = vector.extract_strided_slice %20 {offsets = [0, 10], sizes = [16, 6], strides = [1, 1]} : vector<16x16xf32> to vector<16x6xf32>
    %cst_225 = arith.constant dense<0.000000e+00> : vector<16x6xf32>
    %218 = tpu.matmul %216, %217, %cst_225 {dimension_numbers = #tpu.dot_dimension_numbers<[1], [0], [0], [1], [0, 0, 1, 1], [], []>} : vector<16x16xf32>, vector<16x6xf32>, vector<16x6xf32> -> vector<16x6xf32>
    %219 = arith.addf %214, %218 : vector<16x6xf32>
    %c0_226 = arith.constant 0 : index
    %c0_227 = arith.constant 0 : index
    %220 = vector.load %arg17[%c0_226, %c0_227] : memref<6x4xf32, #tpu.memory_space<vmem>>, vector<6x4xf32>
    %cst_228 = arith.constant dense<0.000000e+00> : vector<16x4xf32>
    %221 = tpu.matmul %219, %220, %cst_228 {dimension_numbers = #tpu.dot_dimension_numbers<[1], [0], [0], [1], [0, 0, 1, 1], [], []>} : vector<16x6xf32>, vector<6x4xf32>, vector<16x4xf32> -> vector<16x4xf32>
    %c3_229 = arith.constant 3 : index
    %c0_230 = arith.constant 0 : index
    %c0_231 = arith.constant 0 : index
    %222 = vector.load %arg13[%c3_229, %c0_230, %c0_231] : memref<5x16x1xf32, #tpu.memory_space<vmem>>, vector<1x16x1xf32>
    %223 = vector.shape_cast %222 : vector<1x16x1xf32> to vector<16x1xf32>
    %224 = vector.broadcast %223 : vector<16x1xf32> to vector<16x4xf32>
    %225 = arith.addf %221, %224 : vector<16x4xf32>
    %c0_232 = arith.constant 0 : index
    %c0_233 = arith.constant 0 : index
    %226 = vector.load %arg22[%c0_232, %c0_233] : memref<16x4xf32, #tpu.memory_space<vmem>>, vector<16x4xf32>
    tpu.vector_store %arg22[%c0_232, %c0_233], %225 {strides = array<i32>} : memref<16x4xf32, #tpu.memory_space<vmem>>, vector<16x4xf32>,
    %c4_234 = arith.constant 4 : index
    %c0_235 = arith.constant 0 : index
    %c0_236 = arith.constant 0 : index
    %c0_237 = arith.constant 0 : index
    %227 = vector.load %arg12[%c4_234, %c0_235, %c0_236, %c0_237] : memref<5x9x16x16xf32, #tpu.memory_space<vmem>>, vector<1x1x16x16xf32>
    %228 = vector.shape_cast %227 : vector<1x1x16x16xf32> to vector<16x16xf32>
    %229 = vector.extract_strided_slice %22 {offsets = [0, 0], sizes = [16, 1], strides = [1, 1]} : vector<16x9xf32> to vector<16x1xf32>
    %cst_238 = arith.constant dense<0.000000e+00> : vector<16x1xf32>
    %230 = tpu.matmul %228, %229, %cst_238 {dimension_numbers = #tpu.dot_dimension_numbers<[1], [0], [0], [1], [0, 0, 1, 1], [], []>} : vector<16x16xf32>, vector<16x1xf32>, vector<16x1xf32> -> vector<16x1xf32>
    %c4_239 = arith.constant 4 : index
    %c1_240 = arith.constant 1 : index
    %c0_241 = arith.constant 0 : index
    %c0_242 = arith.constant 0 : index
    %231 = vector.load %arg12[%c4_239, %c1_240, %c0_241, %c0_242] : memref<5x9x16x16xf32, #tpu.memory_space<vmem>>, vector<1x1x16x16xf32>
    %232 = vector.shape_cast %231 : vector<1x1x16x16xf32> to vector<16x16xf32>
    %233 = vector.extract_strided_slice %22 {offsets = [0, 1], sizes = [16, 1], strides = [1, 1]} : vector<16x9xf32> to vector<16x1xf32>
    %cst_243 = arith.constant dense<0.000000e+00> : vector<16x1xf32>
    %234 = tpu.matmul %232, %233, %cst_243 {dimension_numbers = #tpu.dot_dimension_numbers<[1], [0], [0], [1], [0, 0, 1, 1], [], []>} : vector<16x16xf32>, vector<16x1xf32>, vector<16x1xf32> -> vector<16x1xf32>
    %235 = arith.addf %230, %234 : vector<16x1xf32>
    %c4_244 = arith.constant 4 : index
    %c2_245 = arith.constant 2 : index
    %c0_246 = arith.constant 0 : index
    %c0_247 = arith.constant 0 : index
    %236 = vector.load %arg12[%c4_244, %c2_245, %c0_246, %c0_247] : memref<5x9x16x16xf32, #tpu.memory_space<vmem>>, vector<1x1x16x16xf32>
    %237 = vector.shape_cast %236 : vector<1x1x16x16xf32> to vector<16x16xf32>
    %238 = vector.extract_strided_slice %22 {offsets = [0, 2], sizes = [16, 1], strides = [1, 1]} : vector<16x9xf32> to vector<16x1xf32>
    %cst_248 = arith.constant dense<0.000000e+00> : vector<16x1xf32>
    %239 = tpu.matmul %237, %238, %cst_248 {dimension_numbers = #tpu.dot_dimension_numbers<[1], [0], [0], [1], [0, 0, 1, 1], [], []>} : vector<16x16xf32>, vector<16x1xf32>, vector<16x1xf32> -> vector<16x1xf32>
    %240 = arith.addf %235, %239 : vector<16x1xf32>
    %c4_249 = arith.constant 4 : index
    %c3_250 = arith.constant 3 : index
    %c0_251 = arith.constant 0 : index
    %c0_252 = arith.constant 0 : index
    %241 = vector.load %arg12[%c4_249, %c3_250, %c0_251, %c0_252] : memref<5x9x16x16xf32, #tpu.memory_space<vmem>>, vector<1x1x16x16xf32>
    %242 = vector.shape_cast %241 : vector<1x1x16x16xf32> to vector<16x16xf32>
    %243 = vector.extract_strided_slice %22 {offsets = [0, 3], sizes = [16, 1], strides = [1, 1]} : vector<16x9xf32> to vector<16x1xf32>
    %cst_253 = arith.constant dense<0.000000e+00> : vector<16x1xf32>
    %244 = tpu.matmul %242, %243, %cst_253 {dimension_numbers = #tpu.dot_dimension_numbers<[1], [0], [0], [1], [0, 0, 1, 1], [], []>} : vector<16x16xf32>, vector<16x1xf32>, vector<16x1xf32> -> vector<16x1xf32>
    %245 = arith.addf %240, %244 : vector<16x1xf32>
    %c4_254 = arith.constant 4 : index
    %c4_255 = arith.constant 4 : index
    %c0_256 = arith.constant 0 : index
    %c0_257 = arith.constant 0 : index
    %246 = vector.load %arg12[%c4_254, %c4_255, %c0_256, %c0_257] : memref<5x9x16x16xf32, #tpu.memory_space<vmem>>, vector<1x1x16x16xf32>
    %247 = vector.shape_cast %246 : vector<1x1x16x16xf32> to vector<16x16xf32>
    %248 = vector.extract_strided_slice %22 {offsets = [0, 4], sizes = [16, 1], strides = [1, 1]} : vector<16x9xf32> to vector<16x1xf32>
    %cst_258 = arith.constant dense<0.000000e+00> : vector<16x1xf32>
    %249 = tpu.matmul %247, %248, %cst_258 {dimension_numbers = #tpu.dot_dimension_numbers<[1], [0], [0], [1], [0, 0, 1, 1], [], []>} : vector<16x16xf32>, vector<16x1xf32>, vector<16x1xf32> -> vector<16x1xf32>
    %250 = arith.addf %245, %249 : vector<16x1xf32>
    %c4_259 = arith.constant 4 : index
    %c5_260 = arith.constant 5 : index
    %c0_261 = arith.constant 0 : index
    %c0_262 = arith.constant 0 : index
    %251 = vector.load %arg12[%c4_259, %c5_260, %c0_261, %c0_262] : memref<5x9x16x16xf32, #tpu.memory_space<vmem>>, vector<1x1x16x16xf32>
    %252 = vector.shape_cast %251 : vector<1x1x16x16xf32> to vector<16x16xf32>
    %253 = vector.extract_strided_slice %22 {offsets = [0, 5], sizes = [16, 1], strides = [1, 1]} : vector<16x9xf32> to vector<16x1xf32>
    %cst_263 = arith.constant dense<0.000000e+00> : vector<16x1xf32>
    %254 = tpu.matmul %252, %253, %cst_263 {dimension_numbers = #tpu.dot_dimension_numbers<[1], [0], [0], [1], [0, 0, 1, 1], [], []>} : vector<16x16xf32>, vector<16x1xf32>, vector<16x1xf32> -> vector<16x1xf32>
    %255 = arith.addf %250, %254 : vector<16x1xf32>
    %c4_264 = arith.constant 4 : index
    %c6_265 = arith.constant 6 : index
    %c0_266 = arith.constant 0 : index
    %c0_267 = arith.constant 0 : index
    %256 = vector.load %arg12[%c4_264, %c6_265, %c0_266, %c0_267] : memref<5x9x16x16xf32, #tpu.memory_space<vmem>>, vector<1x1x16x16xf32>
    %257 = vector.shape_cast %256 : vector<1x1x16x16xf32> to vector<16x16xf32>
    %258 = vector.extract_strided_slice %22 {offsets = [0, 6], sizes = [16, 1], strides = [1, 1]} : vector<16x9xf32> to vector<16x1xf32>
    %cst_268 = arith.constant dense<0.000000e+00> : vector<16x1xf32>
    %259 = tpu.matmul %257, %258, %cst_268 {dimension_numbers = #tpu.dot_dimension_numbers<[1], [0], [0], [1], [0, 0, 1, 1], [], []>} : vector<16x16xf32>, vector<16x1xf32>, vector<16x1xf32> -> vector<16x1xf32>
    %260 = arith.addf %255, %259 : vector<16x1xf32>
    %c4_269 = arith.constant 4 : index
    %c7_270 = arith.constant 7 : index
    %c0_271 = arith.constant 0 : index
    %c0_272 = arith.constant 0 : index
    %261 = vector.load %arg12[%c4_269, %c7_270, %c0_271, %c0_272] : memref<5x9x16x16xf32, #tpu.memory_space<vmem>>, vector<1x1x16x16xf32>
    %262 = vector.shape_cast %261 : vector<1x1x16x16xf32> to vector<16x16xf32>
    %263 = vector.extract_strided_slice %22 {offsets = [0, 7], sizes = [16, 1], strides = [1, 1]} : vector<16x9xf32> to vector<16x1xf32>
    %cst_273 = arith.constant dense<0.000000e+00> : vector<16x1xf32>
    %264 = tpu.matmul %262, %263, %cst_273 {dimension_numbers = #tpu.dot_dimension_numbers<[1], [0], [0], [1], [0, 0, 1, 1], [], []>} : vector<16x16xf32>, vector<16x1xf32>, vector<16x1xf32> -> vector<16x1xf32>
    %265 = arith.addf %260, %264 : vector<16x1xf32>
    %c4_274 = arith.constant 4 : index
    %c8_275 = arith.constant 8 : index
    %c0_276 = arith.constant 0 : index
    %c0_277 = arith.constant 0 : index
    %266 = vector.load %arg12[%c4_274, %c8_275, %c0_276, %c0_277] : memref<5x9x16x16xf32, #tpu.memory_space<vmem>>, vector<1x1x16x16xf32>
    %267 = vector.shape_cast %266 : vector<1x1x16x16xf32> to vector<16x16xf32>
    %268 = vector.extract_strided_slice %22 {offsets = [0, 8], sizes = [16, 1], strides = [1, 1]} : vector<16x9xf32> to vector<16x1xf32>
    %cst_278 = arith.constant dense<0.000000e+00> : vector<16x1xf32>
    %269 = tpu.matmul %267, %268, %cst_278 {dimension_numbers = #tpu.dot_dimension_numbers<[1], [0], [0], [1], [0, 0, 1, 1], [], []>} : vector<16x16xf32>, vector<16x1xf32>, vector<16x1xf32> -> vector<16x1xf32>
    %270 = arith.addf %265, %269 : vector<16x1xf32>
    %c4_279 = arith.constant 4 : index
    %c0_280 = arith.constant 0 : index
    %c0_281 = arith.constant 0 : index
    %271 = vector.load %arg13[%c4_279, %c0_280, %c0_281] : memref<5x16x1xf32, #tpu.memory_space<vmem>>, vector<1x16x1xf32>
    %272 = vector.shape_cast %271 : vector<1x16x1xf32> to vector<16x1xf32>
    %273 = arith.addf %270, %272 : vector<16x1xf32>
    %c0_282 = arith.constant 0 : index
    %c0_283 = arith.constant 0 : index
    %274 = vector.load %arg23[%c0_282, %c0_283] : memref<16x1xf32, #tpu.memory_space<vmem>>, vector<16x1xf32>
    tpu.vector_store %arg23[%c0_282, %c0_283], %273 {strides = array<i32>} : memref<16x1xf32, #tpu.memory_space<vmem>>, vector<16x1xf32>,
    return
  }
  func.func @transform_0(%arg0: i32) -> (i32, i32, i32) {
    %c0_i32 = arith.constant 0 : i32
    %c0_i32_0 = arith.constant 0 : i32
    %c0_i32_1 = arith.constant 0 : i32
    return %arg0, %c0_i32, %c0_i32_0 : i32, i32, i32
  }
  func.func @transform_1(%arg0: i32) -> (i32, i32, i32) {
    %c0_i32 = arith.constant 0 : i32
    %c0_i32_0 = arith.constant 0 : i32
    %c0_i32_1 = arith.constant 0 : i32
    return %arg0, %c0_i32, %c0_i32_0 : i32, i32, i32
  }
  func.func @transform_2(%arg0: i32) -> (i32, i32) {
    %c0_i32 = arith.constant 0 : i32
    %c0_i32_0 = arith.constant 0 : i32
    %c0_i32_1 = arith.constant 0 : i32
    return %c0_i32, %c0_i32_0 : i32, i32
  }
  func.func @transform_3(%arg0: i32) -> (i32, i32) {
    %c0_i32 = arith.constant 0 : i32
    %c0_i32_0 = arith.constant 0 : i32
    %c0_i32_1 = arith.constant 0 : i32
    return %c0_i32, %c0_i32_0 : i32, i32
  }
  func.func @transform_4(%arg0: i32) -> (i32, i32) {
    %c0_i32 = arith.constant 0 : i32
    %c0_i32_0 = arith.constant 0 : i32
    %c0_i32_1 = arith.constant 0 : i32
    return %c0_i32, %c0_i32_0 : i32, i32
  }
  func.func @transform_5(%arg0: i32) -> (i32, i32) {
    %c0_i32 = arith.constant 0 : i32
    %c0_i32_0 = arith.constant 0 : i32
    %c0_i32_1 = arith.constant 0 : i32
    return %c0_i32, %c0_i32_0 : i32, i32
  }
  func.func @transform_6(%arg0: i32) -> (i32, i32) {
    %c0_i32 = arith.constant 0 : i32
    %c0_i32_0 = arith.constant 0 : i32
    %c0_i32_1 = arith.constant 0 : i32
    return %c0_i32, %c0_i32_0 : i32, i32
  }
  func.func @transform_7(%arg0: i32) -> (i32, i32) {
    %c0_i32 = arith.constant 0 : i32
    %c0_i32_0 = arith.constant 0 : i32
    %c0_i32_1 = arith.constant 0 : i32
    return %c0_i32, %c0_i32_0 : i32, i32
  }
  func.func @transform_8(%arg0: i32) -> (i32, i32) {
    %c0_i32 = arith.constant 0 : i32
    %c0_i32_0 = arith.constant 0 : i32
    %c0_i32_1 = arith.constant 0 : i32
    return %c0_i32, %c0_i32_0 : i32, i32
  }
  func.func @transform_9(%arg0: i32) -> (i32, i32) {
    %c0_i32 = arith.constant 0 : i32
    %c0_i32_0 = arith.constant 0 : i32
    %c0_i32_1 = arith.constant 0 : i32
    return %c0_i32, %c0_i32_0 : i32, i32
  }
  func.func @transform_10(%arg0: i32) -> (i32, i32) {
    %c0_i32 = arith.constant 0 : i32
    %c0_i32_0 = arith.constant 0 : i32
    %c0_i32_1 = arith.constant 0 : i32
    return %c0_i32, %c0_i32_0 : i32, i32
  }
  func.func @transform_11(%arg0: i32) -> (i32, i32, i32, i32) {
    %c0_i32 = arith.constant 0 : i32
    %c0_i32_0 = arith.constant 0 : i32
    %c0_i32_1 = arith.constant 0 : i32
    %c0_i32_2 = arith.constant 0 : i32
    %c0_i32_3 = arith.constant 0 : i32
    return %c0_i32, %c0_i32_0, %c0_i32_1, %c0_i32_2 : i32, i32, i32, i32
  }
  func.func @transform_12(%arg0: i32) -> (i32, i32, i32) {
    %c0_i32 = arith.constant 0 : i32
    %c0_i32_0 = arith.constant 0 : i32
    %c0_i32_1 = arith.constant 0 : i32
    %c0_i32_2 = arith.constant 0 : i32
    return %c0_i32, %c0_i32_0, %c0_i32_1 : i32, i32, i32
  }
  func.func @transform_13(%arg0: i32) -> (i32, i32) {
    %c0_i32 = arith.constant 0 : i32
    %c0_i32_0 = arith.constant 0 : i32
    %c0_i32_1 = arith.constant 0 : i32
    return %c0_i32, %c0_i32_0 : i32, i32
  }
  func.func @transform_14(%arg0: i32) -> (i32, i32) {
    %c0_i32 = arith.constant 0 : i32
    %c0_i32_0 = arith.constant 0 : i32
    %c0_i32_1 = arith.constant 0 : i32
    return %c0_i32, %c0_i32_0 : i32, i32
  }
  func.func @transform_15(%arg0: i32) -> (i32, i32) {
    %c0_i32 = arith.constant 0 : i32
    %c0_i32_0 = arith.constant 0 : i32
    %c0_i32_1 = arith.constant 0 : i32
    return %c0_i32, %c0_i32_0 : i32, i32
  }
  func.func @transform_16(%arg0: i32) -> (i32, i32) {
    %c0_i32 = arith.constant 0 : i32
    %c0_i32_0 = arith.constant 0 : i32
    %c0_i32_1 = arith.constant 0 : i32
    return %c0_i32, %c0_i32_0 : i32, i32
  }
  func.func @transform_17(%arg0: i32) -> (i32, i32) {
    %c0_i32 = arith.constant 0 : i32
    %c0_i32_0 = arith.constant 0 : i32
    %c0_i32_1 = arith.constant 0 : i32
    return %c0_i32, %c0_i32_0 : i32, i32
  }
  func.func @transform_18(%arg0: i32) -> (i32, i32) {
    %c0_i32 = arith.constant 0 : i32
    %c0_i32_0 = arith.constant 0 : i32
    return %arg0, %c0_i32 : i32, i32
  }
  func.func @transform_19(%arg0: i32) -> (i32, i32) {
    %c0_i32 = arith.constant 0 : i32
    %c0_i32_0 = arith.constant 0 : i32
    return %arg0, %c0_i32 : i32, i32
  }
  func.func @transform_20(%arg0: i32) -> (i32, i32) {
    %c0_i32 = arith.constant 0 : i32
    %c0_i32_0 = arith.constant 0 : i32
    return %arg0, %c0_i32 : i32, i32
  }
  func.func @transform_21(%arg0: i32) -> (i32, i32) {
    %c0_i32 = arith.constant 0 : i32
    %c0_i32_0 = arith.constant 0 : i32
    return %arg0, %c0_i32 : i32, i32
  }
  func.func @transform_22(%arg0: i32) -> (i32, i32) {
    %c0_i32 = arith.constant 0 : i32
    %c0_i32_0 = arith.constant 0 : i32
    return %arg0, %c0_i32 : i32, i32
  }
}

</mosaic_0001>

<bundles_post_ra>
// kernel: tpu_custom_call.1
= control target key start
LH: loop header
LB: loop body
LE: loop exit
PB: predicated region body
PF: predicated region fallthrough
CT: control target
= control target key end

     0   :  { %s11915_s0 = inlined_call_operand.vmem [shape: f32[2,4,256], index: 0, kind: input, shape index: {}]   ;;  %s11916_s1 = inlined_call_operand.vmem [shape: f32[2,8,64], index: 1, kind: input, shape index: {}]   ;;  %s11917_s2 = inlined_call_operand.vmem [shape: f32[16,4], index: 2, kind: input, shape index: {}]   ;;  %s11918_s3 = inlined_call_operand.vmem [shape: f32[16,8], index: 3, kind: input, shape index: {}]   ;;  %s11919_s4 = inlined_call_operand.vmem [shape: f32[256,324], index: 4, kind: input, shape index: {}]   ;;  %s11920_s5 = inlined_call_operand.vmem [shape: f32[64,324], index: 5, kind: input, shape index: {}]   ;;  %s11921_s6 = inlined_call_operand.vmem [shape: f32[16,324], index: 6, kind: input, shape index: {}]   ;;  %s11922_s7 = inlined_call_operand.vmem [shape: f32[324,100], index: 7, kind: input, shape index: {}]   ;;  %s11923_s8 = inlined_call_operand.vmem [shape: f32[100,36], index: 8, kind: input, shape index: {}]   ;;  %s11924_s9 = inlined_call_operand.vmem [shape: f32[36,16], index: 9, kind: input, shape index: {}]   ;;  %s11925_s10 = inlined_call_operand.vmem [shape: f32[16,9], index: 10, kind: input, shape index: {}]   ;;  %s11926_s11 = inlined_call_operand.vmem [shape: f32[5,9,16,16], index: 11, kind: input, shape index: {}]   ;;  %s11927_s12 = inlined_call_operand.vmem [shape: f32[5,16,1], index: 12, kind: input, shape index: {}]   ;;  %s11928_s13 = inlined_call_operand.vmem [shape: f32[286,256], index: 13, kind: input, shape index: {}]   ;;  %s11929_s14 = inlined_call_operand.vmem [shape: f32[78,64], index: 14, kind: input, shape index: {}]   ;;  %s11930_s15 = inlined_call_operand.vmem [shape: f32[22,16], index: 15, kind: input, shape index: {}]   ;;  %s11931_s16 = inlined_call_operand.vmem [shape: f32[6,4], index: 16, kind: input, shape index: {}]   ;;  %s11932_s17 = inlined_call_operand.<no memory space> [shape: f32[1,1], index: 17, kind: input, shape index: {}]   ;;  %s11933_s18 = inlined_call_operand.hbm [shape: f32[32,256], index: 18, kind: output, shape index: {0}]   ;;  %s11934_s19 = inlined_call_operand.hbm [shape: f32[32,64], index: 19, kind: output, shape index: {1}]   ;;  %s11935_s20 = inlined_call_operand.vmem [shape: f32[32,16], index: 20, kind: output, shape index: {2}]   ;;  %s11936_s21 = inlined_call_operand.vmem [shape: f32[32,4], index: 21, kind: output, shape index: {3}]   ;;  %s11937_s22 = inlined_call_operand.vmem [shape: f32[32,1], index: 22, kind: output, shape index: {4}]  }
   0x1   :  { %11978 = sst [smem:[#allocation15_spill]] %s11915_s0 }
   0x2   :  { %11979 = sst [smem:[#allocation16_spill]] %s11916_s1 }
   0x3   :  { %11980 = sst [smem:[#allocation17_spill]] %s11917_s2 }
   0x4   :  { %11981 = sst [smem:[#allocation18_spill]] %s11918_s3 }
   0x5   :  { %11982 = sst [smem:[#allocation19_spill]] %s11919_s4 }
   0x6   :  { %11983 = sst [smem:[#allocation20_spill]] %s11920_s5 }
   0x7   :  { %11984 = sst [smem:[#allocation21_spill]] %s11921_s6 }
   0x8   :  { %11985 = sst [smem:[#allocation22_spill]] %s11922_s7 }
   0x9   :  { %11986 = sst [smem:[#allocation23_spill]] %s11923_s8 }
   0xa   :  { %11987 = sst [smem:[#allocation24_spill]] %s11924_s9 }
   0xb   :  { %11988 = sst [smem:[#allocation25_spill]] %s11925_s10 }
   0xc   :  { %11989 = sst [smem:[#allocation26_spill]] %s11926_s11 }
   0xd   :  { %11990 = sst [smem:[#allocation27_spill]] %s11936_s21 }
   0xe   :  { %11991 = sst [smem:[#allocation28_spill]] %s11937_s22 }
   0xf   :  { %30 = vsyncpa [#allocation4], 0 }
  0x10   :  { %32 = vsyncpa [#allocation4 + $0x1], 0 }
  0x11   :  { %33 = vsyncpa [#allocation6], 0 }
  0x12   :  { %35 = vsyncpa [#allocation6 + $0x1], 0  ;;  %s9920_s17 = smov 0   ;;  %s9922_s3 = smov 0  }
  0x13   :  { %s9924_s28 = smov 0   ;;  %s9926_s29 = smov 0  }
  0x14 LB: > { %11992 = sst [smem:[#allocation9_spill]] %s9760_s17  ;;  %s9941_s30 = sadd.s32 4294967295, %s9772_s29   ;;  %s9772_s29 = sphi %s9926_s29, %s12061_s29   ;;  %s9768_s28 = sphi %s9924_s28, %s12063_s28   ;;  %s9764_s3 = sphi %s9922_s3, %s12065_s3   ;;  %s9760_s17 = sphi %s9920_s17, %s12064_s17  }
  0x15   : > { %11993 = sst [smem:[#allocation10_spill]] %s9768_s28  ;;  %s7628_s4 = sadd.s32 4294967294, %s9772_s29  }
  0x16   : > { %11994 = sst [smem:[#allocation11_spill]] %s9772_s29  ;;  %s9945_s0 = sadd.s32 1, %s9772_s29  }
  0x17   : > { %11995 = sst [smem:[#allocation12_spill]] %s9945_s0  ;;  %s436_s23 = sadd.s32 1, %s9768_s28 }
  0x18   : > { %s433_s1 = ssub.s32 %s9772_s29, %s9945_s0  ;;  %p446_p0 = scmp.ne.s32.totalorder %s9768_s28, %s9764_s3 }
  0x19   : > { %p434_p1 = scmp.eq.s32.totalorder %s433_s1, 0  ;;  %p447_p2 = scmp.eq.s32.totalorder %s9941_s30, 1 }
  0x1a   : > { %p452_p3 = scmp.ne.s32.totalorder %s9764_s3, %s9760_s17  ;;  %p453_p4 = scmp.eq.s32.totalorder %s7628_s4, 1 }
  0x1b   : > { %s9956_s5 = scalar_select %p434_p1, %s9768_s28, %s436_s23  }
  0x1c   : > { %p9958_p5 = por %p447_p2, %p446_p0  ;;  %p9962_p6 = por %p453_p4, %p452_p3 }
  0x1d   : > { %11996 = sst [smem:[#allocation13_spill]] %s9956_s5  ;;  %p7631_p7 = scmp.ge.s32.totalorder %s9772_s29, 1 }
  0x1e   : > { %s11998_s6 = scalar_select %p9962_p6, 1, 0 }
  0x1f   : > { %p638_p8 = scmp.lt.s32.totalorder %s9772_s29, 3 }
  0x20   : > { %11999 = sst [smem:[#allocation14_spill]] %s11998_s6 }
  0x21   : > { %p639_p9 = pnand %p7631_p7, %p638_p8 }
  0x22   : > { %p724_p10 = scmp.lt.s32.totalorder (!%p639_p9), %s9941_s30, 1  ;;  %v11950_v0 = vmov (!%p639_p9), 0.0   ;;  %s12000_s4 = sld [smem:[#allocation19_spill]] (!%p639_p9)  ;;  %vm771_vm0 = vcmask (!%p639_p9), 1043456   ;;  %vm764_vm1 = vcmask (!%p639_p9), 31744   ;;  %vm1110_vm2 = vcmask (!%p639_p9), 64512  }
  0x23   : > { %642 = sbr.rel (%p639_p9) target bundleno = 2493 (0x9bd), region = 92  ;;  %840 = vmatprep.mubr.f32.mxu1 (!%p639_p9), %v11950_v0  ;;  %s12001_s0 = sld [smem:[#allocation15_spill]] (!%p639_p9)  ;;  %vm1216_vm3 = vcmask (!%p639_p9), 523264   ;;  %vm1422_vm4 = vcmask (!%p639_p9), 556032   ;;  %vm1875_vm5 = vcmask (!%p639_p9), 1039360   ;;  %vm2217_vm6 = vcmask (!%p639_p9), 1031168  }
  0x24   : > { %s12002_s17 = sld [smem:[#allocation17_spill]] (!%p639_p9)  ;;  %s12004_s28 = sld [smem:[#allocation16_spill]] (!%p639_p9)  ;;  %vm2407_vm7 = vcmask (!%p639_p9), 900096   ;;  %vm2597_vm8 = vcmask (!%p639_p9), 891904   ;;  %vm2787_vm9 = vcmask (!%p639_p9), 883712   ;;  %vm2977_vm10 = vcmask (!%p639_p9), 752640  }
  0x25   : > { %s12005_s22 = sld [smem:[#allocation20_spill]] (!%p639_p9)  ;;  %s12008_s7 = sld [smem:[#allocation22_spill]] (!%p639_p9)  ;;  %vm3167_vm11 = vcmask (!%p639_p9), 744448   ;;  %vm3357_vm12 = vcmask (!%p639_p9), 736256   ;;  %vm1595_vm13 = vcmask (!%p639_p9), 818176   ;;  %vm1772_vm14 = vcmask (!%p639_p9), 130048  }
  0x26   : > { %s12009_s8 = sld [smem:[#allocation23_spill]] (!%p639_p9)  ;;  %s12010_s23 = sld [smem:[#allocation21_spill]] (!%p639_p9)  ;;  %vm1685_vm15 = vcmask (!%p639_p9), 293888  }
  0x27   : > { %s11969_s2 = smov (!%p639_p9), 127   ;;  %s9779_s29 = smov (!%p639_p9), 108  }
  0x28   : > { %v854_v1 = vld [vmem:[%s12000_s4 + $0x8] sm:$0xff] (!%p639_p9)  ;;  %v857_v2 = vld [vmem:[%s12000_s4 + $0x20] sm:$0xff] (!%p639_p9)  ;;  %v856_v4 = vld [vmem:[%s12000_s4 + $0x18] sm:$0xff] (!%p639_p9)  ;;  %s9782_s27 = smov (!%p639_p9), 90   ;;  %s12011_s11 = sld [smem:[#allocation26_spill]] (!%p639_p9) }
  0x29   : > { %v853_v3 = vld [vmem:[%s12000_s4] sm:$0xff] (!%p639_p9)  ;;  %v860_v6 = vld [vmem:[%s12000_s4 + $0x38] sm:$0xff] (!%p639_p9)  ;;  %v863_v7 = vld [vmem:[%s12000_s4 + $0x50] sm:$0xff] (!%p639_p9)  ;;  %v8666_v9 = vpack.c.bf16 (!%p639_p9), %v857_v2, %v854_v1  ;;  %s12015_s9 = sld [smem:[#allocation24_spill]] (!%p639_p9)  ;;  %s12025_s10 = sld [smem:[#allocation25_spill]] (!%p639_p9) }
  0x2a   : > { %s9971_s25 = scalar_select %p724_p10, %s9941_s30, 1  ;;  %v759_v10 = vld [vmem:[%s12002_s17] sm:$0xff]  ;;  %v8668_v11 = vpack.c.bf16 %v856_v4, %v853_v3  ;;  %v8670_v12 = vpack.c.bf16 %v863_v7, %v860_v6  ;;  %v859_v13 = vld [vmem:[%s12000_s4 + $0x30] sm:$0xff]  ;;  %v862_v14 = vld [vmem:[%s12000_s4 + $0x48] sm:$0xff] }
  0x2b   : > { %s12003_s5 = smov %s12002_s17  ;;  %v866_v15 = vld [vmem:[%s12000_s4 + $0x68] sm:$0xff]  ;;  %v869_v16 = vld [vmem:[%s12000_s4 + $0x80] sm:$0xff]  ;;  %v8672_v18 = vpack.c.bf16 %v862_v14, %v859_v13  ;;  %v868_v20 = vld [vmem:[%s12000_s4 + $0x78] sm:$0xff]  ;;  %s12006_s17 = sld [smem:[#allocation18_spill]] }
  0x2c   : > { %s7890_s26 = sshll.u32 %s9971_s25, 3  ;;  %v760_v17 = vld [vmem:[%s12003_s5 + $0x8] sm:$0xff]  ;;  %v865_v19 = vld [vmem:[%s12000_s4 + $0x60] sm:$0xff]  ;;  %v8674_v21 = vpack.c.bf16 %v869_v16, %v866_v15  ;;  %v872_v22 = vld [vmem:[%s12000_s4 + $0x98] sm:$0xff]  ;;  %s9778_s5 = smov 109  }
  0x2d   : > { %s728_s6 = scalar_lea.vmem %s12001_s0, %s7890_s26  ;;  %v903_v23 = vld [vmem:[%s12000_s4 + $0x190] sm:$0xff]  ;;  %v906_v24 = vld [vmem:[%s12000_s4 + $0x1a8] sm:$0xff]  ;;  %v8676_v30 = vpack.c.bf16 %v868_v20, %v865_v19  ;;  %v909_v31 = vld [vmem:[%s12000_s4 + $0x1c0] sm:$0xff]  ;;  %s732_s0 = scalar_lea.vmem %s12004_s28, %s7890_s26 }
  0x2e   : > { %v761_v5 = vld [vmem:[%s728_s6] sm:$0xff]  ;;  %v875_v25 = vld [vmem:[%s12000_s4 + $0xb0] sm:$0xff]  ;;  %v8730_v26 = vpack.c.bf16 %v906_v24, %v903_v23  ;;  %v858_v28 = vld [vmem:[%s12000_s4 + $0x28] sm:$0xff]  ;;  %s11967_s28 = smov 126   ;;  %s9777_s6 = smov 110  }
  0x2f   : > { %v763_v8 = vcombine.high %v761_v5, %v761_v5  ;;  %v855_v27 = vld [vmem:[%s12000_s4 + $0x10] sm:$0xff]  ;;  %v912_v32 = vld [vmem:[%s12000_s4 + $0x1d8] sm:$0xff]  ;;  %v861_v33 = vld [vmem:[%s12000_s4 + $0x40] sm:$0xff]  ;;  %v8678_v34 = vpack.c.bf16 %v875_v25, %v872_v22  ;;  %s9781_s25 = smov 91   ;;  %s11966_s26 = smov 118  }
  0x30   : > { %v8732_v29 = vpack.c.bf16 %v858_v28, %v855_v27  ;;  %8731 = vmatprep.subr.bf16.mxu0 %v8730_v26  ;;  %v871_v35 = vld [vmem:[%s12000_s4 + $0x90] sm:$0xff]  ;;  %v874_v36 = vld [vmem:[%s12000_s4 + $0xa8] sm:$0xff]  ;;  %v8734_v37 = vpack.c.bf16 %v912_v32, %v909_v31  ;;  %v864_v38 = vld [vmem:[%s12000_s4 + $0x58] sm:$0xff]  ;;  %s9795_s1 = smov 119  }
  0x31   : > { %7643 = vmatprep.subr.msk.mxu1 %vm771_vm0, %v763_v8  ;;  %v878_v39 = vld [vmem:[%s12000_s4 + $0xc8] sm:$0xff]  ;;  %v881_v40 = vld [vmem:[%s12000_s4 + $0xe0] sm:$0xff]  ;;  %v8736_v41 = vpack.c.bf16 %v864_v38, %v861_v33  ;;  %v915_v42 = vld [vmem:[%s12000_s4 + $0x1f0] sm:$0xff]  ;;  %v8680_v46 = vpack.c.bf16 %v874_v36, %v871_v35  ;;  %s12007_s21 = smov %s12006_s17 }
  0x32   : > { %7644 = vmatpush1.msk.msra.mxu1 %vm771_vm0, %v761_v5  ;;  %8733 = vmatpush3.bf16.msra.mxu0 %v8732_v29  ;;  %v918_v43 = vld [vmem:[%s12000_s4 + $0x208] sm:$0xff]  ;;  %v867_v44 = vld [vmem:[%s12000_s4 + $0x70] sm:$0xff]  ;;  %v877_v47 = vld [vmem:[%s12000_s4 + $0xc0] sm:$0xff]  ;;  %v8682_v50 = vpack.c.bf16 %v881_v40, %v878_v39 }
  0x33   : > { %7645 = vmatmul.mubr.msk.f32.vlgmr.msra.gmra.mrb[0].mxu1 %vm764_vm1, %v759_v10  ;;  %8667 = vmatprep.subr.bf16.mxu1 %v8666_v9  ;;  %v870_v45 = vld [vmem:[%s12000_s4 + $0x88] sm:$0xff]  ;;  %v880_v48 = vld [vmem:[%s12000_s4 + $0xd8] sm:$0xff]  ;;  %v8738_v49 = vpack.c.bf16 %v918_v43, %v915_v42  ;;  %v921_v53 = vld [vmem:[%s12000_s4 + $0x220] sm:$0xff] }
  0x34   : > { %846 = vmatprep.mubr.f32.mxu1 %v11950_v0  ;;  %8669 = vmatpush1.bf16.msra.mxu1 %v8668_v11  ;;  %v884_v51 = vld [vmem:[%s12000_s4 + $0xf8] sm:$0xff]  ;;  %v8740_v52 = vpack.c.bf16 %v870_v45, %v867_v44  ;;  %v887_v55 = vld [vmem:[%s12000_s4 + $0x110] sm:$0xff]  ;;  %v873_v57 = vld [vmem:[%s12000_s4 + $0xa0] sm:$0xff]  ;;  %v8684_v59 = vpack.c.bf16 %v880_v48, %v877_v47 }
  0x35   : > { %8671 = vmatprep.subr.bf16.mxu1 %v8670_v12  ;;  %8735 = vmatprep.subr.bf16.mxu0 %v8734_v37  ;;  %v924_v54 = vld [vmem:[%s12000_s4 + $0x238] sm:$0xff]  ;;  %v927_v60 = vld [vmem:[%s12000_s4 + $0x250] sm:$0xff]  ;;  %v930_v61 = vld [vmem:[%s12000_s4 + $0x268] sm:$0xff]  ;;  %v8686_v62 = vpack.c.bf16 %v887_v55, %v884_v51 }
  0x36   : > { %8737 = vmatpush3.bf16.msra.mxu0 %v8736_v41  ;;  %v8742_v56 = vpack.c.bf16 %v924_v54, %v921_v53  ;;  %v876_v58 = vld [vmem:[%s12000_s4 + $0xb8] sm:$0xff]  ;;  %v883_v63 = vld [vmem:[%s12000_s4 + $0xf0] sm:$0xff]  ;;  %v886_v1 = vld [vmem:[%s12000_s4 + $0x108] sm:$0xff]  ;;  %v8746_v5 = vpack.c.bf16 %v930_v61, %v927_v60 }
  0x37   : > { %7646 = vmatmul.mubr.msk.f32.gmra.mrb[2].mxu1 %vm764_vm1, %v760_v17  ;;  %8739 = vmatprep.subr.bf16.mxu0 %v8738_v49  ;;  %v890_v2 = vld [vmem:[%s12000_s4 + $0x128] sm:$0xff]  ;;  %v8744_v3 = vpack.c.bf16 %v876_v58, %v873_v57  ;;  %v893_v4 = vld [vmem:[%s12000_s4 + $0x140] sm:$0xff]  ;;  %v879_v6 = vld [vmem:[%s12000_s4 + $0xd0] sm:$0xff]  ;;  %v8688_v10 = vpack.c.bf16 %v886_v1, %v883_v63 }
  0x38   : > { %8673 = vmatpush1.bf16.msra.mxu1 %v8672_v18  ;;  %v882_v7 = vld [vmem:[%s12000_s4 + $0xe8] sm:$0xff]  ;;  %v933_v8 = vld [vmem:[%s12000_s4 + $0x280] sm:$0xff]  ;;  %v936_v9 = vld [vmem:[%s12000_s4 + $0x298] sm:$0xff]  ;;  %v8690_v11 = vpack.c.bf16 %v893_v4, %v890_v2 }
  0x39   : > { %8675 = vmatprep.subr.bf16.mxu1 %v8674_v21  ;;  %v889_v12 = vld [vmem:[%s12000_s4 + $0x120] sm:$0xff]  ;;  %v892_v13 = vld [vmem:[%s12000_s4 + $0x138] sm:$0xff]  ;;  %v8748_v15 = vpack.c.bf16 %v882_v7, %v879_v6  ;;  %v899_v16 = vld [vmem:[%s12000_s4 + $0x170] sm:$0xff]  ;;  %v8750_v17 = vpack.c.bf16 %v936_v9, %v933_v8 }
  0x3a   : > { %8741 = vmatpush3.bf16.msra.mxu0 %v8740_v52  ;;  %v896_v14 = vld [vmem:[%s12000_s4 + $0x158] sm:$0xff]  ;;  %v885_v18 = vld [vmem:[%s12000_s4 + $0x100] sm:$0xff]  ;;  %v939_v20 = vld [vmem:[%s12000_s4 + $0x2b0] sm:$0xff]  ;;  %v8692_v22 = vpack.c.bf16 %v892_v13, %v889_v12 }
  0x3b   : > { %8743 = vmatprep.subr.bf16.mxu0 %v8742_v56  ;;  %v888_v19 = vld [vmem:[%s12000_s4 + $0x118] sm:$0xff]  ;;  %v942_v21 = vld [vmem:[%s12000_s4 + $0x2c8] sm:$0xff]  ;;  %v8694_v23 = vpack.c.bf16 %v899_v16, %v896_v14  ;;  %v895_v24 = vld [vmem:[%s12000_s4 + $0x150] sm:$0xff] }
  0x3c   : > { %8677 = vmatpush1.bf16.msra.mxu1 %v8676_v30  ;;  %v898_v25 = vld [vmem:[%s12000_s4 + $0x168] sm:$0xff]  ;;  %v8752_v27 = vpack.c.bf16 %v888_v19, %v885_v18  ;;  %v905_v28 = vld [vmem:[%s12000_s4 + $0x1a0] sm:$0xff]  ;;  %v8754_v29 = vpack.c.bf16 %v942_v21, %v939_v20  ;;  %v891_v30 = vld [vmem:[%s12000_s4 + $0x130] sm:$0xff] }
  0x3d   : > { %8679 = vmatprep.subr.bf16.mxu1 %v8678_v34  ;;  %v902_v26 = vld [vmem:[%s12000_s4 + $0x188] sm:$0xff]  ;;  %v945_v32 = vld [vmem:[%s12000_s4 + $0x2e0] sm:$0xff]  ;;  %v948_v33 = vld [vmem:[%s12000_s4 + $0x2f8] sm:$0xff]  ;;  %v8696_v34 = vpack.c.bf16 %v898_v25, %v895_v24 }
  0x3e   : > { %8745 = vmatpush3.bf16.msra.mxu0 %v8744_v3  ;;  %v894_v31 = vld [vmem:[%s12000_s4 + $0x148] sm:$0xff]  ;;  %v8698_v35 = vpack.c.bf16 %v905_v28, %v902_v26  ;;  %v901_v36 = vld [vmem:[%s12000_s4 + $0x180] sm:$0xff]  ;;  %v904_v37 = vld [vmem:[%s12000_s4 + $0x198] sm:$0xff]  ;;  %v8758_v41 = vpack.c.bf16 %v948_v33, %v945_v32 }
  0x3f   : > { %8747 = vmatprep.subr.bf16.mxu0 %v8746_v5  ;;  %v8756_v38 = vpack.c.bf16 %v894_v31, %v891_v30  ;;  %v908_v39 = vld [vmem:[%s12000_s4 + $0x1b8] sm:$0xff]  ;;  %v911_v40 = vld [vmem:[%s12000_s4 + $0x1d0] sm:$0xff]  ;;  %v8700_v42 = vpack.c.bf16 %v904_v37, %v901_v36  ;;  %v910_v45 = vld [vmem:[%s12000_s4 + $0x1c8] sm:$0xff] }
  0x40   : > { %8681 = vmatpush1.bf16.msra.mxu1 %v8680_v46  ;;  %v8702_v43 = vpack.c.bf16 %v911_v40, %v908_v39  ;;  %v907_v44 = vld [vmem:[%s12000_s4 + $0x1b0] sm:$0xff]  ;;  %v914_v46 = vld [vmem:[%s12000_s4 + $0x1e8] sm:$0xff]  ;;  %v917_v47 = vld [vmem:[%s12000_s4 + $0x200] sm:$0xff] }
  0x41   : > { %8683 = vmatprep.subr.bf16.mxu1 %v8682_v50  ;;  %v8704_v48 = vpack.c.bf16 %v910_v45, %v907_v44  ;;  %v8706_v49 = vpack.c.bf16 %v917_v47, %v914_v46  ;;  %v913_v50 = vld [vmem:[%s12000_s4 + $0x1e0] sm:$0xff]  ;;  %v916_v51 = vld [vmem:[%s12000_s4 + $0x1f8] sm:$0xff]  ;;  %v923_v53 = vld [vmem:[%s12000_s4 + $0x230] sm:$0xff] }
  0x42   : > { %8749 = vmatpush3.bf16.msra.mxu0 %v8748_v15  ;;  %v920_v52 = vld [vmem:[%s12000_s4 + $0x218] sm:$0xff]  ;;  %v8708_v54 = vpack.c.bf16 %v916_v51, %v913_v50  ;;  %v919_v56 = vld [vmem:[%s12000_s4 + $0x210] sm:$0xff]  ;;  %v922_v57 = vld [vmem:[%s12000_s4 + $0x228] sm:$0xff] }
  0x43   : > { %8751 = vmatprep.subr.bf16.mxu0 %v8750_v17  ;;  %v8710_v55 = vpack.c.bf16 %v923_v53, %v920_v52  ;;  %v926_v58 = vld [vmem:[%s12000_s4 + $0x248] sm:$0xff]  ;;  %v8712_v60 = vpack.c.bf16 %v922_v57, %v919_v56  ;;  %v928_v63 = vld [vmem:[%s12000_s4 + $0x258] sm:$0xff]  ;;  %v935_v2 = vld [vmem:[%s12000_s4 + $0x290] sm:$0xff] }
  0x44   : > { %8685 = vmatpush1.bf16.msra.mxu1 %v8684_v59  ;;  %v929_v59 = vld [vmem:[%s12000_s4 + $0x260] sm:$0xff]  ;;  %v932_v1 = vld [vmem:[%s12000_s4 + $0x278] sm:$0xff]  ;;  %v931_v5 = vld [vmem:[%s12000_s4 + $0x270] sm:$0xff] }
  0x45   : > { %8687 = vmatprep.subr.bf16.mxu1 %v8686_v62  ;;  %v8714_v61 = vpack.c.bf16 %v929_v59, %v926_v58  ;;  %v925_v62 = vld [vmem:[%s12000_s4 + $0x240] sm:$0xff]  ;;  %v8718_v4 = vpack.c.bf16 %v935_v2, %v932_v1  ;;  %v934_v6 = vld [vmem:[%s12000_s4 + $0x288] sm:$0xff]  ;;  %v940_v12 = vld [vmem:[%s12000_s4 + $0x2b8] sm:$0xff] }
  0x46   : > { %8753 = vmatpush3.bf16.msra.mxu0 %v8752_v27  ;;  %v8716_v3 = vpack.c.bf16 %v928_v63, %v925_v62  ;;  %v938_v7 = vld [vmem:[%s12000_s4 + $0x2a8] sm:$0xff]  ;;  %v941_v8 = vld [vmem:[%s12000_s4 + $0x2c0] sm:$0xff]  ;;  %v8720_v9 = vpack.c.bf16 %v934_v6, %v931_v5  ;;  %v944_v13 = vld [vmem:[%s12000_s4 + $0x2d8] sm:$0xff] }
  0x47   : > { %8755 = vmatprep.subr.bf16.mxu0 %v8754_v29  ;;  %v947_v14 = vld [vmem:[%s12000_s4 + $0x2f0] sm:$0xff]  ;;  %v946_v18 = vld [vmem:[%s12000_s4 + $0x2e8] sm:$0xff]  ;;  %v897_v20 = vld [vmem:[%s12000_s4 + $0x160] sm:$0xff] }
  0x48   : > { %8689 = vmatpush1.bf16.msra.mxu1 %v8688_v10  ;;  %v8722_v10 = vpack.c.bf16 %v941_v8, %v938_v7  ;;  %v8726_v16 = vpack.c.bf16 %v947_v14, %v944_v13  ;;  %v943_v17 = vld [vmem:[%s12000_s4 + $0x2d0] sm:$0xff]  ;;  %v900_v21 = vld [vmem:[%s12000_s4 + $0x178] sm:$0xff]  ;;  %v1197_v25 = vld [vmem:[%s12005_s22 + $0x28] sm:$0xff] }
  0x49   : > { %8691 = vmatprep.subr.bf16.mxu1 %v8690_v11  ;;  %v937_v11 = vld [vmem:[%s12000_s4 + $0x2a0] sm:$0xff]  ;;  %v8728_v19 = vpack.c.bf16 %v946_v18, %v943_v17  ;;  %v1194_v24 = vld [vmem:[%s12005_s22 + $0x10] sm:$0xff]  ;;  %v1193_v27 = vld [vmem:[%s12005_s22 + $0x8] sm:$0xff]  ;;  %s7892_s4 = sshll.u32 %s9941_s30, 9 }
  0x4a   : > { %8757 = vmatpush3.bf16.msra.mxu0 %v8756_v38  ;;  %v8724_v15 = vpack.c.bf16 %v940_v12, %v937_v11  ;;  %v8778_v26 = vpack.c.bf16 %v1197_v25, %v1194_v24  ;;  %v1196_v28 = vld [vmem:[%s12005_s22 + $0x20] sm:$0xff]  ;;  %v1203_v30 = vld [vmem:[%s12005_s22 + $0x58] sm:$0xff]  ;;  %v1198_v45 = vld [vmem:[%s12005_s22 + $0x30] sm:$0xff] }
  0x4b   : > { %8759 = vmatprep.subr.bf16.mxu0 %v8758_v41  ;;  %v1200_v29 = vld [vmem:[%s12005_s22 + $0x40] sm:$0xff]  ;;  %v8762_v33 = vpack.c.bf16 %v1196_v28, %v1193_v27  ;;  %v1195_v39 = vld [vmem:[%s12005_s22 + $0x18] sm:$0xff]  ;;  %v1202_v41 = vld [vmem:[%s12005_s22 + $0x50] sm:$0xff] }
  0x4c   : > { %8693 = vmatpush1.bf16.msra.mxu1 %v8692_v22  ;;  %v8760_v22 = vpack.c.bf16 %v900_v21, %v897_v20  ;;  %v1107_v37 = vld [vmem:[%s12006_s17] sm:$0xff]  ;;  %v1199_v40 = vld [vmem:[%s12005_s22 + $0x38] sm:$0xff]  ;;  %v1201_v46 = vld [vmem:[%s12005_s22 + $0x48] sm:$0xff]  ;;  %s12028_s17 = smov 126  }
  0x4d   : > { %8695 = vmatprep.subr.bf16.mxu1 %v8694_v23  ;;  %v1109_v23 = vld [vmem:[%s732_s0] sm:$0xff]  ;;  %v8766_v44 = vpack.c.bf16 %v1202_v41, %v1199_v40  ;;  %v8768_v47 = vpack.c.bf16 %v1201_v46, %v1198_v45  ;;  %v1207_v52 = vld [vmem:[%s12005_s22 + $0x78] sm:$0xff]  ;;  %v1206_v53 = vld [vmem:[%s12005_s22 + $0x70] sm:$0xff]  ;;  %s9784_s0 = smov 117  }
  0x4e   : > { %8761 = vmatpush3.bf16.msra.mxu0 %v8760_v22  ;;  %v1192_v38 = vld [vmem:[%s12005_s22] sm:$0xff]  ;;  %v1211_v57 = vld [vmem:[%s12005_s22 + $0x98] sm:$0xff]  ;;  %v1214_v58 = vld [vmem:[%s12005_s22 + $0xb0] sm:$0xff] }
  0x4f   : > { %8779 = vmatprep.subr.bf16.mxu0 %v8778_v26  ;;  %v1204_v51 = vld [vmem:[%s12005_s22 + $0x60] sm:$0xff]  ;;  %v8774_v59 = vpack.c.bf16 %v1214_v58, %v1211_v57  ;;  %v1215_v1 = vld [vmem:[%s12005_s22 + $0xb8] sm:$0xff]  ;;  %v1414_v7 = vld [vmem:[%s12008_s7 + $0x108] sm:$0xff] }
  0x50   : > { %8697 = vmatpush1.bf16.msra.mxu1 %v8696_v34  ;;  %v8782_v34 = vpack.c.bf16 %v1203_v30, %v1200_v29  ;;  %v1212_v62 = vld [vmem:[%s12005_s22 + $0xa0] sm:$0xff]  ;;  %v1400_v18 = vld [vmem:[%s12008_s7 + $0x98] sm:$0xff]  ;;  %v1383_v25 = vld [vmem:[%s12008_s7 + $0x10] sm:$0xff] }
  0x51   : > { %8699 = vmatprep.subr.bf16.mxu1 %v8698_v35  ;;  %v8790_v2 = vpack.c.bf16 %v1215_v1, %v1212_v62  ;;  %v1413_v6 = vld [vmem:[%s12008_s7 + $0x100] sm:$0xff]  ;;  %v1416_v20 = vld [vmem:[%s12008_s7 + $0x118] sm:$0xff]  ;;  %v1402_v29 = vld [vmem:[%s12008_s7 + $0xa8] sm:$0xff] }
  0x52   : > { %v8826_v8 = vpack.c.bf16 %v1414_v7, %v1413_v6  ;;  %v1381_v14 = vld [vmem:[%s12008_s7] sm:$0xff]  ;;  %v1387_v41 = vld [vmem:[%s12008_s7 + $0x30] sm:$0xff]  ;;  %v1396_v6 = vld [vmem:[%s12008_s7 + $0x78] sm:$0xff] }
  0x53   : > { %v1401_v27 = vld [vmem:[%s12008_s7 + $0xa0] sm:$0xff]  ;;  %v1419_v62 = vld [vmem:[%s12008_s7 + $0x130] sm:$0xff] }
  0x54   : > { %8701 = vmatpush1.bf16.msra.mxu1 %v8700_v42  ;;  %v1108_v42 = vld [vmem:[%s12007_s21 + $0x8] sm:$0xff]  ;;  %v1417_v30 = vld [vmem:[%s12008_s7 + $0x120] sm:$0xff] }
  0x55   : > { %8703 = vmatprep.subr.bf16.mxu1 %v8702_v43  ;;  %v8764_v43 = vpack.c.bf16 %v1195_v39, %v1192_v38  ;;  %v1404_v38 = vld [vmem:[%s12008_s7 + $0xb8] sm:$0xff] }
  0x58   : > { %8705 = vmatpush1.bf16.msra.mxu1 %v8704_v48  ;;  %v1205_v48 = vld [vmem:[%s12005_s22 + $0x68] sm:$0xff] }
  0x59   : > { %8707 = vmatprep.subr.bf16.mxu1 %v8706_v49  ;;  %v1208_v49 = vld [vmem:[%s12005_s22 + $0x80] sm:$0xff] }
  0x5a   : > { %v8770_v50 = vpack.c.bf16 %v1208_v49, %v1205_v48  ;;  %v1390_v48 = vld [vmem:[%s12008_s7 + $0x48] sm:$0xff]  ;;  %v1407_v49 = vld [vmem:[%s12008_s7 + $0xd0] sm:$0xff] }
  0x5c   : > { %8709 = vmatpush1.bf16.msra.mxu1 %v8708_v54  ;;  %v8772_v54 = vpack.c.bf16 %v1207_v52, %v1204_v51 }
  0x5d   : > { %8711 = vmatprep.subr.bf16.mxu1 %v8710_v55  ;;  %v1209_v55 = vld [vmem:[%s12005_s22 + $0x88] sm:$0xff] }
  0x5e   : > { %v8786_v56 = vpack.c.bf16 %v1209_v55, %v1206_v53  ;;  %v1391_v53 = vld [vmem:[%s12008_s7 + $0x50] sm:$0xff]  ;;  %v1409_v55 = vld [vmem:[%s12008_s7 + $0xe0] sm:$0xff] }
  0x60   : > { %8713 = vmatpush1.bf16.msra.mxu1 %v8712_v60  ;;  %v1210_v60 = vld [vmem:[%s12005_s22 + $0x90] sm:$0xff] }
  0x61   : > { %8715 = vmatprep.subr.bf16.mxu1 %v8714_v61  ;;  %v1213_v61 = vld [vmem:[%s12005_s22 + $0xa8] sm:$0xff] }
  0x62   : > { %v8776_v63 = vpack.c.bf16 %v1213_v61, %v1210_v60  ;;  %v1394_v60 = vld [vmem:[%s12008_s7 + $0x68] sm:$0xff] }
  0x64   : > { %8717 = vmatpush1.bf16.msra.mxu1 %v8716_v3  ;;  %v1397_v3 = vld [vmem:[%s12008_s7 + $0x80] sm:$0xff] }
  0x65   : > { %8719 = vmatprep.subr.bf16.mxu1 %v8718_v4  ;;  %v1398_v4 = vld [vmem:[%s12008_s7 + $0x88] sm:$0xff] }
  0x66   : > { %v8794_v5 = vpack.c.bf16 %v1398_v4, %v1397_v3  ;;  %v1412_v3 = vld [vmem:[%s12008_s7 + $0xf8] sm:$0xff] }
  0x68   : > { %8721 = vmatpush1.bf16.msra.mxu1 %v8720_v9 }
  0x69   : > { %8723 = vmatprep.subr.bf16.mxu1 %v8722_v10 }
  0x6c   : > { %8725 = vmatpush1.bf16.msra.mxu1 %v8724_v15  ;;  %v1382_v15 = vld [vmem:[%s12008_s7 + $0x8] sm:$0xff] }
  0x6d   : > { %8727 = vmatprep.subr.bf16.mxu1 %v8726_v16  ;;  %v1399_v16 = vld [vmem:[%s12008_s7 + $0x90] sm:$0xff]  ;;  %v8796_v22 = vpack.c.bf16 %v1382_v15, %v1381_v14  ;;  %v754_v15 = vld [vmem:[%s12010_s23 + $0x8] sm:$0xff] }
  0x6e   : > { %v8798_v24 = vpack.c.bf16 %v1400_v18, %v1399_v16  ;;  %v755_v14 = vld [vmem:[%s12010_s23 + $0x10] sm:$0xff]  ;;  %v753_v16 = vld [vmem:[%s12010_s23] sm:$0xff] }
  0x70   : > { %8729 = vmatpush1.bf16.msra.mxu1 %v8728_v19  ;;  %v1415_v19 = vld [vmem:[%s12008_s7 + $0x110] sm:$0xff] }
  0x71   : > { %8220 = vmatprep.subr.mxu1 %v1109_v23  ;;  %v8830_v28 = vpack.c.bf16 %v1416_v20, %v1415_v19  ;;  %v1584_v20 = vld [vmem:[%s12009_s8 + $0x10] sm:$0xff] }
 0x106   : > { %v842_v31 = vpop.f32.mrb[0].mxu1 }
 0x107   : > { %v844_v32 = vpop.f32.mrb[1].mxu1 }
 0x108   : > { %1013 = vmatprep.mubr.f32.mxu1 %v844_v32  ;;  %1090 = vmatprep.mubr.f32.mxu0 %v844_v32 }
 0x109   : > { %1014 = vmatmul.mubr.f32.vlgmr.msra.gmra.mrb[4].mxu1 %v842_v31  ;;  %1091 = vmatmul.mubr.f32.vlgmr.msra.gmra.mrb[0].mxu0 %v842_v31  ;;  %v1418_v31 = vld [vmem:[%s12008_s7 + $0x128] sm:$0xff] }
 0x10a   : > { %8221 = vmatpush3.msra.mxu1 %v1109_v23  ;;  %v848_v35 = vpop.f32.mrb[2].mxu1  ;;  %8781 = vmatpush3.bf16.msra.mxu0 %v8778_v26  ;;  %v1384_v26 = vld [vmem:[%s12008_s7 + $0x18] sm:$0xff] }
 0x10b   : > { %v850_v36 = vpop.f32.mrb[3].mxu1  ;;  %8763 = vmatprep.subr.bf16.mxu1 %v8762_v33  ;;  %8783 = vmatprep.subr.bf16.mxu0 %v8782_v34  ;;  %v8800_v32 = vpack.c.bf16 %v1384_v26, %v1383_v25  ;;  %v8802_v33 = vpack.c.bf16 %v1402_v29, %v1401_v27  ;;  %v1586_v25 = vld [vmem:[%s12009_s8 + $0x20] sm:$0xff] }
 0x10c   : > { %1019 = vmatprep.mubr.f32.mxu1 %v850_v36  ;;  %1095 = vmatprep.mubr.f32.mxu0 %v850_v36  ;;  %v8834_v36 = vpack.c.bf16 %v1418_v31, %v1417_v30  ;;  %v757_v31 = vld [vmem:[%s12010_s23 + $0x20] sm:$0xff] }
 0x10d   : > { %1020 = vmatmul.mubr.f32.gmra.mrb[6].mxu1 %v848_v35  ;;  %1096 = vmatmul.mubr.f32.gmra.mrb[2].mxu0 %v848_v35  ;;  %v1386_v35 = vld [vmem:[%s12008_s7 + $0x28] sm:$0xff] }
 0x10e   : > { %8222 = vmatprep.mubr.msk.f32.mxu1 %vm1110_vm2, %v1107_v37  ;;  %8785 = vmatpush3.bf16.msra.mxu0 %v8782_v34  ;;  %v1385_v34 = vld [vmem:[%s12008_s7 + $0x20] sm:$0xff]  ;;  %v1403_v37 = vld [vmem:[%s12008_s7 + $0xb0] sm:$0xff] }
 0x10f   : > { %8787 = vmatprep.subr.bf16.mxu0 %v8786_v56  ;;  %v8804_v39 = vpack.c.bf16 %v1386_v35, %v1385_v34  ;;  %v8806_v40 = vpack.c.bf16 %v1404_v38, %v1403_v37 }
 0x111   : > { %8223 = vmatmul.mubr.msk.f32.vlgmr.msra.gmra.mrb[8].mxu1 %vm1110_vm2, %v1108_v42  ;;  %v1388_v42 = vld [vmem:[%s12008_s7 + $0x38] sm:$0xff]  ;;  %vm9797_vm2 = vmmov 1  }
 0x112   : > { %8765 = vmatpush1.bf16.msra.mxu1 %v8764_v43  ;;  %1287 = vmatprep.mubr.f32.mxu1 %v11950_v0  ;;  %v1405_v43 = vld [vmem:[%s12008_s7 + $0xc0] sm:$0xff]  ;;  %v8808_v45 = vpack.c.bf16 %v1388_v42, %v1387_v41  ;;  %v1588_v41 = vld [vmem:[%s12009_s8 + $0x30] sm:$0xff]  ;;  %v1589_v42 = vld [vmem:[%s12009_s8 + $0x38] sm:$0xff] }
 0x113   : > { %8767 = vmatprep.subr.bf16.mxu1 %v8766_v44  ;;  %8789 = vmatpush3.bf16.msra.mxu0 %v8786_v56  ;;  %v1406_v44 = vld [vmem:[%s12008_s7 + $0xc8] sm:$0xff] }
 0x114   : > { %8791 = vmatprep.subr.bf16.mxu0 %v8790_v2  ;;  %v8810_v46 = vpack.c.bf16 %v1406_v44, %v1405_v43  ;;  %v1410_v56 = vld [vmem:[%s12008_s7 + $0xe8] sm:$0xff] }
 0x115   : > { %v8818_v58 = vpack.c.bf16 %v1410_v56, %v1409_v55 }
 0x116   : > { %8769 = vmatpush1.bf16.msra.mxu1 %v8768_v47  ;;  %v1389_v47 = vld [vmem:[%s12008_s7 + $0x40] sm:$0xff] }
 0x117   : > { %8771 = vmatprep.subr.bf16.mxu1 %v8770_v50  ;;  %8793 = vmatpush3.bf16.msra.mxu0 %v8790_v2  ;;  %v1408_v50 = vld [vmem:[%s12008_s7 + $0xd8] sm:$0xff]  ;;  %v8812_v51 = vpack.c.bf16 %v1390_v48, %v1389_v47  ;;  %v1411_v2 = vld [vmem:[%s12008_s7 + $0xf0] sm:$0xff]  ;;  %v1590_v47 = vld [vmem:[%s12009_s8 + $0x40] sm:$0xff] }
 0x118   : > { %8795 = vmatprep.subr.bf16.mxu0 %v8794_v5  ;;  %v8814_v52 = vpack.c.bf16 %v1408_v50, %v1407_v49  ;;  %v8822_v4 = vpack.c.bf16 %v1412_v3, %v1411_v2  ;;  %v1395_v5 = vld [vmem:[%s12008_s7 + $0x70] sm:$0xff]  ;;  %v1591_v48 = vld [vmem:[%s12009_s8 + $0x48] sm:$0xff] }
 0x119   : > { %v8824_v7 = vpack.c.bf16 %v1396_v6, %v1395_v5  ;;  %v8858_v49 = vpack.c.bf16 %v1591_v48, %v1590_v47  ;;  %v1592_v50 = vld [vmem:[%s12009_s8 + $0x50] sm:$0xff] }
 0x11a   : > { %8773 = vmatpush1.bf16.msra.mxu1 %v8772_v54  ;;  %v1392_v54 = vld [vmem:[%s12008_s7 + $0x58] sm:$0xff] }
 0x11b   : > { %8775 = vmatprep.subr.bf16.mxu1 %v8774_v59  ;;  %v8816_v57 = vpack.c.bf16 %v1392_v54, %v1391_v53  ;;  %v1393_v59 = vld [vmem:[%s12008_s7 + $0x60] sm:$0xff] }
 0x11c   : > { %v8820_v61 = vpack.c.bf16 %v1394_v60, %v1393_v59  ;;  %v1594_v53 = vld [vmem:[%s12009_s8 + $0x60] sm:$0xf] }
 0x11e   : > { %8777 = vmatpush1.bf16.msra.mxu1 %v8776_v63  ;;  %v1420_v63 = vld [vmem:[%s12008_s7 + $0x138] sm:$0xff] }
 0x11f   : > { %8827 = vmatprep.subr.bf16.mxu1 %v8826_v8  ;;  %v8838_v1 = vpack.c.bf16 %v1420_v63, %v1419_v62 }
 0x1dc   : > { %v7926_v9 = vpop.f32.mrb[0].mxu0 }
 0x1dd   : > { %v7927_v10 = vpop.f32.mrb[1].mxu0 }
 0x1de   : > { %v10376_v11 = vadd.f32 %v7927_v10, %v7926_v9  ;;  %v1582_v9 = vld [vmem:[%s12009_s8] sm:$0xff]  ;;  %v1583_v10 = vld [vmem:[%s12009_s8 + $0x8] sm:$0xff] }
 0x1e0   : > { %v7929_v12 = vpop.f32.mrb[2].mxu0 }
 0x1e1   : > { %v7930_v13 = vpop.f32.mrb[3].mxu0 }
 0x1e2   : > { %v10387_v17 = vadd.f32 %v7930_v13, %v7929_v12  ;;  %v8842_v12 = vpack.c.bf16 %v1583_v10, %v1582_v9  ;;  %v758_v13 = vld [vmem:[%s12010_s23 + $0x28] sm:$0xff] }
 0x1e4   : > { %v8224_v21 = vpop.f32.mrb[8].mxu1  ;;  %v1106_v19 = vadd.f32 %v10387_v17, %v758_v13  ;;  %v1587_v17 = vld [vmem:[%s12009_s8 + $0x28] sm:$0xff] }
 0x1e5   : > { %v1183_v23 = vpop.f32.mrb[9].mxu1  ;;  %v8850_v34 = vpack.c.bf16 %v1587_v17, %v1586_v25 }
 0x1e6   : > { %7649 = vmatmul.mubr.msk.f32.vlgmr.msra.gmra.mrb[4].mxu1 %vm1216_vm3, %v1183_v23  ;;  %8241 = vmatprep.mubr.msk.f32.mxu0 %vm1216_vm3, %v1183_v23  ;;  %v1103_v23 = vadd.f32 %v10376_v11, %v755_v14  ;;  %v756_v11 = vld [vmem:[%s12010_s23 + $0x18] sm:$0xff] }
 0x1e7   : > { %8242 = vmatmul.mubr.msk.f32.vlgmr.msra.gmra.mrb[4].mxu0 %vm1216_vm3, %v8224_v21  ;;  %1293 = vmatprep.mubr.f32.mxu1 %v11950_v0 }
 0x1e8   : > { %8797 = vmatpush3.bf16.msra.mxu0 %v8796_v22  ;;  %8829 = vmatpush3.bf16.msra.mxu1 %v8826_v8  ;;  %v1421_v8 = vld [vmem:[%s12008_s7 + $0x140] sm:$0xf] }
 0x1e9   : > { %8799 = vmatprep.subr.bf16.mxu0 %v8798_v24  ;;  %8831 = vmatprep.subr.bf16.mxu1 %v8830_v28  ;;  %v1585_v24 = vld [vmem:[%s12009_s8 + $0x18] sm:$0xff] }
 0x1ea   : > { %7650 = vmatmul.mubr.msk.f32.gmra.mrb[6].mxu1 %vm1216_vm3, %v8224_v21 }
 0x1ec   : > { %8801 = vmatpush3.bf16.msra.mxu0 %v8800_v32  ;;  %8833 = vmatpush3.bf16.msra.mxu1 %v8830_v28 }
 0x1ed   : > { %8803 = vmatprep.subr.bf16.mxu0 %v8802_v33  ;;  %8835 = vmatprep.subr.bf16.mxu1 %v8834_v36  ;;  %v8846_v33 = vpack.c.bf16 %v1585_v24, %v1584_v20 }
 0x1f0   : > { %8805 = vmatpush3.bf16.msra.mxu0 %v8804_v39  ;;  %8837 = vmatpush3.bf16.msra.mxu1 %v8834_v36 }
 0x1f1   : > { %8807 = vmatprep.subr.bf16.mxu0 %v8806_v40  ;;  %8839 = vmatprep.subr.bf16.mxu1 %v8838_v1 }
 0x1f4   : > { %8809 = vmatpush3.bf16.msra.mxu0 %v8808_v45  ;;  %8841 = vmatpush3.bf16.msra.mxu1 %v8838_v1 }
 0x1f5   : > { %8811 = vmatprep.subr.bf16.mxu0 %v8810_v46  ;;  %8260 = vmatprep.subr.msk.mxu1 %vm771_vm0, %v1421_v8  ;;  %v8854_v46 = vpack.c.bf16 %v1589_v42, %v1588_v41 }
 0x1f8   : > { %8813 = vmatpush3.bf16.msra.mxu0 %v8812_v51  ;;  %8261 = vmatpush3.msk.msra.mxu1 %vm771_vm0, %v1421_v8  ;;  %v1593_v51 = vld [vmem:[%s12009_s8 + $0x58] sm:$0xff] }
 0x1f9   : > { %8815 = vmatprep.subr.bf16.mxu0 %v8814_v52  ;;  %v8862_v52 = vpack.c.bf16 %v1593_v51, %v1592_v50 }
 0x1fc   : > { %8817 = vmatpush3.bf16.msra.mxu0 %v8816_v57 }
 0x1fd   : > { %8819 = vmatprep.subr.bf16.mxu0 %v8818_v58 }
 0x200   : > { %8821 = vmatpush3.bf16.msra.mxu0 %v8820_v61 }
 0x201   : > { %8823 = vmatprep.subr.bf16.mxu0 %v8822_v4 }
 0x204   : > { %8825 = vmatpush3.bf16.msra.mxu0 %v8824_v7 }
 0x205   : > { %8843 = vmatprep.subr.bf16.mxu0 %v8842_v12 }
 0x2b9   : > { %v1289_v18 = vpop.f32.mrb[4].mxu1 }
 0x2ba   : > { %v1291_v21 = vpop.f32.mrb[5].mxu1  ;;  %v8243_v22 = vpop.f32.mrb[4].mxu0  ;;  %v10535_v29 = vadd.f32 %v1289_v18, %v753_v16 }
 0x2bb   : > { %v10530_v26 = vadd.f32 %v1291_v21, %v754_v15  ;;  %v1380_v27 = vadd.f32 %v8243_v22, %v1106_v19  ;;  %v1366_v28 = vpop.f32.mrb[5].mxu0 }
 0x2bc   : > { %v1377_v30 = vadd.f32 %v1366_v28, %v1103_v23 }
 0x2bd   : > { %v1295_v32 = vpop.f32.mrb[6].mxu1  ;;  %1496 = vmatprep.mubr.f32.mxu0 %v10530_v26 }
 0x2be   : > { %v10541_v35 = vadd.f32 %v1295_v32, %v756_v11  ;;  %v1297_v36 = vpop.f32.mrb[7].mxu1  ;;  %1497 = vmatmul.mubr.f32.vlgmr.msra.gmra.mrb[6].mxu0 %v10535_v29  ;;  %8262 = vmatprep.mubr.msk.f32.mxu1 %vm1422_vm4, %v1377_v30  ;;  %v9395_v37 = vpack.i.bf16 %v1377_v30, %v10530_v26  ;;  %v10561_v43 = vpack.c.bf16 %v1380_v27, %v1377_v30 }
 0x2bf   : > { %v10545_v38 = vadd.f32 %v1297_v36, %v757_v31  ;;  %8263 = vmatmul.mubr.msk.f32.vlgmr.msra.gmra.mrb[10].mxu1 %vm1422_vm4, %v1380_v27  ;;  %8845 = vmatpush3.bf16.msra.mxu0 %v8842_v12 }
 0x2c0   : > { %9396 = vrot.lane.b32.xlu0 %v9395_v37, %s11969_s2  ;;  %v9405_v39 = vpack.i.bf16 %v10541_v35, %v10535_v29  ;;  %8847 = vmatprep.subr.bf16.mxu0 %v8846_v33 }
 0x2c1   : > { %1501 = vmatprep.mubr.f32.mxu0 %v10545_v38  ;;  %v9400_v40 = vpack.i.bf16 %v1380_v27, %v10545_v38 }
 0x2c2   : > { %9406 = vrot.lane.b32.xlu1 %v9405_v39, %s11969_s2  ;;  %1502 = vmatmul.mubr.f32.gmra.mrb[8].mxu0 %v10541_v35 }
 0x2c3   : > { %8849 = vmatpush3.bf16.msra.mxu0 %v8846_v33 }
 0x2c4   : > { %9401 = vrot.lane.b32.xlu0 %v9400_v40, %s11969_s2  ;;  %8851 = vmatprep.subr.bf16.mxu0 %v8850_v34 }
 0x2c6   : > { %9411 = vrot.lane.b32.xlu1 %v9395_v37, %s11967_s28 }
 0x2c7   : > { %8853 = vmatpush3.bf16.msra.mxu0 %v8850_v34 }
 0x2c8   : > { %9416 = vrot.lane.b32.xlu0 %v9400_v40, %s11967_s28  ;;  %8855 = vmatprep.subr.bf16.mxu0 %v8854_v46 }
 0x2ca   : > { %9421 = vrot.lane.b32.xlu1 %v9405_v39, %s11967_s28 }
 0x2cb   : > { %8857 = vmatpush3.bf16.msra.mxu0 %v8854_v46 }
 0x2cc   : > { %9426 = vrot.lane.b32.xlu0 %v9395_v37, %s9777_s6  ;;  %8859 = vmatprep.subr.bf16.mxu0 %v8858_v49 }
 0x2ce   : > { %9431 = vrot.lane.b32.xlu1 %v9400_v40, %s9777_s6 }
 0x2cf   : > { %8861 = vmatpush3.bf16.msra.mxu0 %v8858_v49 }
 0x2d0   : > { %9436 = vrot.lane.b32.xlu0 %v9405_v39, %s9777_s6  ;;  %8863 = vmatprep.subr.bf16.mxu0 %v8862_v52  ;;  %s9780_s6 = smov 92  }
 0x2d2   : > { %9441 = vrot.lane.b32.xlu1 %v9395_v37, %s9778_s5 }
 0x2d3   : > { %8865 = vmatpush3.bf16.msra.mxu0 %v8862_v52 }
 0x2d4   : > { %9446 = vrot.lane.b32.xlu0 %v9400_v40, %s9778_s5  ;;  %8289 = vmatprep.subr.msk.mxu0 %vm771_vm0, %v1594_v53 }
 0x2d6   : > { %9451 = vrot.lane.b32.xlu1 %v9405_v39, %s9778_s5  ;;  %s12050_s5 = smov 124  }
 0x2d7   : > { %8290 = vmatpush3.msk.msra.mxu0 %vm771_vm0, %v1594_v53 }
 0x2d8   : > { %9456 = vrot.lane.b32.xlu0 %v9395_v37, %s9779_s29 }
 0x2da   : > { %9461 = vrot.lane.b32.xlu1 %v9400_v40, %s9779_s29 }
 0x2dc   : > { %9466 = vrot.lane.b32.xlu0 %v9405_v39, %s9779_s29 }
 0x2de   : > { %9471 = vrot.lane.b32.xlu1 %v9395_v37, %s9780_s6 }
 0x2e0   : > { %9476 = vrot.lane.b32.xlu0 %v9400_v40, %s9780_s6 }
 0x2e2   : > { %9481 = vrot.lane.b32.xlu1 %v9405_v39, %s9780_s6  ;;  %s11971_s6 = smov 122  }
 0x2e4   : > { %9486 = vrot.lane.b32.xlu0 %v9395_v37, %s9781_s25 }
 0x2e6   : > { %9491 = vrot.lane.b32.xlu1 %v9400_v40, %s9781_s25 }
 0x2e8   : > { %9496 = vrot.lane.b32.xlu0 %v9405_v39, %s9781_s25  ;;  %s9785_s25 = smov 116  }
 0x2ea   : > { %9501 = vrot.lane.b32.xlu1 %v9395_v37, %s9782_s27 }
 0x2ec   : > { %9506 = vrot.lane.b32.xlu0 %v9400_v40, %s9782_s27 }
 0x2ee   : > { %9511 = vrot.lane.b32.xlu1 %v9405_v39, %s9782_s27  ;;  %s9786_s27 = smov 107  }
 0x332   : > { %v9397_v54 = vpop.permute.xlu0 %9396 }
 0x333   : > { %v9399_v55 = vunpack.i.h.bf16 %v9397_v54  ;;  %v9398_v56 = vunpack.i.l.bf16 %v9397_v54 }
 0x334   : > { %v9407_v57 = vpop.permute.xlu1 %9406 }
 0x335   : > { %v9408_v58 = vunpack.i.l.bf16 %v9407_v57  ;;  %v10591_v59 = vsel %vm1875_vm5, %v9398_v56, %v9399_v55  ;;  %v9409_v61 = vunpack.i.h.bf16 %v9407_v57 }
 0x336   : > { %v9402_v60 = vpop.permute.xlu0 %9401 }
 0x337   : > { %v10594_v62 = vsel %vm1875_vm5, %v9408_v58, %v9398_v56  ;;  %v9404_v63 = vunpack.i.h.bf16 %v9402_v60  ;;  %v9403_v1 = vunpack.i.l.bf16 %v9402_v60 }
 0x338   : > { %v10596_v2 = vpop.permute.xlu1 %9411 }
 0x339   : > { %v10598_v3 = vpack.c.bf16 %v9404_v63, %v9399_v55  ;;  %v10601_v4 = vsel %vm1875_vm5, %v9409_v61, %v9403_v1  ;;  %v9414_v5 = vunpack.i.h.bf16 %v10596_v2  ;;  %v9413_v6 = vunpack.i.l.bf16 %v10596_v2  ;;  %v10842_v2 = vld [vmem:[%s12011_s11 + $0x20] sm:$0xff] }
 0x33a   : > { %v10607_v8 = vpop.permute.xlu0 %9416  ;;  %v10610_v9 = vsel %vm1875_vm5, %v9403_v1, %v9404_v63  ;;  %vm3616_vm5 = vcmask 244736  }
 0x33b   : > { %v11964_v10 = vunpack.i.h.bf16 %v10607_v8  ;;  %v9418_v12 = vunpack.i.l.bf16 %v10607_v8  ;;  %8883 = vmatprep.subr.bf16.mxu0 %v10598_v3  ;;  %v10620_v14 = vsel %vm2217_vm6, %v9413_v6, %v9414_v5 }
 0x33c   : > { %v9422_v15 = vpop.permute.xlu1 %9421 }
 0x33d   : > { %v9424_v16 = vunpack.i.h.bf16 %v9422_v15  ;;  %v9423_v18 = vunpack.i.l.bf16 %v9422_v15  ;;  %v10625_v19 = vsel %vm2217_vm6, %v9418_v12, %v11964_v10 }
 0x33e   : > { %v10627_v20 = vpop.permute.xlu0 %9426 }
 0x33f   : > { %v10632_v22 = vsel %vm2217_vm6, %v9423_v18, %v9413_v6  ;;  %v10635_v23 = vsel %vm2217_vm6, %v9424_v16, %v9418_v12  ;;  %v11961_v24 = vunpack.i.h.bf16 %v10627_v20  ;;  %v9428_v25 = vunpack.i.l.bf16 %v10627_v20 }
 0x340   : > { %v10641_v27 = vpop.permute.xlu1 %9431  ;;  %vm4629_vm6 = vcmask 637952  }
 0x341   : > { %v11960_v28 = vunpack.i.h.bf16 %v10641_v27  ;;  %v9433_v11 = vunpack.i.l.bf16 %v10641_v27  ;;  %v10648_v30 = vsel %vm2407_vm7, %v9428_v25, %v11961_v24 }
 0x342   : > { %v9437_v31 = vpop.permute.xlu0 %9436 }
 0x343   : > { %v9439_v32 = vunpack.i.h.bf16 %v9437_v31  ;;  %v9438_v33 = vunpack.i.l.bf16 %v9437_v31  ;;  %v10653_v34 = vsel %vm2407_vm7, %v9433_v11, %v11960_v28 }
 0x344   : > { %v10655_v36 = vpop.permute.xlu1 %9441 }
 0x345   : > { %v10660_v39 = vsel %vm2407_vm7, %v9439_v32, %v9433_v11  ;;  %v10663_v40 = vsel %vm2407_vm7, %v9438_v33, %v9428_v25  ;;  %v11959_v41 = vunpack.i.h.bf16 %v10655_v36  ;;  %v9443_v42 = vunpack.i.l.bf16 %v10655_v36 }
 0x346   : > { %v10669_v47 = vpop.permute.xlu0 %9446  ;;  %vm5550_vm7 = vcmask 179200  }
 0x347   : > { %v11958_v48 = vunpack.i.h.bf16 %v10669_v47  ;;  %v9448_v49 = vunpack.i.l.bf16 %v10669_v47  ;;  %v10676_v50 = vsel %vm2597_vm8, %v9443_v42, %v11959_v41 }
 0x348   : > { %v9452_v51 = vpop.permute.xlu1 %9451 }
 0x349   : > { %v9454_v52 = vunpack.i.h.bf16 %v9452_v51  ;;  %v9453_v53 = vunpack.i.l.bf16 %v9452_v51  ;;  %v10681_v54 = vsel %vm2597_vm8, %v9448_v49, %v11958_v48 }
 0x34a   : > { %v10683_v55 = vpop.permute.xlu0 %9456 }
 0x34b   : > { %v10688_v57 = vsel %vm2597_vm8, %v9453_v53, %v9443_v42  ;;  %v10691_v58 = vsel %vm2597_vm8, %v9454_v52, %v9448_v49  ;;  %v11957_v60 = vunpack.i.h.bf16 %v10683_v55  ;;  %v9458_v61 = vunpack.i.l.bf16 %v10683_v55 }
 0x34c   : > { %v10697_v1 = vpop.permute.xlu1 %9461 }
 0x34d   : > { %v11956_v6 = vunpack.i.h.bf16 %v10697_v1  ;;  %v9463_v12 = vunpack.i.l.bf16 %v10697_v1  ;;  %v10704_v15 = vsel %vm2787_vm9, %v9458_v61, %v11957_v60 }
 0x34e   : > { %v9467_v16 = vpop.permute.xlu0 %9466 }
 0x34f   : > { %v9469_v18 = vunpack.i.h.bf16 %v9467_v16  ;;  %v9468_v25 = vunpack.i.l.bf16 %v9467_v16  ;;  %v10709_v11 = vsel %vm2787_vm9, %v9463_v12, %v11956_v6 }
 0x350   : > { %v10711_v31 = vpop.permute.xlu1 %9471 }
 0x351   : > { %v10716_v33 = vsel %vm2787_vm9, %v9469_v18, %v9463_v12  ;;  %v10719_v42 = vsel %vm2787_vm9, %v9468_v25, %v9458_v61  ;;  %v11955_v49 = vunpack.i.h.bf16 %v10711_v31  ;;  %v9473_v51 = vunpack.i.l.bf16 %v10711_v31 }
 0x352   : > { %v10725_v53 = vpop.permute.xlu0 %9476 }
 0x353   : > { %v11953_v16 = vunpack.i.h.bf16 %v10725_v53  ;;  %v9478_v63 = vunpack.i.l.bf16 %v10725_v53  ;;  %v10732_v12 = vsel %vm2977_vm10, %v9473_v51, %v11955_v49 }
 0x354   : > { %v9482_v61 = vpop.permute.xlu1 %9481 }
 0x355   : > { %v9484_v18 = vunpack.i.h.bf16 %v9482_v61  ;;  %v9483_v25 = vunpack.i.l.bf16 %v9482_v61  ;;  %v10737_v32 = vsel %vm2977_vm10, %v9478_v63, %v11953_v16 }
 0x356   : > { %v10739_v52 = vpop.permute.xlu0 %9486 }
 0x357   : > { %v10744_v46 = vsel %vm2977_vm10, %v9483_v25, %v9473_v51  ;;  %v10747_v37 = vsel %vm2977_vm10, %v9484_v18, %v9478_v63  ;;  %v11952_v17 = vunpack.i.h.bf16 %v10739_v52  ;;  %v9488_v61 = vunpack.i.l.bf16 %v10739_v52 }
 0x358   : > { %v10753_v45 = vpop.permute.xlu1 %9491 }
 0x359   : > { %v11954_v0 = vunpack.i.h.bf16 %v10753_v45  ;;  %v9493_v44 = vunpack.i.l.bf16 %v10753_v45  ;;  %v10760_v51 = vsel %vm3167_vm11, %v9488_v61, %v11952_v17 }
 0x35a   : > { %v9497_v63 = vpop.permute.xlu0 %9496 }
 0x35b   : > { %v9499_v18 = vunpack.i.h.bf16 %v9497_v63  ;;  %v9498_v25 = vunpack.i.l.bf16 %v9497_v63  ;;  %v10765_v56 = vsel %vm3167_vm11, %v9493_v44, %v11954_v0 }
 0x35c   : > { %v10767_v21 = vpop.permute.xlu1 %9501 }
 0x35d   : > { %v10772_v13 = vsel %vm3167_vm11, %v9499_v18, %v9493_v44  ;;  %v10775_v17 = vsel %vm3167_vm11, %v9498_v25, %v9488_v61  ;;  %v11963_v16 = vunpack.i.h.bf16 %v10767_v21  ;;  %v11962_v63 = vunpack.i.l.bf16 %v10767_v21 }
 0x35e   : > { %v10781_v49 = vpop.permute.xlu0 %9506 }
 0x35f   : > { %v9509_v6 = vunpack.i.h.bf16 %v10781_v49  ;;  %v11965_v60 = vunpack.i.l.bf16 %v10781_v49  ;;  %v10790_v44 = vsel %vm3357_vm12, %v11962_v63, %v11963_v16 }
 0x361   : > { %v10797_v61 = vsel %vm3357_vm12, %v11965_v60, %v9509_v6  ;;  %v10804_v60 = vld [vmem:[%s12011_s11 + $0x10] sm:$0xff] }
 0x391   : > { %v7977_v25 = vpop.f32.mrb[6].mxu0 }
 0x392   : > { %v7978_v0 = vpop.f32.mrb[7].mxu0  ;;  %v8264_v7 = vpop.f32.mrb[10].mxu1 }
 0x393   : > { %v7979_v48 = vadd.f32 %v7978_v0, %v7977_v25  ;;  %v1573_v41 = vpop.f32.mrb[11].mxu1  ;;  %v10812_v0 = vld [vmem:[%s12011_s11 + $0x18] sm:$0xff]  ;;  %v12017_v25 = vunpack.i.h.bf16 %v10669_v47  ;;  %v10892_v47 = vld [vmem:[%s12011_s11 + $0x40] sm:$0xff] }
 0x395   : > { %v1574_v28 = vadd.f32 %v7979_v48, %v1573_v41  ;;  %v7980_v24 = vpop.f32.mrb[8].mxu0  ;;  %v1681_v48 = vld [vmem:[%s12015_s9 + $0x8] sm:$0xff] }
 0x396   : > { %v7981_v63 = vpop.f32.mrb[9].mxu0 }
 0x397   : > { %v7982_v16 = vadd.f32 %v7981_v63, %v7980_v24  ;;  %8291 = vmatprep.mubr.msk.f32.mxu0 %vm1595_vm13, %v1574_v28  ;;  %v12016_v63 = vunpack.i.h.bf16 %v10655_v36  ;;  %v10887_v36 = vld [vmem:[%s12011_s11 + $0x38] sm:$0xff] }
 0x399   : > { %v1579_v10 = vadd.f32 %v8264_v7, %v7982_v16  ;;  %v10819_v7 = vld [vmem:[%s12011_s11] sm:$0xff]  ;;  %v1682_v16 = vld [vmem:[%s12015_s9 + $0x10] sm:$0xff] }
 0x39b   : > { %8292 = vmatmul.mubr.msk.f32.vlgmr.msra.gmra.mrb[10].mxu0 %vm1595_vm13, %v1579_v10  ;;  %v9515_v18 = vpack.i.bf16 %v1579_v10, %v1574_v28  ;;  %v10821_v24 = vpack.c.bf16 %v1579_v10, %v1574_v28  ;;  %v10836_v10 = vld [vmem:[%s12011_s11 + $0x8] sm:$0xff] }
 0x39c   : > { %8885 = vmatpush3.bf16.msra.mxu0 %v10598_v3  ;;  %8318 = vmatprep.mubr.msk.f32.mxu0 %vm1772_vm14, %v10804_v60  ;;  %v12012_v3 = vunpack.i.h.bf16 %v10607_v8  ;;  %v10855_v28 = vld [vmem:[%s12011_s11 + $0x28] sm:$0xff] }
 0x39d   : > { %8891 = vmatprep.subr.bf16.mxu0 %v10561_v43  ;;  %9516 = vrot.lane.b32.xlu0 %v9515_v18, %s11969_s2  ;;  %s11974_s2 = smov 120  }
 0x39e   : > { %v8898_v41 = vpack.c.bf16 %v12012_v3, %v9414_v5  ;;  %v12014_v5 = vunpack.i.h.bf16 %v10641_v27  ;;  %v1680_v27 = vld [vmem:[%s12015_s9] sm:$0xff]  ;;  %v8914_v3 = vpack.c.bf16 %v12017_v25, %v12016_v63  ;;  %v12021_v63 = vunpack.i.h.bf16 %v10725_v53 }
 0x39f   : > { %8319 = vmatmul.mubr.msk.f32.vlgmr.msra.gmra.mrb[12].mxu0 %vm1772_vm14, %v10812_v0  ;;  %v12022_v53 = vunpack.i.h.bf16 %v10739_v52  ;;  %v10946_v52 = vld [vmem:[%s12011_s11 + $0x70] sm:$0xff] }
 0x3a0   : > { %8893 = vmatpush3.bf16.msra.mxu0 %v10561_v43  ;;  %8325 = vmatprep.mubr.msk.f32.mxu0 %vm1772_vm14, %v10819_v7  ;;  %v12013_v43 = vunpack.i.h.bf16 %v10627_v20  ;;  %v10861_v20 = vld [vmem:[%s12011_s11 + $0x30] sm:$0xff] }
 0x3a1   : > { %8899 = vmatprep.subr.bf16.mxu0 %v8898_v41  ;;  %9526 = vrot.lane.b32.xlu0 %v9515_v18, %s11967_s28  ;;  %s9791_s28 = smov 115  }
 0x3a2   : > { %v8906_v8 = vpack.c.bf16 %v12014_v5, %v12013_v43  ;;  %v1683_v43 = vld [vmem:[%s12015_s9 + $0x18] sm:$0xff] }
 0x3a3   : > { %v8870_v5 = vpack.c.bf16 %v1683_v43, %v1682_v16  ;;  %v10905_v16 = vld [vmem:[%s12011_s11 + $0x48] sm:$0xff] }
 0x3a4   : > { %v10941_v43 = vld [vmem:[%s12011_s11 + $0x68] sm:$0xff] }
 0x3a5   : > { %9536 = vrot.lane.b32.xlu0 %v9515_v18, %s11966_s26  ;;  %s11973_s26 = smov 121  }
 0x3a7   : > { %8326 = vmatmul.mubr.msk.f32.vlgmr.msra.gmra.mrb[12].mxu0 %vm1772_vm14, %v10836_v10 }
 0x3a8   : > { %8901 = vmatpush3.bf16.msra.mxu0 %v8898_v41  ;;  %8332 = vmatprep.mubr.msk.f32.mxu0 %vm1772_vm14, %v10842_v2  ;;  %v8866_v41 = vpack.c.bf16 %v1681_v48, %v1680_v27  ;;  %v12019_v27 = vunpack.i.h.bf16 %v10697_v1  ;;  %v12020_v1 = vunpack.i.h.bf16 %v10711_v31  ;;  %v10928_v31 = vld [vmem:[%s12011_s11 + $0x60] sm:$0xff] }
 0x3a9   : > { %8907 = vmatprep.subr.bf16.mxu0 %v8906_v8  ;;  %9546 = vrot.lane.b32.xlu0 %v9515_v18, %s9784_s0  ;;  %s12026_s0 = smov 127  }
 0x3aa   : > { %8867 = vmatprep.subr.bf16.mxu1 %v8866_v41  ;;  %v8930_v25 = vpack.c.bf16 %v12021_v63, %v12020_v1 }
 0x3ab   : > { %8869 = vmatpush3.bf16.msra.mxu1 %v8866_v41 }
 0x3ac   : > { %8871 = vmatprep.subr.bf16.mxu1 %v8870_v5 }
 0x3ad   : > { %9556 = vrot.lane.b32.xlu0 %v9515_v18, %s9785_s25 }
 0x3af   : > { %8333 = vmatmul.mubr.msk.f32.vlgmr.msra.gmra.mrb[12].mxu0 %vm1772_vm14, %v10855_v28  ;;  %8873 = vmatpush3.bf16.msra.mxu1 %v8870_v5 }
 0x3b0   : > { %8909 = vmatpush3.bf16.msra.mxu0 %v8906_v8  ;;  %8339 = vmatprep.mubr.msk.f32.mxu0 %vm1772_vm14, %v10861_v20  ;;  %v12018_v8 = vunpack.i.h.bf16 %v10683_v55  ;;  %v10910_v55 = vld [vmem:[%s12011_s11 + $0x50] sm:$0xff] }
 0x3b1   : > { %8915 = vmatprep.subr.bf16.mxu0 %v8914_v3  ;;  %9566 = vrot.lane.b32.xlu0 %v9515_v18, %s9779_s29  ;;  %s9787_s29 = smov 106  }
 0x3b2   : > { %v8922_v48 = vpack.c.bf16 %v12019_v27, %v12018_v8  ;;  %v10959_v8 = vld [vmem:[%s12011_s11 + $0x78] sm:$0xff]  ;;  %v1770_v27 = vld [vmem:[%s12025_s10] sm:$0xff] }
 0x3b5   : > { %9576 = vrot.lane.b32.xlu0 %v9515_v18, %s9786_s27  ;;  %s9792_s27 = smov 114  }
 0x3b7   : > { %8340 = vmatmul.mubr.msk.f32.vlgmr.msra.gmra.mrb[12].mxu0 %vm1772_vm14, %v10887_v36 }
 0x3b8   : > { %8917 = vmatpush3.bf16.msra.mxu0 %v8914_v3  ;;  %8346 = vmatprep.mubr.msk.f32.mxu0 %vm1772_vm14, %v10892_v47  ;;  %v12023_v3 = vunpack.i.h.bf16 %v10753_v45  ;;  %v12024_v45 = vunpack.i.h.bf16 %v10767_v21 }
 0x3b9   : > { %8923 = vmatprep.subr.bf16.mxu0 %v8922_v48  ;;  %9586 = vrot.lane.b32.xlu0 %v9515_v18, %s9787_s29  ;;  %v10923_v18 = vld [vmem:[%s12011_s11 + $0x58] sm:$0xff]  ;;  %s9796_s29 = smov 125  }
 0x3ba   : > { %v8938_v41 = vpack.c.bf16 %v12023_v3, %v12022_v53  ;;  %v8946_v5 = vpack.c.bf16 %v9509_v6, %v12024_v45  ;;  %v1684_v6 = vld [vmem:[%s12015_s9 + $0x20] sm:$0xf] }
 0x3bb   : > { %8302 = vmatprep.subr.msk.mxu1 %vm771_vm0, %v1684_v6 }
 0x3bc   : > { %8303 = vmatpush3.msk.msra.mxu1 %vm771_vm0, %v1684_v6  ;;  %vm3623_vm0 = vcmask 1045504  }
 0x3bd   : > { %vm11432_vm4 = vmpackc.low %vm3623_vm0, %vm9797_vm2 }
 0x3bf   : > { %8347 = vmatmul.mubr.msk.f32.vlgmr.msra.gmra.mrb[12].mxu0 %vm1772_vm14, %v10905_v16 }
 0x3c0   : > { %8925 = vmatpush3.bf16.msra.mxu0 %v8922_v48  ;;  %8353 = vmatprep.mubr.msk.f32.mxu0 %vm1772_vm14, %v10910_v55  ;;  %v1771_v48 = vld [vmem:[%s12025_s10 + $0x8] sm:$0xff] }
 0x3c1   : > { %8931 = vmatprep.subr.bf16.mxu0 %v8930_v25  ;;  %v8874_v1 = vpack.c.bf16 %v1771_v48, %v1770_v27  ;;  %v12029_v27 = vpack.c.bf16 %v10601_v4, %v10594_v62  ;;  %v12033_v62 = vpack.c.bf16 %v10625_v19, %v10620_v14  ;;  %v12040_v4 = vpack.c.bf16 %v10691_v58, %v10688_v57 }
 0x3c2   : > { %v12041_v14 = vpack.c.bf16 %v10709_v11, %v10704_v15  ;;  %v12042_v19 = vpack.c.bf16 %v10716_v33, %v10719_v42  ;;  %v12049_v57 = vunpack.i.l.bf16 %v10781_v49  ;;  %v7722_v11 = vld [vmem:[%s12011_s11 + $0xa0] sm:$0xff]  ;;  %v7723_v42 = vld [vmem:[%s12011_s11 + $0xa8] sm:$0xff]  ;;  %v7720_v49 = vld [vmem:[%s12011_s11 + $0x90] sm:$0xff] }
 0x3c3   : > { %8875 = vmatprep.subr.bf16.mxu1 %v8874_v1 }
 0x3c7   : > { %8354 = vmatmul.mubr.msk.f32.vlgmr.msra.gmra.mrb[12].mxu0 %vm1772_vm14, %v10923_v18 }
 0x3c8   : > { %8933 = vmatpush3.bf16.msra.mxu0 %v8930_v25  ;;  %8360 = vmatprep.mubr.msk.f32.mxu0 %vm1772_vm14, %v10928_v31 }
 0x3c9   : > { %8939 = vmatprep.subr.bf16.mxu0 %v8938_v41 }
 0x3cf   : > { %8361 = vmatmul.mubr.msk.f32.vlgmr.msra.gmra.mrb[12].mxu0 %vm1772_vm14, %v10941_v43 }
 0x3d0   : > { %8941 = vmatpush3.bf16.msra.mxu0 %v8938_v41  ;;  %8367 = vmatprep.mubr.msk.f32.mxu0 %vm1772_vm14, %v10946_v52  ;;  %v12027_v41 = vpack.c.bf16 %v10610_v9, %v10591_v59  ;;  %v10988_v59 = vld [vmem:[%s12011_s11 + $0x80] sm:$0xff]  ;;  %v10995_v9 = vld [vmem:[%s12011_s11 + $0x88] sm:$0xff] }
 0x3d1   : > { %8947 = vmatprep.subr.bf16.mxu0 %v8946_v5 }
 0x3d7   : > { %8368 = vmatmul.mubr.msk.f32.vlgmr.msra.gmra.mrb[12].mxu0 %vm1772_vm14, %v10959_v8 }
 0x3d8   : > { %8949 = vmatpush3.bf16.msra.mxu0 %v8946_v5  ;;  %8374 = vmatprep.mubr.msk.f32.mxu0 %vm1772_vm14, %v10988_v59 }
 0x3df   : > { %8375 = vmatmul.mubr.msk.f32.vlgmr.msra.gmra.mrb[12].mxu0 %vm1772_vm14, %v10995_v9 }
 0x46e   : > { %v8293_v63 = vpop.f32.mrb[10].mxu0 }
 0x46f   : > { %v1671_v25 = vpop.f32.mrb[11].mxu0 }
 0x470   : > { %8304 = vmatprep.mubr.msk.f32.mxu1 %vm1685_vm15, %v1671_v25  ;;  %v9520_v53 = vpack.i.bf16 %v8293_v63, %v1671_v25  ;;  %v10975_v3 = vpack.c.bf16 %v8293_v63, %v1671_v25  ;;  %v12032_v25 = vpack.c.bf16 %v10541_v35, %v10535_v29  ;;  %v12037_v29 = vpack.c.bf16 %v10653_v34, %v10648_v30  ;;  %v9512_v34 = vpop.permute.xlu1 %9511 }
 0x471   : > { %8305 = vmatmul.mubr.msk.f32.vlgmr.msra.gmra.mrb[12].mxu1 %vm1685_vm15, %v8293_v63  ;;  %v12031_v63 = vmov 0.0   ;;  %v12038_v35 = vpack.c.bf16 %v10660_v39, %v10663_v40  ;;  %v12045_v30 = vpack.c.bf16 %v10765_v56, %v10760_v51  ;;  %v9514_v39 = vunpack.i.h.bf16 %v9512_v34 }
 0x472   : > { %8877 = vmatpush3.bf16.msra.mxu1 %v8874_v1  ;;  %9521 = vrot.lane.b32.xlu1 %v9520_v53, %s12026_s0  ;;  %v12030_v1 = vpack.c.bf16 %v10545_v38, %v10530_v26  ;;  %v12035_v26 = vpack.c.bf16 %v10635_v23, %v10632_v22  ;;  %v12039_v38 = vpack.c.bf16 %v10681_v54, %v10676_v50  ;;  %v9513_v40 = vunpack.i.l.bf16 %v9512_v34  ;;  %v9517_v50 = vpop.permute.xlu0 %9516 }
 0x473   : > { %8879 = vmatprep.subr.bf16.mxu1 %v12027_v41  ;;  %v12043_v22 = vpack.c.bf16 %v10737_v32, %v10732_v12  ;;  %v12044_v23 = vpack.c.bf16 %v10747_v37, %v10744_v46  ;;  %v12046_v37 = vpack.c.bf16 %v10772_v13, %v10775_v17  ;;  %v12047_v46 = vpack.c.bf16 %v10797_v61, %v10790_v44 }
 0x474   : > { %v12048_v54 = vunpack.i.l.bf16 %v10767_v21  ;;  %v3360_v58 = vsel %vm3357_vm12, %v9514_v39, %v12049_v57  ;;  %v9518_v15 = vunpack.i.l.bf16 %v9517_v50  ;;  %v3548_v57 = vld [vmem:[%s11928_s13 + $0x80] sm:$0xff] }
 0x476   : > { %9531 = vrot.lane.b32.xlu1 %v9520_v53, %s12028_s17  ;;  %v3358_v56 = vsel %vm3357_vm12, %v9513_v40, %v12048_v54  ;;  %v9527_v21 = vpop.permute.xlu0 %9526  ;;  %v3546_v40 = vld [vmem:[%s11928_s13 + $0x70] sm:$0xff] }
 0x477   : > { %v8944_v13 = vpack.c.bf16 %v3360_v58, %v3358_v56  ;;  %v9529_v32 = vunpack.i.h.bf16 %v9527_v21  ;;  %v9528_v33 = vunpack.i.l.bf16 %v9527_v21  ;;  %v3550_v58 = vld [vmem:[%s11928_s13 + $0x90] sm:$0xff] }
 0x479   : > { %v9032_v12 = vpack.c.bf16 %v9529_v32, %v9528_v33  ;;  %v3552_v32 = vld [vmem:[%s11928_s13 + $0xa0] sm:$0xff]  ;;  %v3554_v33 = vld [vmem:[%s11928_s13 + $0xb0] sm:$0xff] }
 0x47a   : > { %9541 = vrot.lane.b32.xlu1 %v9520_v53, %s11971_s6  ;;  %s11976_s6 = smov 124   ;;  %v9537_v51 = vpop.permute.xlu0 %9536 }
 0x47b   : > { %v9539_v44 = vunpack.i.h.bf16 %v9537_v51  ;;  %v9538_v61 = vunpack.i.l.bf16 %v9537_v51  ;;  %v7740_v51 = vld [vmem:[%s12011_s11 + $0xe0] sm:$0xff] }
 0x47e   : > { %9551 = vrot.lane.b32.xlu1 %v9520_v53, %s11973_s26 }
 0x482   : > { %9561 = vrot.lane.b32.xlu1 %v9520_v53, %s11974_s2 }
 0x486   : > { %9571 = vrot.lane.b32.xlu1 %v9520_v53, %s9785_s25  ;;  %s11975_s25 = smov 123  }
 0x48a   : > { %9581 = vrot.lane.b32.xlu1 %v9520_v53, %s9791_s28  ;;  %s12034_s28 = smov 122  }
 0x48e   : > { %9591 = vrot.lane.b32.xlu1 %v9520_v53, %s9792_s27  ;;  %s12036_s27 = smov 118   ;;  %v3536_v53 = vld [vmem:[%s11928_s13 + $0x20] sm:$0xff] }
 0x544   : > { %v8306_v45 = vpop.f32.mrb[12].mxu1 }
 0x545   : > { %v1761_v5 = vpop.f32.mrb[13].mxu1 }
 0x546   : > { %8311 = vmatprep.mubr.msk.f32.mxu1 %vm1772_vm14, %v1761_v5  ;;  %v9600_v6 = vpack.i.bf16 %v8306_v45, %v1761_v5  ;;  %v11005_v48 = vpack.c.bf16 %v8306_v45, %v1761_v5 }
 0x547   : > { %8312 = vmatmul.mubr.msk.f32.vlgmr.msra.gmra.mrb[14].mxu1 %vm1772_vm14, %v8306_v45 }
 0x548   : > { %8881 = vmatpush1.bf16.msra.mxu1 %v12029_v27  ;;  %9601 = vrot.lane.b32.xlu1 %v9600_v6, %s12028_s17  ;;  %v3543_v27 = vld [vmem:[%s11928_s13 + $0x58] sm:$0xff] }
 0x549   : > { %9596 = vrot.lane.b32.xlu0 %v9600_v6, %s12026_s0  ;;  %8887 = vmatprep.subr.bf16.mxu1 %v12030_v1  ;;  %v3540_v1 = vld [vmem:[%s11928_s13 + $0x40] sm:$0xff] }
 0x54a   : > { %1956 = vmatprep.mubr.f32.mxu1 %v12031_v63 }
 0x54b   : > { %7666 = vmatmul.mubr.msk.f32.vlgmr.msra.gmra.mrb[16].mxu1 %vm1772_vm14, %v10804_v60  ;;  %v9519_v60 = vunpack.i.h.bf16 %v9517_v50  ;;  %v3549_v50 = vld [vmem:[%s11928_s13 + $0x88] sm:$0xff] }
 0x54c   : > { %8889 = vmatpush1.bf16.msra.mxu1 %v12032_v25  ;;  %9611 = vrot.lane.b32.xlu1 %v9600_v6, %s11975_s25  ;;  %s11602_s25 = sand.u32 1, %s9764_s3  }
 0x54d   : > { %9606 = vrot.lane.b32.xlu0 %v9600_v6, %s11976_s6  ;;  %8895 = vmatprep.subr.bf16.mxu1 %v12033_v62  ;;  %v9024_v17 = vpack.c.bf16 %v9519_v60, %v9518_v15  ;;  %v3553_v60 = vld [vmem:[%s11928_s13 + $0xa8] sm:$0xff]  ;;  %v3555_v15 = vld [vmem:[%s11928_s13 + $0xb8] sm:$0xff]  ;;  %s7632_s6 = sshll.u32 %s11602_s25, 5 }
 0x54e   : > { %1962 = vmatprep.mubr.f32.mxu1 %v12031_v63 }
 0x54f   : > { %7667 = vmatmul.mubr.msk.f32.gmra.mrb[18].mxu1 %vm1772_vm14, %v10812_v0  ;;  %v7721_v0 = vld [vmem:[%s12011_s11 + $0x98] sm:$0xff] }
 0x550   : > { %9621 = vrot.lane.b32.xlu1 %v9600_v6, %s11974_s2  ;;  %2114 = vmatprep.mubr.f32.mxu1 %v12031_v63  ;;  %s12055_s2 = smov 121  }
 0x551   : > { %9616 = vrot.lane.b32.xlu0 %v9600_v6, %s12034_s28 }
 0x553   : > { %7670 = vmatmul.mubr.msk.f32.vlgmr.msra.gmra.mrb[16].mxu1 %vm1772_vm14, %v10819_v7  ;;  %v7728_v7 = vld [vmem:[%s12011_s11 + $0xb0] sm:$0xff] }
 0x554   : > { %8897 = vmatpush1.bf16.msra.mxu1 %v12035_v26  ;;  %9631 = vrot.lane.b32.xlu1 %v9600_v6, %s12036_s27  ;;  %s12051_s27 = smov 123  }
 0x555   : > { %9626 = vrot.lane.b32.xlu0 %v9600_v6, %s9795_s1  ;;  %8903 = vmatprep.subr.bf16.mxu1 %v12037_v29  ;;  %v3541_v6 = vld [vmem:[%s11928_s13 + $0x48] sm:$0xff]  ;;  %v3542_v29 = vld [vmem:[%s11928_s13 + $0x50] sm:$0xff] }
 0x556   : > { %2120 = vmatprep.mubr.f32.mxu1 %v12031_v63  ;;  %v8958_v26 = vpack.c.bf16 %v3543_v27, %v3541_v6  ;;  %v3569_v6 = vld [vmem:[%s11928_s13 + $0x128] sm:$0xff]  ;;  %v3571_v27 = vld [vmem:[%s11928_s13 + $0x138] sm:$0xff] }
 0x557   : > { %7671 = vmatmul.mubr.msk.f32.gmra.mrb[18].mxu1 %vm1772_vm14, %v10836_v10  ;;  %v9036_v10 = vpack.c.bf16 %v9539_v44, %v9538_v61  ;;  %v8972_v44 = vpack.c.bf16 %v3554_v33, %v3552_v32  ;;  %v3580_v32 = vld [vmem:[%s11928_s13 + $0x180] sm:$0xff]  ;;  %v3582_v33 = vld [vmem:[%s11928_s13 + $0x190] sm:$0xff] }
 0x558   : > { %2298 = vmatprep.mubr.f32.mxu1 %v12031_v63 }
 0x55b   : > { %7676 = vmatmul.mubr.msk.f32.vlgmr.msra.gmra.mrb[16].mxu1 %vm1772_vm14, %v10842_v2  ;;  %v9547_v2 = vpop.permute.xlu0 %9546 }
 0x55c   : > { %8905 = vmatpush1.bf16.msra.mxu1 %v12038_v35  ;;  %2304 = vmatprep.mubr.f32.mxu1 %v12031_v63  ;;  %v7733_v35 = vld [vmem:[%s12011_s11 + $0xc8] sm:$0xff] }
 0x55d   : > { %8911 = vmatprep.subr.bf16.mxu1 %v12039_v38  ;;  %v11187_v38 = vpop.f32.mrb[12].mxu0 }
 0x55f   : > { %7677 = vmatmul.mubr.msk.f32.gmra.mrb[18].mxu1 %vm1772_vm14, %v10855_v28  ;;  %v3535_v28 = vld [vmem:[%s11928_s13 + $0x18] sm:$0xff]  ;;  %v9557_v45 = vpop.permute.xlu0 %9556 }
 0x560   : > { %2488 = vmatprep.mubr.f32.mxu1 %v12031_v63  ;;  %v9559_v25 = vunpack.i.h.bf16 %v9557_v45  ;;  %v9558_v62 = vunpack.i.l.bf16 %v9557_v45  ;;  %v3566_v45 = vld [vmem:[%s11928_s13 + $0x110] sm:$0xff] }
 0x562   : > { %v9044_v34 = vpack.c.bf16 %v9559_v25, %v9558_v62 }
 0x563   : > { %7682 = vmatmul.mubr.msk.f32.vlgmr.msra.gmra.mrb[16].mxu1 %vm1772_vm14, %v10861_v20  ;;  %v3532_v20 = vld [vmem:[%s11928_s13] sm:$0xff] }
 0x564   : > { %8913 = vmatpush1.bf16.msra.mxu1 %v12040_v4  ;;  %2494 = vmatprep.mubr.f32.mxu1 %v12031_v63  ;;  %v8960_v4 = vpack.c.bf16 %v3542_v29, %v3540_v1  ;;  %v3568_v29 = vld [vmem:[%s11928_s13 + $0x120] sm:$0xff] }
 0x565   : > { %8919 = vmatprep.subr.bf16.mxu1 %v12041_v14  ;;  %v7736_v14 = vld [vmem:[%s12011_s11 + $0xd0] sm:$0xff] }
 0x567   : > { %7683 = vmatmul.mubr.msk.f32.gmra.mrb[18].mxu1 %vm1772_vm14, %v10887_v36  ;;  %v9549_v36 = vunpack.i.h.bf16 %v9547_v2 }
 0x568   : > { %2678 = vmatprep.mubr.f32.mxu1 %v12031_v63 }
 0x56b   : > { %7688 = vmatmul.mubr.msk.f32.vlgmr.msra.gmra.mrb[16].mxu1 %vm1772_vm14, %v10892_v47  ;;  %v9548_v47 = vunpack.i.l.bf16 %v9547_v2 }
 0x56c   : > { %8921 = vmatpush1.bf16.msra.mxu1 %v12042_v19  ;;  %2684 = vmatprep.mubr.f32.mxu1 %v12031_v63  ;;  %v11192_v19 = vpop.f32.mrb[13].mxu0 }
 0x56d   : > { %8927 = vmatprep.subr.bf16.mxu1 %v12043_v22  ;;  %v9040_v41 = vpack.c.bf16 %v9549_v36, %v9548_v47  ;;  %v3545_v22 = vld [vmem:[%s11928_s13 + $0x68] sm:$0xff] }
 0x56f   : > { %7689 = vmatmul.mubr.msk.f32.gmra.mrb[18].mxu1 %vm1772_vm14, %v10905_v16 }
 0x570   : > { %2868 = vmatprep.mubr.f32.mxu1 %v12031_v63 }
 0x573   : > { %7694 = vmatmul.mubr.msk.f32.vlgmr.msra.gmra.mrb[16].mxu1 %vm1772_vm14, %v10910_v55  ;;  %v3534_v55 = vld [vmem:[%s11928_s13 + $0x10] sm:$0xff] }
 0x574   : > { %8929 = vmatpush1.bf16.msra.mxu1 %v12044_v23  ;;  %2874 = vmatprep.mubr.f32.mxu1 %v12031_v63  ;;  %v3547_v23 = vld [vmem:[%s11928_s13 + $0x78] sm:$0xff] }
 0x575   : > { %8935 = vmatprep.subr.bf16.mxu1 %v12045_v30  ;;  %v3544_v30 = vld [vmem:[%s11928_s13 + $0x60] sm:$0xff]  ;;  %v8962_v39 = vpack.c.bf16 %v3547_v23, %v3545_v22  ;;  %v3575_v22 = vld [vmem:[%s11928_s13 + $0x158] sm:$0xff] }
 0x576   : > { %v8964_v54 = vpack.c.bf16 %v3546_v40, %v3544_v30  ;;  %v7748_v23 = vld [vmem:[%s12011_s11 + $0x100] sm:$0xff] }
 0x577   : > { %7695 = vmatmul.mubr.msk.f32.gmra.mrb[18].mxu1 %vm1772_vm14, %v10923_v18  ;;  %v7729_v18 = vld [vmem:[%s12011_s11 + $0xb8] sm:$0xff]  ;;  %v3572_v40 = vld [vmem:[%s11928_s13 + $0x140] sm:$0xff] }
 0x578   : > { %3058 = vmatprep.mubr.f32.mxu1 %v12031_v63 }
 0x57b   : > { %7700 = vmatmul.mubr.msk.f32.vlgmr.msra.gmra.mrb[16].mxu1 %vm1772_vm14, %v10928_v31  ;;  %v8952_v31 = vpack.c.bf16 %v3534_v55, %v3532_v20  ;;  %v3560_v55 = vld [vmem:[%s11928_s13 + $0xe0] sm:$0xff] }
 0x57c   : > { %8937 = vmatpush1.bf16.msra.mxu1 %v12046_v37  ;;  %3064 = vmatprep.mubr.f32.mxu1 %v12031_v63  ;;  %v3551_v37 = vld [vmem:[%s11928_s13 + $0x98] sm:$0xff] }
 0x57d   : > { %8943 = vmatprep.subr.bf16.mxu1 %v12047_v46  ;;  %v9567_v46 = vpop.permute.xlu0 %9566  ;;  %v8966_v56 = vpack.c.bf16 %v3551_v37, %v3549_v50  ;;  %v3574_v50 = vld [vmem:[%s11928_s13 + $0x150] sm:$0xff]  ;;  %v3577_v37 = vld [vmem:[%s11928_s13 + $0x168] sm:$0xff] }
 0x57e   : > { %v9568_v21 = vunpack.i.l.bf16 %v9567_v46 }
 0x57f   : > { %7701 = vmatmul.mubr.msk.f32.gmra.mrb[18].mxu1 %vm1772_vm14, %v10941_v43  ;;  %v7732_v43 = vld [vmem:[%s12011_s11 + $0xc0] sm:$0xff] }
 0x580   : > { %3248 = vmatprep.mubr.f32.mxu1 %v12031_v63 }
 0x581   : > { %v9577_v2 = vpop.permute.xlu0 %9576 }
 0x582   : > { %v9579_v36 = vunpack.i.h.bf16 %v9577_v2  ;;  %v9578_v47 = vunpack.i.l.bf16 %v9577_v2 }
 0x583   : > { %7706 = vmatmul.mubr.msk.f32.vlgmr.msra.gmra.mrb[16].mxu1 %vm1772_vm14, %v10946_v52  ;;  %v3537_v52 = vld [vmem:[%s11928_s13 + $0x28] sm:$0xff] }
 0x584   : > { %8945 = vmatpush1.bf16.msra.mxu1 %v8944_v13  ;;  %3254 = vmatprep.mubr.f32.mxu1 %v12031_v63  ;;  %v8968_v13 = vpack.c.bf16 %v3550_v58, %v3548_v57  ;;  %v3576_v57 = vld [vmem:[%s11928_s13 + $0x160] sm:$0xff]  ;;  %v3578_v58 = vld [vmem:[%s11928_s13 + $0x170] sm:$0xff] }
 0x585   : > { %9025 = vmatprep.subr.bf16.mxu1 %v9024_v17 }
 0x587   : > { %7707 = vmatmul.mubr.msk.f32.gmra.mrb[18].mxu1 %vm1772_vm14, %v10959_v8  ;;  %v3539_v8 = vld [vmem:[%s11928_s13 + $0x38] sm:$0xff] }
 0x588   : > { %3438 = vmatprep.mubr.f32.mxu1 %v12031_v63 }
 0x58b   : > { %7712 = vmatmul.mubr.msk.f32.vlgmr.msra.gmra.mrb[16].mxu1 %vm1772_vm14, %v10988_v59  ;;  %v8954_v59 = vpack.c.bf16 %v3539_v8, %v3537_v52  ;;  %v3567_v52 = vld [vmem:[%s11928_s13 + $0x118] sm:$0xff]  ;;  %v7744_v8 = vld [vmem:[%s12011_s11 + $0xf0] sm:$0xff] }
 0x58c   : > { %9027 = vmatpush3.bf16.msra.mxu1 %v9024_v17  ;;  %3444 = vmatprep.mubr.f32.mxu1 %v12031_v63  ;;  %v9569_v17 = vunpack.i.h.bf16 %v9567_v46  ;;  %v3579_v46 = vld [vmem:[%s11928_s13 + $0x178] sm:$0xff] }
 0x58d   : > { %9029 = vmatprep.subr.bf16.mxu1 %v10821_v24 }
 0x58e   : > { %v9048_v61 = vpack.c.bf16 %v9569_v17, %v9568_v21  ;;  %v7752_v17 = vld [vmem:[%s12011_s11 + $0x110] sm:$0xff]  ;;  %v8996_v21 = vpack.c.bf16 %v3578_v58, %v3576_v57  ;;  %v3596_v57 = vld [vmem:[%s11928_s13 + $0x200] sm:$0xff] }
 0x58f   : > { %7713 = vmatmul.mubr.msk.f32.gmra.mrb[18].mxu1 %vm1772_vm14, %v10995_v9  ;;  %v3538_v9 = vld [vmem:[%s11928_s13 + $0x30] sm:$0xff] }
 0x590   : > { %8381 = vmatprep.mubr.msk.f32.mxu1 %vm1772_vm14, %v7722_v11  ;;  %v8956_v5 = vpack.c.bf16 %v3538_v9, %v3536_v53  ;;  %v8970_v11 = vpack.c.bf16 %v3555_v15, %v3553_v60  ;;  %v3564_v9 = vld [vmem:[%s11928_s13 + $0x100] sm:$0xff]  ;;  %v7749_v60 = vld [vmem:[%s12011_s11 + $0x108] sm:$0xff]  ;;  %v3598_v58 = vld [vmem:[%s11928_s13 + $0x210] sm:$0xff] }
 0x591   : > { %v8984_v1 = vpack.c.bf16 %v3566_v45, %v3564_v9  ;;  %v3581_v15 = vld [vmem:[%s11928_s13 + $0x188] sm:$0xff]  ;;  %v4608_v45 = vld [vmem:[%s11929_s14 + $0x10] sm:$0xff] }
 0x593   : > { %8382 = vmatmul.mubr.msk.f32.vlgmr.msra.gmra.mrb[20].mxu1 %vm1772_vm14, %v7723_v42  ;;  %v7737_v42 = vld [vmem:[%s12011_s11 + $0xd8] sm:$0xff] }
 0x594   : > { %9031 = vmatpush3.bf16.msra.mxu1 %v10821_v24  ;;  %8388 = vmatprep.mubr.msk.f32.mxu1 %vm1772_vm14, %v7720_v49  ;;  %v3533_v24 = vld [vmem:[%s11928_s13 + $0x8] sm:$0xff] }
 0x595   : > { %9033 = vmatprep.subr.bf16.mxu1 %v9032_v12  ;;  %v8950_v16 = vpack.c.bf16 %v3535_v28, %v3533_v24  ;;  %v3557_v49 = vld [vmem:[%s11928_s13 + $0xc8] sm:$0xff]  ;;  %v3563_v28 = vld [vmem:[%s11928_s13 + $0xf8] sm:$0xff] }
 0x596   : > { %v3561_v24 = vld [vmem:[%s11928_s13 + $0xe8] sm:$0xff] }
 0x597   : > { %8951 = vmatprep.subr.bf16.mxu0 %v8950_v16  ;;  %v8978_v16 = vpack.c.bf16 %v3563_v28, %v3561_v24  ;;  %v3588_v28 = vld [vmem:[%s11928_s13 + $0x1c0] sm:$0xff] }
 0x598   : > { %8953 = vmatpush1.bf16.msra.mxu0 %v8952_v31  ;;  %v7741_v31 = vld [vmem:[%s12011_s11 + $0xe8] sm:$0xff] }
 0x599   : > { %8955 = vmatprep.subr.bf16.mxu0 %v8954_v59 }
 0x59b   : > { %8389 = vmatmul.mubr.msk.f32.vlgmr.msra.gmra.mrb[20].mxu1 %vm1772_vm14, %v7721_v0 }
 0x59c   : > { %9035 = vmatpush3.bf16.msra.mxu1 %v9032_v12  ;;  %8395 = vmatprep.mubr.msk.f32.mxu1 %vm1772_vm14, %v7728_v7  ;;  %v3559_v12 = vld [vmem:[%s11928_s13 + $0xd8] sm:$0xff]  ;;  %v3556_v7 = vld [vmem:[%s11928_s13 + $0xc0] sm:$0xff] }
 0x59d   : > { %9037 = vmatprep.subr.bf16.mxu1 %v9036_v10  ;;  %8957 = vmatpush1.bf16.msra.mxu0 %v8956_v5  ;;  %v8974_v0 = vpack.c.bf16 %v3559_v12, %v3557_v49  ;;  %v9587_v5 = vpop.permute.xlu0 %9586  ;;  %v3587_v49 = vld [vmem:[%s11928_s13 + $0x1b8] sm:$0xff]  ;;  %v9000_v12 = vpack.c.bf16 %v3582_v33, %v3580_v32  ;;  %v3600_v33 = vld [vmem:[%s11928_s13 + $0x220] sm:$0xff] }
 0x59e   : > { %8959 = vmatprep.subr.bf16.mxu0 %v8958_v26  ;;  %v9589_v25 = vunpack.i.h.bf16 %v9587_v5  ;;  %v9588_v62 = vunpack.i.l.bf16 %v9587_v5  ;;  %v8986_v26 = vpack.c.bf16 %v3571_v27, %v3569_v6  ;;  %v4609_v5 = vld [vmem:[%s11929_s14 + $0x18] sm:$0xff] }
 0x59f   : > { %v9064_v6 = vpack.c.bf16 %v4609_v5, %v4608_v45  ;;  %v7777_v45 = vld [vmem:[%s12011_s11 + $0x160] sm:$0xff] }
 0x5a1   : > { %8961 = vmatpush1.bf16.msra.mxu0 %v8960_v4  ;;  %v7745_v4 = vld [vmem:[%s12011_s11 + $0xf8] sm:$0xff] }
 0x5a2   : > { %8963 = vmatprep.subr.bf16.mxu0 %v8962_v39 }
 0x5a3   : > { %8396 = vmatmul.mubr.msk.f32.vlgmr.msra.gmra.mrb[20].mxu1 %vm1772_vm14, %v7729_v18  ;;  %v3562_v18 = vld [vmem:[%s11928_s13 + $0xf0] sm:$0xff] }
 0x5a4   : > { %9039 = vmatpush3.bf16.msra.mxu1 %v9036_v10  ;;  %8402 = vmatprep.mubr.msk.f32.mxu1 %vm1772_vm14, %v7732_v43  ;;  %v3558_v10 = vld [vmem:[%s11928_s13 + $0xd0] sm:$0xff]  ;;  %v3565_v43 = vld [vmem:[%s11928_s13 + $0x108] sm:$0xff]  ;;  %v8980_v53 = vpack.c.bf16 %v3562_v18, %v3560_v55  ;;  %v3592_v18 = vld [vmem:[%s11928_s13 + $0x1e0] sm:$0xff] }
 0x5a5   : > { %9041 = vmatprep.subr.bf16.mxu1 %v9040_v41  ;;  %8965 = vmatpush1.bf16.msra.mxu0 %v8964_v54  ;;  %v8976_v20 = vpack.c.bf16 %v3558_v10, %v3556_v7  ;;  %v8982_v59 = vpack.c.bf16 %v3567_v52, %v3565_v43  ;;  %v8992_v54 = vpack.c.bf16 %v3574_v50, %v3572_v40  ;;  %v3589_v7 = vld [vmem:[%s11928_s13 + $0x1c8] sm:$0xff]  ;;  %v3591_v10 = vld [vmem:[%s11928_s13 + $0x1d8] sm:$0xff]  ;;  %v5534_v40 = vld [vmem:[%s11930_s15] sm:$0xff] }
 0x5a6   : > { %8967 = vmatprep.subr.bf16.mxu0 %v8966_v56  ;;  %v8994_v56 = vpack.c.bf16 %v3579_v46, %v3577_v37  ;;  %v9006_v24 = vpack.c.bf16 %v3591_v10, %v3589_v7  ;;  %v3597_v52 = vld [vmem:[%s11928_s13 + $0x208] sm:$0xff]  ;;  %v3604_v46 = vld [vmem:[%s11927_s12] sm:$0xff]  ;;  %v7763_v10 = vld [vmem:[%s12011_s11 + $0x130] sm:$0xff] }
 0x5a7   : > { %v5535_v50 = vld [vmem:[%s11930_s15 + $0x8] sm:$0xff] }
 0x5a8   : > { %v11446_v37 = vpack.c.bf16 %v5535_v50, %v5534_v40 }
 0x5a9   : > { %8969 = vmatpush1.bf16.msra.mxu0 %v8968_v13  ;;  %v3583_v13 = vld [vmem:[%s11928_s13 + $0x198] sm:$0xff] }
 0x5aa   : > { %8971 = vmatprep.subr.bf16.mxu0 %v8970_v11  ;;  %v8998_v11 = vpack.c.bf16 %v3583_v13, %v3581_v15  ;;  %v3603_v15 = vld [vmem:[%s11928_s13 + $0x238] sm:$0x3f]  ;;  %v9522_v13 = vpop.permute.xlu1 %9521 }
 0x5ab   : > { %8403 = vmatmul.mubr.msk.f32.vlgmr.msra.gmra.mrb[20].mxu1 %vm1772_vm14, %v7733_v35  ;;  %v3570_v35 = vld [vmem:[%s11928_s13 + $0x130] sm:$0xff] }
 0x5ac   : > { %9043 = vmatpush3.bf16.msra.mxu1 %v9040_v41  ;;  %8409 = vmatprep.mubr.msk.f32.mxu1 %vm1772_vm14, %v7736_v14  ;;  %v9052_v41 = vpack.c.bf16 %v9579_v36, %v9578_v47  ;;  %v3573_v14 = vld [vmem:[%s11928_s13 + $0x148] sm:$0xff]  ;;  %v8988_v30 = vpack.c.bf16 %v3570_v35, %v3568_v29  ;;  %v3595_v47 = vld [vmem:[%s11928_s13 + $0x1f8] sm:$0xff] }
 0x5ad   : > { %9045 = vmatprep.subr.bf16.mxu1 %v9044_v34  ;;  %8973 = vmatpush1.bf16.msra.mxu0 %v8972_v44  ;;  %v8990_v39 = vpack.c.bf16 %v3575_v22, %v3573_v14  ;;  %v3584_v44 = vld [vmem:[%s11928_s13 + $0x1a0] sm:$0xff]  ;;  %v3593_v36 = vld [vmem:[%s11928_s13 + $0x1e8] sm:$0xff]  ;;  %v4613_v14 = vld [vmem:[%s11929_s14 + $0x38] sm:$0xff] }
 0x5ae   : > { %8975 = vmatprep.subr.bf16.mxu0 %v8974_v0  ;;  %v7753_v0 = vld [vmem:[%s12011_s11 + $0x118] sm:$0xff]  ;;  %v9010_v55 = vpack.c.bf16 %v3595_v47, %v3593_v36  ;;  %v9532_v7 = vpop.permute.xlu1 %9531  ;;  %v7762_v47 = vld [vmem:[%s12011_s11 + $0x128] sm:$0xff] }
 0x5b1   : > { %8977 = vmatpush1.bf16.msra.mxu0 %v8976_v20  ;;  %v3590_v20 = vld [vmem:[%s11928_s13 + $0x1d0] sm:$0xff] }
 0x5b2   : > { %8979 = vmatprep.subr.bf16.mxu0 %v8978_v16  ;;  %v9008_v16 = vpack.c.bf16 %v3590_v20, %v3588_v28  ;;  %v9542_v20 = vpop.permute.xlu1 %9541 }
 0x5b3   : > { %8410 = vmatmul.mubr.msk.f32.vlgmr.msra.gmra.mrb[20].mxu1 %vm1772_vm14, %v7737_v42  ;;  %v3585_v42 = vld [vmem:[%s11928_s13 + $0x1a8] sm:$0xff]  ;;  %v9543_v36 = vunpack.i.l.bf16 %v9542_v20 }
 0x5b4   : > { %9047 = vmatpush3.bf16.msra.mxu1 %v9044_v34  ;;  %8416 = vmatprep.mubr.msk.f32.mxu1 %vm1772_vm14, %v7740_v51  ;;  %v9056_v34 = vpack.c.bf16 %v9589_v25, %v9588_v62  ;;  %v9002_v51 = vpack.c.bf16 %v3587_v49, %v3585_v42  ;;  %v4610_v25 = vld [vmem:[%s11929_s14 + $0x20] sm:$0xff]  ;;  %v3602_v42 = vld [vmem:[%s11928_s13 + $0x230] sm:$0x3f]  ;;  %v9524_v49 = vunpack.i.h.bf16 %v9522_v13 }
 0x5b5   : > { %9049 = vmatprep.subr.bf16.mxu1 %v9048_v61  ;;  %8981 = vmatpush1.bf16.msra.mxu0 %v8980_v53 }
 0x5b6   : > { %8983 = vmatprep.subr.bf16.mxu0 %v8982_v59  ;;  %v4607_v59 = vld [vmem:[%s11929_s14 + $0x8] sm:$0xff] }
 0x5b9   : > { %8985 = vmatpush1.bf16.msra.mxu0 %v8984_v1 }
 0x5ba   : > { %8987 = vmatprep.subr.bf16.mxu0 %v8986_v26  ;;  %v4611_v26 = vld [vmem:[%s11929_s14 + $0x28] sm:$0xff] }
 0x5bb   : > { %8417 = vmatmul.mubr.msk.f32.vlgmr.msra.gmra.mrb[20].mxu1 %vm1772_vm14, %v7741_v31  ;;  %v3594_v31 = vld [vmem:[%s11928_s13 + $0x1f0] sm:$0xff]  ;;  %v9068_v29 = vpack.c.bf16 %v4611_v26, %v4610_v25  ;;  %v7778_v25 = vld [vmem:[%s12011_s11 + $0x168] sm:$0xff] }
 0x5bc   : > { %9051 = vmatpush3.bf16.msra.mxu1 %v9048_v61  ;;  %8423 = vmatprep.mubr.msk.f32.mxu1 %vm1772_vm14, %v7744_v8  ;;  %v3586_v61 = vld [vmem:[%s11928_s13 + $0x1b0] sm:$0xff]  ;;  %v9012_v43 = vpack.c.bf16 %v3594_v31, %v3592_v18  ;;  %v3599_v8 = vld [vmem:[%s11928_s13 + $0x218] sm:$0xff]  ;;  %v9552_v18 = vpop.permute.xlu1 %9551 }
 0x5bd   : > { %9053 = vmatprep.subr.bf16.mxu1 %v9052_v41  ;;  %8989 = vmatpush1.bf16.msra.mxu0 %v8988_v30  ;;  %v9004_v2 = vpack.c.bf16 %v3586_v61, %v3584_v44  ;;  %v9014_v53 = vpack.c.bf16 %v3599_v8, %v3597_v52  ;;  %v4615_v30 = vld [vmem:[%s11929_s14 + $0x48] sm:$0x3f]  ;;  %v9021_v44 = vpack.c.bf16 %v3602_v42, %v3600_v33  ;;  %v9553_v31 = vunpack.i.l.bf16 %v9552_v18  ;;  %v7773_v52 = vld [vmem:[%s12011_s11 + $0x150] sm:$0xff]  ;;  %v6455_v42 = vld [vmem:[%s11931_s16] sm:$0x3f] }
 0x5be   : > { %8991 = vmatprep.subr.bf16.mxu0 %v8990_v39 }
 0x5c1   : > { %8993 = vmatpush1.bf16.msra.mxu0 %v8992_v54  ;;  %v3605_v54 = vld [vmem:[%s11927_s12 + $0x8] sm:$0xff] }
 0x5c2   : > { %8995 = vmatprep.subr.bf16.mxu0 %v8994_v56  ;;  %v9798_v56 = vmov 0  }
 0x5c3   : > { %8424 = vmatmul.mubr.msk.f32.vlgmr.msra.gmra.mrb[20].mxu1 %vm1772_vm14, %v7745_v4  ;;  %v4612_v4 = vld [vmem:[%s11929_s14 + $0x30] sm:$0xff]  ;;  %9675 = vset.pattern.permute.xlu0 %v9798_v56 }
 0x5c4   : > { %9055 = vmatpush3.bf16.msra.mxu1 %v9052_v41  ;;  %8430 = vmatprep.mubr.msk.f32.mxu1 %vm1772_vm14, %v7748_v23  ;;  %v4606_v41 = vld [vmem:[%s11929_s14] sm:$0xff]  ;;  %v9072_v22 = vpack.c.bf16 %v4613_v14, %v4612_v4  ;;  %v9597_v4 = vpop.permute.xlu0 %9596 }
 0x5c5   : > { %9057 = vmatprep.subr.bf16.mxu1 %v9056_v34  ;;  %8997 = vmatpush1.bf16.msra.mxu0 %v8996_v21  ;;  %v9060_v9 = vpack.c.bf16 %v4607_v59, %v4606_v41  ;;  %v4614_v23 = vld [vmem:[%s11929_s14 + $0x40] sm:$0xff]  ;;  %v9016_v21 = vpack.c.bf16 %v3598_v58, %v3596_v57  ;;  %v9598_v33 = vunpack.i.l.bf16 %v9597_v4 }
 0x5c6   : > { %8999 = vmatprep.subr.bf16.mxu0 %v8998_v11  ;;  %9676 = vset.pattern.permute.xlu1 %v9798_v56  ;;  %v7789_v56 = vld [vmem:[%s12011_s11 + $0x190] sm:$0xff] }
 0x5c8   : > { %v11536_v40 = vpop.permute.xlu0 %9606 }
 0x5c9   : > { %9001 = vmatpush1.bf16.msra.mxu0 %v9000_v12  ;;  %v9523_v12 = vunpack.i.l.bf16 %v9522_v13  ;;  %v7790_v13 = vld [vmem:[%s12011_s11 + $0x198] sm:$0xff] }
 0x5ca   : > { %9003 = vmatprep.subr.bf16.mxu0 %v9002_v51 }
 0x5cb   : > { %8431 = vmatmul.mubr.msk.f32.vlgmr.msra.gmra.mrb[20].mxu1 %vm1772_vm14, %v7749_v60  ;;  %v3601_v60 = vld [vmem:[%s11928_s13 + $0x228] sm:$0xff] }
 0x5cc   : > { %9059 = vmatpush3.bf16.msra.mxu1 %v9056_v34  ;;  %8437 = vmatprep.mubr.msk.f32.mxu1 %vm1772_vm14, %v7752_v17  ;;  %v9076_v34 = vpack.c.bf16 %v4615_v30, %v4614_v23  ;;  %v9018_v32 = vpack.c.bf16 %v3603_v15, %v3601_v60  ;;  %v7782_v23 = vld [vmem:[%s12011_s11 + $0x178] sm:$0xff]  ;;  %v7785_v30 = vld [vmem:[%s12011_s11 + $0x180] sm:$0xff]  ;;  %v11545_v57 = vpop.permute.xlu0 %9616 }
 0x5cd   : > { %9005 = vmatpush1.bf16.msra.mxu0 %v9004_v2  ;;  %9061 = vmatprep.subr.bf16.mxu1 %v9060_v9  ;;  %v9534_v2 = vunpack.i.h.bf16 %v9532_v7 }
 0x5ce   : > { %9007 = vmatprep.subr.bf16.mxu0 %v9006_v24  ;;  %v9533_v24 = vunpack.i.l.bf16 %v9532_v7  ;;  %v7757_v7 = vld [vmem:[%s11927_s12 + $0x18] sm:$0xff] }
 0x5d0   : > { %v9090_v28 = vpack.c.bf16 %v9534_v2, %v9533_v24  ;;  %v11549_v60 = vpop.permute.xlu0 %9626 }
 0x5d1   : > { %9009 = vmatpush1.bf16.msra.mxu0 %v9008_v16  ;;  %v7769_v16 = vld [vmem:[%s12011_s11 + $0x140] sm:$0xff] }
 0x5d2   : > { %9011 = vmatprep.subr.bf16.mxu0 %v9010_v55 }
 0x5d3   : > { %8438 = vmatmul.mubr.msk.f32.vlgmr.msra.gmra.mrb[20].mxu1 %vm1772_vm14, %v7753_v0  ;;  %v9082_v0 = vpack.c.bf16 %v9524_v49, %v9523_v12 }
 0x5d4   : > { %9063 = vmatpush3.bf16.msra.mxu1 %v9060_v9  ;;  %v7774_v9 = vld [vmem:[%s12011_s11 + $0x158] sm:$0xff] }
 0x5d5   : > { %9013 = vmatpush1.bf16.msra.mxu0 %v9012_v43  ;;  %9065 = vmatprep.subr.bf16.mxu1 %v9064_v6  ;;  %v7770_v43 = vld [vmem:[%s12011_s11 + $0x148] sm:$0xff] }
 0x5d6   : > { %9015 = vmatprep.subr.bf16.mxu0 %v9014_v53  ;;  %v9562_v53 = vpop.permute.xlu1 %9561 }
 0x5d7   : > { %v9564_v41 = vunpack.i.h.bf16 %v9562_v53  ;;  %v9563_v59 = vunpack.i.l.bf16 %v9562_v53 }
 0x5d8   : > { %9067 = vmatpush3.bf16.msra.mxu1 %v9064_v6 }
 0x5d9   : > { %9069 = vmatprep.subr.bf16.mxu1 %v9068_v29  ;;  %v9102_v5 = vpack.c.bf16 %v9564_v41, %v9563_v59 }
 0x5da   : > { %v9572_v6 = vpop.permute.xlu1 %9571 }
 0x5dc   : > { %9071 = vmatpush3.bf16.msra.mxu1 %v9068_v29 }
 0x5dd   : > { %9073 = vmatprep.subr.bf16.mxu1 %v9072_v22 }
 0x5de   : > { %v9582_v29 = vpop.permute.xlu1 %9581 }
 0x5df   : > { %v9584_v14 = vunpack.i.h.bf16 %v9582_v29 }
 0x5e0   : > { %9075 = vmatpush3.bf16.msra.mxu1 %v9072_v22  ;;  %v9583_v22 = vunpack.i.l.bf16 %v9582_v29  ;;  %v7805_v29 = vld [vmem:[%s12011_s11 + $0x1c8] sm:$0xff] }
 0x5e1   : > { %9078 = vmatprep.subr.msk.bf16.mxu1 %vm11432_vm4, %v9076_v34 }
 0x5e2   : > { %v9592_v39 = vpop.permute.xlu1 %9591 }
 0x5e3   : > { %v9594_v50 = vunpack.i.h.bf16 %v9592_v39 }
 0x5e4   : > { %9081 = vmatpush3.bf16.msk.msra.mxu1 %vm11432_vm4, %v9076_v34  ;;  %v9110_v34 = vpack.c.bf16 %v9584_v14, %v9583_v22 }
 0x5e5   : > { %9119 = vmatprep.subr.bf16.mxu1 %v11446_v37 }
 0x61a   : > { %v8313_v27 = vpop.f32.mrb[14].mxu1 }
 0x61b   : > { %v1845_v1 = vpop.f32.mrb[15].mxu1 }
 0x61c   : > { %v9640_v62 = vpack.i.bf16 %v8313_v27, %v1845_v1  ;;  %v11414_v35 = vpack.c.bf16 %v8313_v27, %v1845_v1  ;;  %v9574_v27 = vunpack.i.h.bf16 %v9572_v6  ;;  %v9573_v1 = vunpack.i.l.bf16 %v9572_v6 }
 0x61e   : > { %9641 = vrot.lane.b32.xlu1 %v9640_v62, %s12028_s17  ;;  %9636 = vrot.lane.b32.xlu0 %v9640_v62, %s12026_s0  ;;  %v9106_v26 = vpack.c.bf16 %v9574_v27, %v9573_v1 }
 0x622   : > { %9651 = vrot.lane.b32.xlu1 %v9640_v62, %s12050_s5  ;;  %9646 = vrot.lane.b32.xlu0 %v9640_v62, %s9796_s29  ;;  %s11607_s5 = scalar_lea.vmem [#allocation3], %s7632_s6  ;;  %s7385_s6 = scalar_lea.sflag [#allocation4], %s11602_s25 }
 0x626   : > { %9661 = vrot.lane.b32.xlu1 %v9640_v62, %s12034_s28  ;;  %9656 = vrot.lane.b32.xlu0 %v9640_v62, %s12051_s27  ;;  %s12054_s28 = smov 120   ;;  %s7637_s27 = sshll.u32 %s9941_s30, 1 }
 0x627   : > { %p736_p11 = scmp.lt.s32.totalorder %s7637_s27, 3 }
 0x629   : > { %s12067_s27 = smov (!%p736_p11, %s7637_s27), 3 }
 0x62a   : > { %9671 = vrot.lane.b32.xlu1 %v9640_v62, %s12054_s28  ;;  %9666 = vrot.lane.b32.xlu0 %v9640_v62, %s12055_s2  ;;  %v7781_v62 = vld [vmem:[%s12011_s11 + $0x170] sm:$0xff]  ;;  %s7633_s28 = sshll.u32 %s11602_s25, 4  ;;  %s11713_s1 = sshll.u32 %s12067_s27, 3 }
 0x62b   : > { %s11639_s29 = scalar_lea.vmem [#allocation5], %s7633_s28  ;;  %s739_s26 = scalar_lea.vmem %s11935_s20, %s11713_s1 }
 0x62c   : > { %s7419_s27 = sshll.u32 %s11607_s5, 4  ;;  %s7435_s7 = sshll.u32 %s11639_s29, 4  ;;  %s11818_s27 = int_to_ptr.vmem [resolvable:$true] %s7419_s27  ;;  %s11820_s7 = int_to_ptr.vmem [resolvable:$true] %s7435_s7 }
 0x62d   : > { %s11826_s2 = scalar_lea.hbm %s11933_s18, %s7892_s4  ;;  %s9678_s0 = scalar_lea.vmem %s11818_s27, 512 }
 0x62e   : > { %3608 = vperm.xlu0 %9675, %v3604_v46   ;;  %3613 = vperm.xlu1 %9676, %v3605_v54   ;;  %v9593_v46 = vunpack.i.l.bf16 %v9592_v39  ;;  %v7786_v54 = vld [vmem:[%s12011_s11 + $0x188] sm:$0xff]  ;;  %v9609_v39 = vunpack.i.h.bf16 %v11536_v40  ;;  %p9679_p12 = scmp.ne.s32.totalorder %s11818_s27, %s9678_s0 }
 0x630   : > { %v9114_v58 = vpack.c.bf16 %v9594_v50, %v9593_v46  ;;  %v9608_v50 = vunpack.i.l.bf16 %v11536_v40  ;;  %v7803_v46 = vld [vmem:[%s12011_s11 + $0x1b8] sm:$0xff]  ;;  %p9680_p13 = pnand %p9679_p12, %p9958_p5 }
 0x632   : > { %4626 = vperm.xlu0 %9675, %v7757_v7   ;;  %v7826_v7 = vld [vmem:[%s12011_s11 + $0x210] sm:$0xff]  ;;  %p9681_p0 = pneg %p9680_p13 }
 0x65e   : > { %v3440_v17 = vpop.f32.mrb[16].mxu1 }
 0x65f   : > { %v3442_v11 = vpop.f32.mrb[17].mxu1 }
 0x660   : > { %3694 = vmatprep.mubr.f32.mxu0 %v3442_v11  ;;  %v7793_v11 = vld [vmem:[%s12011_s11 + $0x1a0] sm:$0xff] }
 0x661   : > { %3695 = vmatmul.mubr.f32.vlgmr.msra.gmra.mrb[14].mxu0 %v3440_v17 }
 0x662   : > { %9017 = vmatpush1.bf16.msra.mxu0 %v9016_v21  ;;  %v3446_v51 = vpop.f32.mrb[18].mxu1  ;;  %v5536_v21 = vld [vmem:[%s11930_s15 + $0x10] sm:$0x3f] }
 0x663   : > { %v3448_v61 = vpop.f32.mrb[19].mxu1  ;;  %9020 = vmatprep.subr.msk.bf16.mxu0 %vm11432_vm4, %v9018_v32  ;;  %v9599_v32 = vunpack.i.h.bf16 %v9597_v4  ;;  %v7802_v4 = vld [vmem:[%s12011_s11 + $0x1b0] sm:$0xff] }
 0x664   : > { %3700 = vmatprep.mubr.f32.mxu0 %v3448_v61  ;;  %v7794_v61 = vld [vmem:[%s12011_s11 + $0x1a8] sm:$0xff] }
 0x665   : > { %3701 = vmatmul.mubr.f32.gmra.mrb[16].mxu0 %v3446_v51  ;;  %v9122_v12 = vpack.c.bf16 %v9599_v32, %v9598_v33  ;;  %v7818_v32 = vld [vmem:[%s12011_s11 + $0x1f0] sm:$0xff] }
 0x666   : > { %9023 = vmatpush1.bf16.msk.msra.mxu0 %vm11432_vm4, %v9021_v44  ;;  %3771 = vmatprep.mubr.f32.mxu0 %v12031_v63 }
 0x667   : > { %9083 = vmatprep.subr.bf16.mxu0 %v9082_v0 }
 0x669   : > { %7718 = vmatmul.mubr.msk.f32.vlgmr.msra.gmra.mrb[14].mxu0 %vm3616_vm5, %v11192_v19  ;;  %v7764_v19 = vld [vmem:[%s12011_s11 + $0x138] sm:$0xff] }
 0x66a   : > { %9085 = vmatpush3.bf16.msra.mxu0 %v9082_v0  ;;  %3777 = vmatprep.mubr.f32.mxu0 %v12031_v63  ;;  %v7761_v63 = vld [vmem:[%s12011_s11 + $0x120] sm:$0xff] }
 0x66b   : > { %9087 = vmatprep.subr.bf16.mxu0 %v10975_v3 }
 0x66d   : > { %7719 = vmatmul.mubr.msk.f32.gmra.mrb[16].mxu0 %vm3616_vm5, %v11187_v38  ;;  %v9544_v38 = vunpack.i.h.bf16 %v9542_v20 }
 0x66e   : > { %8467 = vmatprep.mubr.msk.f32.mxu0 %vm1772_vm14, %v7763_v10  ;;  %v9602_v10 = vpop.permute.xlu1 %9601 }
 0x66f   : > { %v9094_v55 = vpack.c.bf16 %v9544_v38, %v9543_v36 }
 0x671   : > { %8468 = vmatmul.mubr.msk.f32.vlgmr.msra.gmra.mrb[18].mxu0 %vm1772_vm14, %v7764_v19 }
 0x672   : > { %9089 = vmatpush3.bf16.msra.mxu0 %v10975_v3  ;;  %8474 = vmatprep.mubr.msk.f32.mxu0 %vm1772_vm14, %v7761_v63  ;;  %v9554_v3 = vunpack.i.h.bf16 %v9552_v18  ;;  %v11583_v2 = vpop.permute.xlu1 %9611 }
 0x673   : > { %9091 = vmatprep.subr.bf16.mxu0 %v9090_v28  ;;  %v9614_v40 = vunpack.i.h.bf16 %v11583_v2 }
 0x674   : > { %v9098_v8 = vpack.c.bf16 %v9554_v3, %v9553_v31 }
 0x676   : > { %v11585_v24 = vpop.permute.xlu1 %9621 }
 0x679   : > { %8475 = vmatmul.mubr.msk.f32.vlgmr.msra.gmra.mrb[18].mxu0 %vm1772_vm14, %v7762_v47 }
 0x67a   : > { %9093 = vmatpush3.bf16.msra.mxu0 %v9090_v28  ;;  %8481 = vmatprep.mubr.msk.f32.mxu0 %vm1772_vm14, %v7769_v16  ;;  %v11587_v19 = vpop.permute.xlu1 %9631 }
 0x67b   : > { %9095 = vmatprep.subr.bf16.mxu0 %v9094_v55 }
 0x681   : > { %8482 = vmatmul.mubr.msk.f32.vlgmr.msra.gmra.mrb[18].mxu0 %vm1772_vm14, %v7770_v43 }
 0x682   : > { %9097 = vmatpush3.bf16.msra.mxu0 %v9094_v55  ;;  %8488 = vmatprep.mubr.msk.f32.mxu0 %vm1772_vm14, %v7773_v52 }
 0x683   : > { %9099 = vmatprep.subr.bf16.mxu0 %v9098_v8 }
 0x689   : > { %8489 = vmatmul.mubr.msk.f32.vlgmr.msra.gmra.mrb[18].mxu0 %vm1772_vm14, %v7774_v9  ;;  %v7797_v9 = vld [vmem:[%s11927_s12 + $0x20] sm:$0xff] }
 0x68a   : > { %9101 = vmatpush3.bf16.msra.mxu0 %v9098_v8  ;;  %8495 = vmatprep.mubr.msk.f32.mxu0 %vm1772_vm14, %v7777_v45  ;;  %v7798_v45 = vld [vmem:[%s11927_s12 + $0x28] sm:$0xff] }
 0x68b   : > { %9103 = vmatprep.subr.bf16.mxu0 %v9102_v5 }
 0x690   : > { %v9637_v49 = vpop.permute.xlu0 %9636  ;;  %v11589_v63 = vpop.permute.xlu1 %9641 }
 0x691   : > { %8496 = vmatmul.mubr.msk.f32.vlgmr.msra.gmra.mrb[18].mxu0 %vm1772_vm14, %v7778_v25  ;;  %v9639_v51 = vunpack.i.h.bf16 %v9637_v49  ;;  %v9638_v44 = vunpack.i.l.bf16 %v9637_v49  ;;  %v7804_v25 = vld [vmem:[%s12011_s11 + $0x1c0] sm:$0xff]  ;;  %v9623_v49 = vunpack.i.l.bf16 %v11585_v24 }
 0x692   : > { %9105 = vmatpush3.bf16.msra.mxu0 %v9102_v5  ;;  %8502 = vmatprep.mubr.msk.f32.mxu0 %vm1772_vm14, %v7781_v62  ;;  %v9604_v62 = vunpack.i.h.bf16 %v9602_v10 }
 0x693   : > { %9107 = vmatprep.subr.bf16.mxu0 %v9106_v26  ;;  %v11572_v0 = vpack.c.bf16 %v9639_v51, %v9638_v44  ;;  %v9629_v44 = vunpack.i.h.bf16 %v11549_v60 }
 0x694   : > { %v11591_v28 = vpop.permute.xlu0 %9646  ;;  %v11593_v20 = vpop.permute.xlu1 %9651 }
 0x698   : > { %v11595_v38 = vpop.permute.xlu0 %9656  ;;  %v11597_v36 = vpop.permute.xlu1 %9661 }
 0x699   : > { %8503 = vmatmul.mubr.msk.f32.vlgmr.msra.gmra.mrb[18].mxu0 %vm1772_vm14, %v7782_v23 }
 0x69a   : > { %9109 = vmatpush3.bf16.msra.mxu0 %v9106_v26  ;;  %8509 = vmatprep.mubr.msk.f32.mxu0 %vm1772_vm14, %v7785_v30  ;;  %v9603_v26 = vunpack.i.l.bf16 %v9602_v10 }
 0x69b   : > { %9111 = vmatprep.subr.bf16.mxu0 %v9110_v34 }
 0x69c   : > { %v11599_v47 = vpop.permute.xlu0 %9666  ;;  %v11605_v16 = vpop.permute.xlu1 %9671  ;;  %v9130_v14 = vpack.c.bf16 %v9604_v62, %v9603_v26  ;;  %v7846_v62 = vld [vmem:[%s12011_s11 + $0x258] sm:$0xff]  ;;  %v7843_v26 = vld [vmem:[%s12011_s11 + $0x240] sm:$0xff] }
 0x6a1   : > { %8510 = vmatmul.mubr.msk.f32.vlgmr.msra.gmra.mrb[18].mxu0 %vm1772_vm14, %v7786_v54  ;;  %v9134_v54 = vpack.c.bf16 %v9609_v39, %v9608_v50  ;;  %v9659_v39 = vunpack.i.h.bf16 %v11595_v38  ;;  %v9658_v50 = vunpack.i.l.bf16 %v11595_v38  ;;  %v7860_v38 = vld [vmem:[%s12011_s11 + $0x288] sm:$0xff] }
 0x6a2   : > { %9113 = vmatpush3.bf16.msra.mxu0 %v9110_v34  ;;  %8516 = vmatprep.mubr.msk.f32.mxu0 %vm1772_vm14, %v7789_v56  ;;  %v9613_v56 = vunpack.i.l.bf16 %v11583_v2  ;;  %v9634_v2 = vunpack.i.h.bf16 %v11587_v19 }
 0x6a3   : > { %9115 = vmatprep.subr.bf16.mxu0 %v9114_v58 }
 0x6a6   : > { %v8439_v15 = vpop.f32.mrb[20].mxu1 }
 0x6a7   : > { %v4595_v17 = vpop.f32.mrb[21].mxu1 }
 0x6a8   : > { %8460 = vmatprep.mubr.msk.f32.mxu1 %vm4629_vm6, %v4595_v17  ;;  %v9619_v17 = vunpack.i.h.bf16 %v11545_v57 }
 0x6a9   : > { %8461 = vmatmul.mubr.msk.f32.vlgmr.msra.gmra.mrb[22].mxu1 %vm4629_vm6, %v8439_v15  ;;  %8517 = vmatmul.mubr.msk.f32.vlgmr.msra.gmra.mrb[18].mxu0 %vm1772_vm14, %v7790_v13  ;;  %v7814_v15 = vld [vmem:[%s12011_s11 + $0x1e0] sm:$0xff]  ;;  %v9138_v13 = vpack.c.bf16 %v9614_v40, %v9613_v56  ;;  %v9663_v40 = vunpack.i.l.bf16 %v11597_v36  ;;  %v7863_v56 = vld [vmem:[%s12011_s11 + $0x290] sm:$0xff] }
 0x6aa   : > { %9117 = vmatpush3.bf16.msra.mxu0 %v9114_v58  ;;  %9121 = vmatpush3.bf16.msra.mxu1 %v11446_v37  ;;  %v7756_v37 = vld [vmem:[%s11927_s12 + $0x10] sm:$0xff]  ;;  %v7811_v58 = vld [vmem:[%s12011_s11 + $0x1d8] sm:$0xff] }
 0x6ab   : > { %8530 = vmatprep.subr.msk.mxu1 %vm3623_vm0, %v5536_v21  ;;  %8523 = vmatprep.mubr.msk.f32.mxu0 %vm1772_vm14, %v7793_v11  ;;  %v7815_v11 = vld [vmem:[%s12011_s11 + $0x1e8] sm:$0xff] }
 0x6ac   : > { %8598 = vmatprep.subr.msk.mxu0 %vm3623_vm0, %v6455_v42  ;;  %4621 = vperm.xlu1 %9676, %v7756_v37   ;;  %v7823_v37 = vld [vmem:[%s12011_s11 + $0x208] sm:$0xff] }
 0x6ad   : > { %v3609_v55 = vpop.permute.xlu0 %3608  ;;  %v3614_v52 = vpop.permute.xlu1 %3613 }
 0x6ae   : > { %8531 = vmatpush3.msk.msra.mxu1 %vm3623_vm0, %v5536_v21  ;;  %v9618_v21 = vunpack.i.l.bf16 %v11545_v57  ;;  %v7819_v57 = vld [vmem:[%s12011_s11 + $0x1f8] sm:$0xff] }
 0x6af   : > { %9123 = vmatprep.subr.bf16.mxu1 %v9122_v12 }
 0x6b0   : > { %5542 = vperm.xlu1 %9676, %v7797_v9   ;;  %v9142_v33 = vpack.c.bf16 %v9619_v17, %v9618_v21  ;;  %v7838_v9 = vld [vmem:[%s11927_s12 + $0x30] sm:$0xff]  ;;  %v7867_v17 = vld [vmem:[%s12011_s11 + $0x2a0] sm:$0xff] }
 0x6b1   : > { %8524 = vmatmul.mubr.msk.f32.vlgmr.msra.gmra.mrb[18].mxu0 %vm1772_vm14, %v7794_v61  ;;  %v4627_v23 = vpop.permute.xlu0 %4626  ;;  %v9628_v61 = vunpack.i.l.bf16 %v11549_v60  ;;  %v9633_v60 = vunpack.i.l.bf16 %v11587_v19  ;;  %v7834_v19 = vld [vmem:[%s12011_s11 + $0x230] sm:$0xff]  ;;  %6461 = vperm.xlu0 %9675, %v7838_v9  }
 0x6b2   : > { %8599 = vmatpush3.msk.msra.mxu0 %vm3623_vm0, %v6455_v42  ;;  %v9624_v42 = vunpack.i.h.bf16 %v11585_v24  ;;  %v7827_v24 = vld [vmem:[%s12011_s11 + $0x218] sm:$0xff] }
 0x6b3   : > { %9159 = vmatprep.subr.bf16.mxu0 %v11572_v0  ;;  %v9150_v10 = vpack.c.bf16 %v9629_v44, %v9628_v61 }
 0x6b4   : > { %5547 = vperm.xlu1 %9676, %v7798_v45   ;;  %v9146_v51 = vpack.c.bf16 %v9624_v42, %v9623_v49  ;;  %v7839_v45 = vld [vmem:[%s11927_s12 + $0x38] sm:$0xff]  ;;  %v7875_v49 = vld [vmem:[%s12011_s11 + $0x2c0] sm:$0xff] }
 0x6b5   : > { %6466 = vperm.xlu0 %9675, %v7839_v45  }
 0x72b   : > { %v4622_v22 = vpop.permute.xlu1 %4621 }
 0x73c   : > { %v3773_v18 = vpop.f32.mrb[14].mxu0 }
 0x73d   : > { %v9198_v3 = vadd.f32 %v3773_v18, %v3609_v55  ;;  %v3775_v31 = vpop.f32.mrb[15].mxu0  ;;  %v9154_v18 = vpack.c.bf16 %v9634_v2, %v9633_v60 }
 0x73e   : > { %v9199_v43 = vadd.f32 %v3775_v31, %v3609_v55  ;;  %v7830_v55 = vld [vmem:[%s12011_s11 + $0x220] sm:$0xff]  ;;  %v7835_v31 = vld [vmem:[%s12011_s11 + $0x238] sm:$0xff] }
 0x73f   : > { %3784 = vst [vmem:[%s11607_s5] sm:$0xff] %v9198_v3  ;;  %v7831_v3 = vld [vmem:[%s12011_s11 + $0x228] sm:$0xff] }
 0x740   : > { %3785 = vst [vmem:[%s11607_s5 + $0x8] sm:$0xff] %v9199_v43  ;;  %v3779_v8 = vpop.f32.mrb[16].mxu0  ;;  %v5543_v43 = vpop.permute.xlu1 %5542 }
 0x741   : > { %v9200_v53 = vadd.f32 %v3779_v8, %v3614_v52  ;;  %v3781_v41 = vpop.f32.mrb[17].mxu0 }
 0x742   : > { %v9201_v59 = vadd.f32 %v3781_v41, %v3614_v52 }
 0x743   : > { %3786 = vst [vmem:[%s11607_s5 + $0x10] sm:$0xff] %v9200_v53 }
 0x744   : > { %3787 = vst [vmem:[%s11607_s5 + $0x18] sm:$0xff] %v9201_v59  ;;  %v5548_v52 = vpop.permute.xlu1 %5547  ;;  %s9799_s5 = smov [#allocation3]  }
 0x77c   : > { %v8462_v5 = vpop.f32.mrb[22].mxu1 }
 0x77d   : > { %v4705_v6 = vpop.f32.mrb[23].mxu1  ;;  %v4711_v30 = vadd.f32 %v8462_v5, %v4627_v23  ;;  %v9653_v23 = vunpack.i.l.bf16 %v11593_v20 }
 0x77e   : > { %v4706_v34 = vadd.f32 %v4705_v6, %v4622_v22 }
 0x77f   : > { %4715 = vst.msk [vmem:[%s11639_s29 + $0x8] sm:$0xff] %vm1216_vm3, %v4711_v30  ;;  %v7855_v30 = vld [vmem:[%s12011_s11 + $0x270] sm:$0xff] }
 0x780   : > { %4714 = vst.msk [vmem:[%s11639_s29] sm:$0xff] %vm1216_vm3, %v4706_v34  ;;  %vm6469_vm3 = vcmask 48128   ;;  %s9682_s29 = sshll.u32 %s9799_s5, 4  ;;  %s9683_s29 = int_to_ptr.vmem [resolvable:$false] %s9682_s29 }
 0x781   : > { %s9684_s17 = scalar_lea.vmem %s9683_s29, 1024  ;;  %p9685_p1 = scmp.lt.s32.totalorder %s11818_s27, %s9683_s29 }
 0x782   : > { %p9686_p2 = scmp.lt.s32.totalorder %s9684_s17, %s9678_s0 }
 0x784   : > { %v8525_v27 = vpop.f32.mrb[18].mxu0  ;;  %p9687_p3 = por %p9686_p2, %p9685_p1 }
 0x785   : > { %v5523_v1 = vpop.f32.mrb[19].mxu0 }
 0x786   : > { %8532 = vmatprep.mubr.msk.f32.mxu1 %vm5550_vm7, %v5523_v1  ;;  %v9644_v1 = vunpack.i.h.bf16 %v11589_v63  ;;  %p9688_p4 = pnand %p9687_p3, %p9681_p0 }
 0x787   : > { %8533 = vmatmul.mubr.msk.f32.vlgmr.msra.gmra.mrb[24].mxu1 %vm5550_vm7, %v8525_v27  ;;  %v7845_v27 = vld [vmem:[%s12011_s11 + $0x250] sm:$0xff] }
 0x788   : > { %9125 = vmatpush3.bf16.msra.mxu1 %v9122_v12  ;;  %8539 = vmatprep.mubr.msk.f32.mxu1 %vm1772_vm14, %v7804_v25  ;;  %v7822_v12 = vld [vmem:[%s12011_s11 + $0x200] sm:$0xff]  ;;  %v9643_v25 = vunpack.i.l.bf16 %v11589_v63  ;;  %v9648_v63 = vunpack.i.l.bf16 %v11591_v28 }
 0x789   : > { %9127 = vmatprep.subr.bf16.mxu1 %v11005_v48 }
 0x78b   : > { %8540 = vmatmul.mubr.msk.f32.vlgmr.msra.gmra.mrb[26].mxu1 %vm1772_vm14, %v7805_v29  ;;  %v9166_v29 = vpack.c.bf16 %v9644_v1, %v9643_v25 }
 0x78c   : > { %9129 = vmatpush3.bf16.msra.mxu1 %v11005_v48  ;;  %8546 = vmatprep.mubr.msk.f32.mxu1 %vm1772_vm14, %v7802_v4  ;;  %v7810_v48 = vld [vmem:[%s12011_s11 + $0x1d0] sm:$0xff]  ;;  %v7844_v4 = vld [vmem:[%s12011_s11 + $0x248] sm:$0xff] }
 0x78d   : > { %9131 = vmatprep.subr.bf16.mxu1 %v9130_v14 }
 0x793   : > { %8547 = vmatmul.mubr.msk.f32.vlgmr.msra.gmra.mrb[26].mxu1 %vm1772_vm14, %v7803_v46  ;;  %v7859_v46 = vld [vmem:[%s12011_s11 + $0x280] sm:$0xff] }
 0x794   : > { %9133 = vmatpush3.bf16.msra.mxu1 %v9130_v14  ;;  %8553 = vmatprep.mubr.msk.f32.mxu1 %vm1772_vm14, %v7810_v48  ;;  %v7851_v14 = vld [vmem:[%s12011_s11 + $0x260] sm:$0xff]  ;;  %v9178_v48 = vpack.c.bf16 %v9659_v39, %v9658_v50 }
 0x795   : > { %9135 = vmatprep.subr.bf16.mxu1 %v9134_v54 }
 0x79b   : > { %8554 = vmatmul.mubr.msk.f32.vlgmr.msra.gmra.mrb[26].mxu1 %vm1772_vm14, %v7811_v58 }
 0x79c   : > { %9137 = vmatpush3.bf16.msra.mxu1 %v9134_v54  ;;  %8560 = vmatprep.mubr.msk.f32.mxu1 %vm1772_vm14, %v7814_v15  ;;  %v9664_v54 = vunpack.i.h.bf16 %v11597_v36  ;;  %v9669_v15 = vunpack.i.h.bf16 %v11599_v47  ;;  %v7864_v36 = vld [vmem:[%s12011_s11 + $0x298] sm:$0xff] }
 0x79d   : > { %9139 = vmatprep.subr.bf16.mxu1 %v9138_v13 }
 0x79e   : > { %v9182_v58 = vpack.c.bf16 %v9664_v54, %v9663_v40 }
 0x7a3   : > { %8561 = vmatmul.mubr.msk.f32.vlgmr.msra.gmra.mrb[26].mxu1 %vm1772_vm14, %v7815_v11  ;;  %v9674_v11 = vunpack.i.h.bf16 %v11605_v16 }
 0x7a4   : > { %9141 = vmatpush3.bf16.msra.mxu1 %v9138_v13  ;;  %8567 = vmatprep.mubr.msk.f32.mxu1 %vm1772_vm14, %v7818_v32  ;;  %v9668_v13 = vunpack.i.l.bf16 %v11599_v47  ;;  %v9673_v47 = vunpack.i.l.bf16 %v11605_v16  ;;  %v7868_v32 = vld [vmem:[%s12011_s11 + $0x2a8] sm:$0xff]  ;;  %v7872_v16 = vld [vmem:[%s12011_s11 + $0x2b8] sm:$0xff] }
 0x7a5   : > { %9143 = vmatprep.subr.bf16.mxu1 %v9142_v33 }
 0x7a6   : > { %v9186_v21 = vpack.c.bf16 %v9669_v15, %v9668_v13  ;;  %v9190_v42 = vpack.c.bf16 %v9674_v11, %v9673_v47 }
 0x7ab   : > { %8568 = vmatmul.mubr.msk.f32.vlgmr.msra.gmra.mrb[26].mxu1 %vm1772_vm14, %v7819_v57  ;;  %v7876_v57 = vld [vmem:[%s12011_s11 + $0x2c8] sm:$0xff] }
 0x7ac   : > { %9145 = vmatpush3.bf16.msra.mxu1 %v9142_v33  ;;  %8574 = vmatprep.mubr.msk.f32.mxu1 %vm1772_vm14, %v7822_v12  ;;  %v7871_v33 = vld [vmem:[%s12011_s11 + $0x2b0] sm:$0xff] }
 0x7ad   : > { %9147 = vmatprep.subr.bf16.mxu1 %v9146_v51 }
 0x7b3   : > { %8575 = vmatmul.mubr.msk.f32.vlgmr.msra.gmra.mrb[26].mxu1 %vm1772_vm14, %v7823_v37 }
 0x7b4   : > { %9149 = vmatpush3.bf16.msra.mxu1 %v9146_v51  ;;  %8581 = vmatprep.mubr.msk.f32.mxu1 %vm1772_vm14, %v7826_v7 }
 0x7b5   : > { %9151 = vmatprep.subr.bf16.mxu1 %v9150_v10 }
 0x7bb   : > { %8582 = vmatmul.mubr.msk.f32.vlgmr.msra.gmra.mrb[26].mxu1 %vm1772_vm14, %v7827_v24 }
 0x7bc   : > { %9153 = vmatpush3.bf16.msra.mxu1 %v9150_v10  ;;  %8588 = vmatprep.mubr.msk.f32.mxu1 %vm1772_vm14, %v7830_v55 }
 0x7bd   : > { %9155 = vmatprep.subr.bf16.mxu1 %v9154_v18 }
 0x7c3   : > { %8589 = vmatmul.mubr.msk.f32.vlgmr.msra.gmra.mrb[26].mxu1 %vm1772_vm14, %v7831_v3 }
 0x7c4   : > { %9157 = vmatpush3.bf16.msra.mxu1 %v9154_v18  ;;  %8595 = vmatprep.mubr.msk.f32.mxu1 %vm1772_vm14, %v7834_v19 }
 0x7cb   : > { %8596 = vmatmul.mubr.msk.f32.vlgmr.msra.gmra.mrb[26].mxu1 %vm1772_vm14, %v7835_v31 }
 0x85a   : > { %v8534_v8 = vpop.f32.mrb[24].mxu1 }
 0x85b   : > { %v5626_v53 = vpop.f32.mrb[25].mxu1  ;;  %v5632_v59 = vadd.f32 %v8534_v8, %v5548_v52 }
 0x85c   : > { %v5627_v41 = vadd.f32 %v5626_v53, %v5543_v43 }
 0x85d   : > { %5636 = vst.msk [vmem:[%s739_s26 + $0x8] sm:$0xff] %vm1772_vm14, %v5632_v59 }
 0x85e   : > { %5635 = vst.msk [vmem:[%s739_s26] sm:$0xff] %vm1772_vm14, %v5627_v41 }
 0x89e   : > { %v8597_v5 = vpop.f32.mrb[26].mxu1 }
 0x89f   : > { %v6444_v6 = vpop.f32.mrb[27].mxu1 }
 0x8a0   : > { %8600 = vmatprep.mubr.msk.f32.mxu0 %vm6469_vm3, %v6444_v6 }
 0x8a1   : > { %8601 = vmatmul.mubr.msk.f32.vlgmr.msra.gmra.mrb[20].mxu0 %vm6469_vm3, %v8597_v5 }
 0x8a2   : > { %9161 = vmatpush3.bf16.msra.mxu0 %v11572_v0  ;;  %8607 = vmatprep.mubr.msk.f32.mxu0 %vm1772_vm14, %v7845_v27  ;;  %v9649_v0 = vunpack.i.h.bf16 %v11591_v28  ;;  %v7852_v28 = vld [vmem:[%s12011_s11 + $0x268] sm:$0xff] }
 0x8a3   : > { %9163 = vmatprep.subr.bf16.mxu0 %v11414_v35 }
 0x8a4   : > { %v9170_v22 = vpack.c.bf16 %v9649_v0, %v9648_v63 }
 0x8a5   : > { %8608 = vmatmul.mubr.msk.f32.vlgmr.msra.gmra.mrb[22].mxu0 %vm1772_vm14, %v7846_v62 }
 0x8a6   : > { %9165 = vmatpush3.bf16.msra.mxu0 %v11414_v35  ;;  %8614 = vmatprep.mubr.msk.f32.mxu0 %vm1772_vm14, %v7843_v26  ;;  %v9654_v35 = vunpack.i.h.bf16 %v11593_v20  ;;  %v7856_v20 = vld [vmem:[%s12011_s11 + $0x278] sm:$0xff] }
 0x8a7   : > { %9167 = vmatprep.subr.bf16.mxu0 %v9166_v29 }
 0x8a8   : > { %v9174_v34 = vpack.c.bf16 %v9654_v35, %v9653_v23 }
 0x8ad   : > { %8615 = vmatmul.mubr.msk.f32.vlgmr.msra.gmra.mrb[22].mxu0 %vm1772_vm14, %v7844_v4 }
 0x8ae   : > { %9169 = vmatpush3.bf16.msra.mxu0 %v9166_v29  ;;  %8621 = vmatprep.mubr.msk.f32.mxu0 %vm1772_vm14, %v7851_v14 }
 0x8af   : > { %9171 = vmatprep.subr.bf16.mxu0 %v9170_v22 }
 0x8b5   : > { %8622 = vmatmul.mubr.msk.f32.vlgmr.msra.gmra.mrb[22].mxu0 %vm1772_vm14, %v7852_v28 }
 0x8b6   : > { %9173 = vmatpush3.bf16.msra.mxu0 %v9170_v22  ;;  %8628 = vmatprep.mubr.msk.f32.mxu0 %vm1772_vm14, %v7855_v30 }
 0x8b7   : > { %9175 = vmatprep.subr.bf16.mxu0 %v9174_v34 }
 0x8bd   : > { %8629 = vmatmul.mubr.msk.f32.vlgmr.msra.gmra.mrb[22].mxu0 %vm1772_vm14, %v7856_v20 }
 0x8be   : > { %9177 = vmatpush3.bf16.msra.mxu0 %v9174_v34  ;;  %8635 = vmatprep.mubr.msk.f32.mxu0 %vm1772_vm14, %v7859_v46 }
 0x8bf   : > { %9179 = vmatprep.subr.bf16.mxu0 %v9178_v48 }
 0x8c5   : > { %8636 = vmatmul.mubr.msk.f32.vlgmr.msra.gmra.mrb[22].mxu0 %vm1772_vm14, %v7860_v38 }
 0x8c6   : > { %9181 = vmatpush3.bf16.msra.mxu0 %v9178_v48  ;;  %8642 = vmatprep.mubr.msk.f32.mxu0 %vm1772_vm14, %v7863_v56 }
 0x8c7   : > { %9183 = vmatprep.subr.bf16.mxu0 %v9182_v58 }
 0x8cd   : > { %8643 = vmatmul.mubr.msk.f32.vlgmr.msra.gmra.mrb[22].mxu0 %vm1772_vm14, %v7864_v36 }
 0x8ce   : > { %9185 = vmatpush3.bf16.msra.mxu0 %v9182_v58  ;;  %8649 = vmatprep.mubr.msk.f32.mxu0 %vm1772_vm14, %v7867_v17 }
 0x8cf   : > { %9187 = vmatprep.subr.bf16.mxu0 %v9186_v21 }
 0x8d5   : > { %8650 = vmatmul.mubr.msk.f32.vlgmr.msra.gmra.mrb[22].mxu0 %vm1772_vm14, %v7868_v32 }
 0x8d6   : > { %9189 = vmatpush3.bf16.msra.mxu0 %v9186_v21  ;;  %8656 = vmatprep.mubr.msk.f32.mxu0 %vm1772_vm14, %v7871_v33 }
 0x8d7   : > { %9191 = vmatprep.subr.bf16.mxu0 %v9190_v42 }
 0x8dd   : > { %8657 = vmatmul.mubr.msk.f32.vlgmr.msra.gmra.mrb[22].mxu0 %vm1772_vm14, %v7872_v16 }
 0x8de   : > { %9193 = vmatpush3.bf16.msra.mxu0 %v9190_v42  ;;  %8663 = vmatprep.mubr.msk.f32.mxu0 %vm1772_vm14, %v7875_v49 }
 0x8e5   : > { %8664 = vmatmul.mubr.msk.f32.vlgmr.msra.gmra.mrb[22].mxu0 %vm1772_vm14, %v7876_v57 }
 0x8e6   : > { %9691 = shalt.err (!%p9688_p4)
}
 0x8e7   : > { %s9692_s8 = scalar_lea.hbm %s11826_s2, 512  ;;  %s9696_s26 = scalar_lea.hbm %s11933_s18, 1024 }
 0x8e8   : > { %p9693_p7 = scmp.ne.s32.totalorder %s11826_s2, %s9692_s8  ;;  %p9697_p10 = scmp.lt.u32.totalorder %s11826_s2, %s11933_s18 }
 0x8e9   : > { %p9698_p11 = scmp.lt.u32.totalorder %s9696_s26, %s9692_s8  ;;  %p9700_p13 = scmp.lt.u32.totalorder %s9692_s8, %s11826_s2 }
 0x8ea   : > { %p9694_p8 = pnand %p9693_p7, %p9958_p5 }
 0x8eb   : > { %p9699_p12 = por %p9698_p11, %p9697_p10 }
 0x8ec   : > { %p9695_p9 = pneg %p9694_p8 }
 0x8ed   : > { %p9701_p0 = por %p9700_p13, %p9699_p12 }
 0x8ef   : > { %p9702_p1 = pnand %p9701_p0, %p9695_p9 }
 0x8f1   : > { %9705 = shalt.err (!%p9702_p1)
}
 0x8f2   : > { %s9800_s0 = smov 256   ;;  %s9801_s29 = smov 16  }
 0x8f3   : > { %9322 = dma.vmem_to_hbm [thread:$0]  (%p9958_p5), %s11818_s27, 512, %s11826_s2, %s7385_s6, %s9800_s0, %s9800_s0, %s9801_s29  }
 0x8f4   : > { %s7893_s17 = sshll.u32 %s9941_s30, 8  ;;  %s7390_s26 = scalar_lea.sflag [#allocation6], %s11602_s25 }
 0x8f5   : > { %s11856_s4 = scalar_lea.hbm %s11934_s19, %s7893_s17  ;;  %s9706_s28 = scalar_lea.vmem %s11820_s7, 256 }
 0x8f6   : > { %p9707_p2 = scmp.ne.s32.totalorder %s11820_s7, %s9706_s28  ;;  %s9802_s5 = smov [#allocation5]  }
 0x8f7   : > { %s9710_s10 = sshll.u32 %s9802_s5, 4  ;;  %s9711_s10 = int_to_ptr.vmem [resolvable:$false] %s9710_s10 }
 0x8f8   : > { %p9708_p3 = pnand %p9707_p2, %p9958_p5  ;;  %s9712_s11 = scalar_lea.vmem %s9711_s10, 512 }
 0x8f9   : > { %p9713_p7 = scmp.lt.s32.totalorder %s11820_s7, %s9711_s10  ;;  %p9714_p8 = scmp.lt.s32.totalorder %s9712_s11, %s9706_s28 }
 0x8fa   : > { %p9709_p4 = pneg %p9708_p3 }
 0x8fb   : > { %p9715_p9 = por %p9714_p8, %p9713_p7 }
 0x8fd   : > { %p9716_p10 = pnand %p9715_p9, %p9709_p4 }
 0x8ff   : > { %9719 = shalt.err (!%p9716_p10)
}
 0x900   : > { %s9720_s30 = scalar_lea.hbm %s11856_s4, 256  ;;  %s9724_s6 = scalar_lea.hbm %s11934_s19, 512 }
 0x901   : > { %p9721_p11 = scmp.ne.s32.totalorder %s11856_s4, %s9720_s30  ;;  %p9725_p0 = scmp.lt.u32.totalorder %s11856_s4, %s11934_s19 }
 0x902   : > { %p9726_p1 = scmp.lt.u32.totalorder %s9724_s6, %s9720_s30  ;;  %p9728_p3 = scmp.lt.u32.totalorder %s9720_s30, %s11856_s4 }
 0x903   : > { %p9722_p12 = pnand %p9721_p11, %p9958_p5 }
 0x904   : > { %p9727_p2 = por %p9726_p1, %p9725_p0 }
 0x905   : > { %p9723_p13 = pneg %p9722_p12 }
 0x906   : > { %p9729_p4 = por %p9728_p3, %p9727_p2 }
 0x908   : > { %p9730_p7 = pnand %p9729_p4, %p9723_p13 }
 0x90a   : > { %9733 = shalt.err (!%p9730_p7)
}
 0x90b   : > { %s9803_s11 = smov 128   ;;  %s9804_s29 = smov 8   ;;  %v6462_v12 = vpop.permute.xlu0 %6461  ;;  %v7879_v10 = vld [vmem:[%s11927_s12 + $0x40] sm:$0xff]  ;;  %v7880_v60 = vld [vmem:[%s11927_s12 + $0x48] sm:$0xff]  ;;  %vm7381_vm8 = vcmask 7168  }
 0x90c   : > { %9323 = dma.vmem_to_hbm [thread:$0]  (%p9958_p5), %s11820_s7, 256, %s11856_s4, %s7390_s26, %s9803_s11, %s9803_s11, %s9804_s29  }
 0x90d   : > { %s12056_s9 = sld [smem:[#allocation27_spill]]  ;;  %s12057_s26 = sld [smem:[#allocation28_spill]] }
 0x90f   : > { %v6467_v51 = vpop.permute.xlu0 %6466 }
 0x913   : > { %s745_s28 = scalar_lea.vmem %s12056_s9, %s11713_s1  ;;  %s751_s27 = scalar_lea.vmem %s12057_s26, %s11713_s1 }
 0x974   : > { %v8602_v44 = vpop.f32.mrb[20].mxu0 }
 0x975   : > { %v6545_v61 = vpop.f32.mrb[21].mxu0  ;;  %v6551_v7 = vadd.f32 %v8602_v44, %v6467_v51 }
 0x976   : > { %v6546_v37 = vadd.f32 %v6545_v61, %v6462_v12 }
 0x977   : > { %6555 = vst.msk [vmem:[%s745_s28 + $0x8] sm:$0xff] %vm764_vm1, %v6551_v7 }
 0x978   : > { %6554 = vst.msk [vmem:[%s745_s28] sm:$0xff] %vm764_vm1, %v6546_v37 }
 0x9b8   : > { %v8665_v2 = vpop.f32.mrb[22].mxu0 }
 0x9b9   : > { %v7365_v24 = vpop.f32.mrb[23].mxu0  ;;  %v7380_v18 = vadd.f32 %v8665_v2, %v7880_v60 }
 0x9ba   : > { %v7379_v55 = vadd.f32 %v7879_v10, %v7365_v24 }
 0x9bb   : > { %7383 = vst.msk [vmem:[%s751_s27 + $0x8] sm:$0xff] %vm7381_vm8, %v7380_v18 }
 0x9bc   : > { %7382 = vst.msk [vmem:[%s751_s27] sm:$0xff] %vm7381_vm8, %v7379_v55 }
 0x9bd PF: > { %s12058_s2 = sld [smem:[#allocation11_spill]]  ;;  %s12059_s6 = sld [smem:[#allocation9_spill]] }
 0x9c3   : > { %p9333_p5 = scmp.ge.s32.totalorder %s12058_s2, 2  ;;  %s7462_s10 = sand.u32 1, %s12059_s6  }
 0x9c4   : > { %s7463_s11 = scalar_lea.sflag [#allocation4], %s7462_s10 }
 0x9c5   : > { %p9327_p8 = pnand %p9333_p5, %p9962_p6 }
 0x9c7   : > { %9751 = dma.done.wait (!%p9327_p8), %s7463_s11, 512  }
 0x9c8   : > { %9753 = vsyncadd (!%p9327_p8), %s7463_s11, 4294966784  ;;  %s7472_s29 = scalar_lea.sflag [#allocation6], %s7462_s10 }
 0x9c9   : > { %9755 = dma.done.wait (!%p9327_p8), %s7472_s29, 256  }
 0x9ca   : > { %9757 = vsyncadd (!%p9327_p8), %s7472_s29, 4294967040  ;;  %s12061_s29 = sld [smem:[#allocation12_spill]]  ;;  %s12062_s1 = sld [smem:[#allocation10_spill]] }
 0x9cb   : > { %s12063_s28 = sld [smem:[#allocation13_spill]]  ;;  %s12064_s17 = smov %s9764_s3 }
 0x9d0   : > { %p38_p9 = scmp.ge.s32.totalorder %s12061_s29, 4   ;;  %s12065_s3 = smov %s12062_s1 }
 0x9d2   :  { %40 = sbr.rel (!%p38_p9) target bundleno = 20 (0x14), region = 231 }
 0x9d9   :  { %7501 = vsyncpa [#allocation4], 1 }
 0x9da   :  { %7503 = vsyncpa [#allocation4 + $0x1], 1 }
 0x9db   :  { %7504 = vsyncpa [#allocation6], 1 }
 0x9dc   :  { %7506 = vsyncpa [#allocation6 + $0x1], 1 }

</bundles_post_ra>
